<compile_context>
chip_gen: v6e
topology: v6e:2x2x1
jax: 0.10.0
libtpu: 0.0.40
codegen_flags: <defaults>
</compile_context>

<pallas_src>
import jax
import jax.numpy as jnp
from jax.experimental import pallas as pl
from jax.experimental.pallas import tpu as pltpu


def _round_up(x, m):
    return (x + m - 1) // m * m


def _cdiv(a, b):
    return -(-a // b)


def basic_conv2d_forward(x, w, gamma, beta, running_mean, running_var,
                         *, stride=1, padding=0, dilation=1, eps=1e-5,
                         max_cin_block=256):
    """x: (B, Cin, H, W) f32, w: (Cout, Cin, k, k) f32 -> (B, Cout, Ho, Wo) f32."""
    if stride != 1:
        raise NotImplementedError("stride > 1 not implemented")  # TODO(synk)
    B, Cin, H, W = x.shape
    Cout, Cin_w, KH, KW = w.shape
    assert Cin_w == Cin and KH == KW
    K = KH
    KK = K * K
    halo = dilation * (K - 1)
    H_out = H + 2 * padding - halo
    W_out = W + 2 * padding - halo

    # --- padded geometry (lane/sublane friendly) -----------------------------
    W_p = _round_up(W + 2 * padding, 8)          # padded row length, mult of 8
    extra_w = W_p - (W + 2 * padding)
    H_p = H + 2 * padding
    extra_h = _cdiv(halo, W_p) if halo > 0 else 0  # room for the largest tap end
    H_p_ext = H_p + extra_h
    HPW = H_p_ext * W_p
    M_acc = H_out * W_p                          # accumulator rows (padded cols)

    Cin_p = _round_up(Cin, 128)
    CBLK = max_cin_block if Cin_p % max_cin_block == 0 else 128
    n_cb = Cin_p // CBLK
    Np = _round_up(Cout, 128)                    # lane-dense output channels

    # M-chunk rows so the f32 accumulator stays <= ~16 vregs (64 KiB).
    mt_target = max(8, (128 * 128) // Np)
    rows_per_chunk = max(1, min(H_out, mt_target // W_p))

    # --- wrapper-side layout plumbing (glue; hoist out of hot path in a real
    #     network: keep activations in padded NHWC bf16 and fold weights once) --
    x_nhwc = jnp.transpose(x, (0, 2, 3, 1)).astype(jnp.bfloat16)
    x_pad = jnp.pad(x_nhwc, ((0, 0),
                             (padding, padding + extra_h),
                             (padding, padding + extra_w),
                             (0, Cin_p - Cin)))
    x_flat = x_pad.reshape(B, HPW, Cin_p)        # flat padded-row slab

    # Fold BN scale into the weights; keep only the bias.
    scale = gamma / jnp.sqrt(running_var + eps)
    bias = beta - running_mean * scale
    w_f = w * scale[:, None, None, None]
    w_t = jnp.transpose(w_f, (2, 3, 1, 0)).reshape(KK, Cin, Cout)
    w_t = jnp.pad(w_t, ((0, 0), (0, Cin_p - Cin), (0, Np - Cout)))
    w_bf = w_t.astype(jnp.bfloat16)              # (KK, Cin_p, Np)
    bias_p = jnp.pad(bias, (0, Np - Cout)).reshape(1, Np).astype(jnp.float32)

    # --- fused conv + folded-BN kernel ---------------------------------------
    def kernel(x_ref, w_ref, b_ref, o_ref):
        c = pl.program_id(1)
        bvec = b_ref[...]                        # (1, Np) f32

        for y0 in range(0, H_out, rows_per_chunk):
            rows = min(rows_per_chunk, H_out - y0)
            m0 = y0 * W_p
            mt = rows * W_p
            acc = None
            for dy in range(K):
                for dx in range(K):
                    off = m0 + (dy * W_p + dx) * dilation       # static
                    patch = x_ref[0, pl.ds(off, mt), :]          # (mt, CBLK) bf16
                    part = jnp.dot(patch, w_ref[dy * K + dx],
                                   preferred_element_type=jnp.float32)
                    acc = part if acc is None else acc + part

            if n_cb == 1:
                o_ref[0, pl.ds(m0, mt), :] = acc + bvec
            else:
                @pl.when(c == 0)
                def _first():
                    o_ref[0, pl.ds(m0, mt), :] = acc + bvec

                @pl.when(c != 0)
                def _rest():
                    o_ref[0, pl.ds(m0, mt), :] += acc

    out = pl.pallas_call(
        kernel,
        out_shape=jax.ShapeDtypeStruct((B, M_acc, Np), jnp.float32),
        grid_spec=pltpu.PrefetchScalarGridSpec(
            num_scalar_prefetch=0,
            grid=(B, n_cb),
            in_specs=[
                pl.BlockSpec((1, HPW, CBLK), lambda b, c: (b, 0, c)),
                pl.BlockSpec((KK, CBLK, Np), lambda b, c: (0, c, 0)),
                pl.BlockSpec((1, Np), lambda b, c: (0, 0)),
            ],
            out_specs=pl.BlockSpec((1, M_acc, Np), lambda b, c: (b, 0, 0)),
        ),
        compiler_params=pltpu.CompilerParams(
            dimension_semantics=("parallel", "arbitrary")),
    )(x_flat, w_bf, bias_p)

    # (B, H_out*W_p, Np) -> crop pad columns / pad channels -> NCHW.
    out = out.reshape(B, H_out, W_p, Np)[:, :, :W_out, :Cout]
    return jnp.transpose(out, (0, 3, 1, 2))


def _reference(x, w, gamma, beta, rmean, rvar, *, padding, dilation, eps=1e-5):
    """Same bf16-rounded folded operands, XLA conv (HIGHEST) + bias."""
    scale = gamma / jnp.sqrt(rvar + eps)
    w_f = (w * scale[:, None, None, None]).astype(jnp.bfloat16).astype(jnp.float32)
    x_f = x.astype(jnp.bfloat16).astype(jnp.float32)
    y = jax.lax.conv_general_dilated(
        x_f, w_f, window_strides=(1, 1),
        padding=((padding, padding), (padding, padding)),
        rhs_dilation=(dilation, dilation),
        dimension_numbers=("NCHW", "OIHW", "NCHW"),
        precision=jax.lax.Precision.HIGHEST)
    bias = beta - rmean * scale
    return y + bias[None, :, None, None]


if __name__ == "__main__":
    key = jax.random.PRNGKey(0)

    configs = [
        # (B, Cin, Cout, H, W, K, pad, dil, max_cin_block)
        (2, 64, 32, 16, 16, 3, 1, 1, 256),    # single Cin block, 3x3
        (1, 256, 48, 14, 14, 3, 2, 2, 128),   # forces n_cb=2 (accumulate path), dilation=2
        (2, 96, 32, 8, 8, 1, 0, 1, 256),      # 1x1 conv
    ]

    for (B, Cin, Cout, H, W, K, PAD, DIL, MCB) in configs:
        key, k1, k2, k3, k4, k5, k6 = jax.random.split(key, 7)
        x = jax.random.normal(k1, (B, Cin, H, W), jnp.float32)
        w = 0.05 * jax.random.normal(k2, (Cout, Cin, K, K), jnp.float32)
        gamma = 1.0 + 0.1 * jax.random.normal(k3, (Cout,), jnp.float32)
        beta = 0.1 * jax.random.normal(k4, (Cout,), jnp.float32)
        rmean = 0.1 * jax.random.normal(k5, (Cout,), jnp.float32)
        rvar = jnp.abs(1.0 + 0.1 * jax.random.normal(k6, (Cout,), jnp.float32))

        fwd = jax.jit(lambda *a, p=PAD, d=DIL, m=MCB:
                      basic_conv2d_forward(*a, stride=1, padding=p, dilation=d,
                                           max_cin_block=m))
        out = jax.block_until_ready(fwd(x, w, gamma, beta, rmean, rvar))

        H_out = H + 2 * PAD - DIL * (K - 1)
        W_out = W + 2 * PAD - DIL * (K - 1)
        assert out.shape == (B, Cout, H_out, W_out), out.shape
        assert bool(jnp.all(jnp.isfinite(out)))

        ref = _reference(x, w, gamma, beta, rmean, rvar, padding=PAD, dilation=DIL)
        err = float(jnp.max(jnp.abs(out - ref)))
        assert err < 2e-2, (err, (B, Cin, Cout, H, W, K, PAD, DIL))

    print("KERNEL_OK")
</pallas_src>

<mosaic_0001>
module attributes {stable_mosaic.version = 11 : i64} {
  func.func @kernel(%arg0: i32, %arg1: i32, %arg2: memref<1x456x128xbf16, #tpu.memory_space<vmem>>, %arg3: memref<9x128x128xbf16, #tpu.memory_space<vmem>>, %arg4: memref<1x128xf32, #tpu.memory_space<vmem>>, %arg5: memref<1x384x128xf32, #tpu.memory_space<vmem>>) attributes {dimension_semantics = [#tpu.dimension_semantics<parallel>, #tpu.dimension_semantics<arbitrary>], iteration_bounds = array<i64: 2, 1>, scalar_prefetch = 0 : i64, scratch_operands = 0 : i64, tpu.core_type = #tpu.core_type<tc>, window_params = [{transform_indices = @transform_0, window_bounds = array<i64: 1, 456, 128>}, {transform_indices = @transform_1, window_bounds = array<i64: 9, 128, 128>}, {pipeline_mode = #tpu.pipeline_mode<synchronous>, transform_indices = @transform_2, window_bounds = array<i64: 1, 128>}, {transform_indices = @transform_3, window_bounds = array<i64: 1, 384, 128>}]} {
    %c0 = arith.constant 0 : index
    %c0_0 = arith.constant 0 : index
    %0 = vector.load %arg4[%c0, %c0_0] : memref<1x128xf32, #tpu.memory_space<vmem>>, vector<1x128xf32>
    %c0_1 = arith.constant 0 : index
    %c0_2 = arith.constant 0 : index
    %c0_3 = arith.constant 0 : index
    %1 = vector.load %arg2[%c0_1, %c0_2, %c0_3] : memref<1x456x128xbf16, #tpu.memory_space<vmem>>, vector<1x120x128xbf16>
    %2 = vector.shape_cast %1 : vector<1x120x128xbf16> to vector<120x128xbf16>
    %c0_4 = arith.constant 0 : index
    %c0_5 = arith.constant 0 : index
    %c0_6 = arith.constant 0 : index
    %3 = vector.load %arg3[%c0_4, %c0_5, %c0_6] : memref<9x128x128xbf16, #tpu.memory_space<vmem>>, vector<1x128x128xbf16>
    %4 = vector.shape_cast %3 : vector<1x128x128xbf16> to vector<128x128xbf16>
    %cst = arith.constant dense<0.000000e+00> : vector<120x128xf32>
    %5 = tpu.matmul %2, %4, %cst {dimension_numbers = #tpu.dot_dimension_numbers<[1], [0], [0], [1], [0, 0, 1, 1], [], []>} : vector<120x128xbf16>, vector<128x128xbf16>, vector<120x128xf32> -> vector<120x128xf32>
    %c0_7 = arith.constant 0 : index
    %c1 = arith.constant 1 : index
    %c0_8 = arith.constant 0 : index
    %6 = vector.load %arg2[%c0_7, %c1, %c0_8] : memref<1x456x128xbf16, #tpu.memory_space<vmem>>, vector<1x120x128xbf16>
    %7 = vector.shape_cast %6 : vector<1x120x128xbf16> to vector<120x128xbf16>
    %c1_9 = arith.constant 1 : index
    %c0_10 = arith.constant 0 : index
    %c0_11 = arith.constant 0 : index
    %8 = vector.load %arg3[%c1_9, %c0_10, %c0_11] : memref<9x128x128xbf16, #tpu.memory_space<vmem>>, vector<1x128x128xbf16>
    %9 = vector.shape_cast %8 : vector<1x128x128xbf16> to vector<128x128xbf16>
    %cst_12 = arith.constant dense<0.000000e+00> : vector<120x128xf32>
    %10 = tpu.matmul %7, %9, %cst_12 {dimension_numbers = #tpu.dot_dimension_numbers<[1], [0], [0], [1], [0, 0, 1, 1], [], []>} : vector<120x128xbf16>, vector<128x128xbf16>, vector<120x128xf32> -> vector<120x128xf32>
    %11 = arith.addf %5, %10 : vector<120x128xf32>
    %c0_13 = arith.constant 0 : index
    %c2 = arith.constant 2 : index
    %c0_14 = arith.constant 0 : index
    %12 = vector.load %arg2[%c0_13, %c2, %c0_14] : memref<1x456x128xbf16, #tpu.memory_space<vmem>>, vector<1x120x128xbf16>
    %13 = vector.shape_cast %12 : vector<1x120x128xbf16> to vector<120x128xbf16>
    %c2_15 = arith.constant 2 : index
    %c0_16 = arith.constant 0 : index
    %c0_17 = arith.constant 0 : index
    %14 = vector.load %arg3[%c2_15, %c0_16, %c0_17] : memref<9x128x128xbf16, #tpu.memory_space<vmem>>, vector<1x128x128xbf16>
    %15 = vector.shape_cast %14 : vector<1x128x128xbf16> to vector<128x128xbf16>
    %cst_18 = arith.constant dense<0.000000e+00> : vector<120x128xf32>
    %16 = tpu.matmul %13, %15, %cst_18 {dimension_numbers = #tpu.dot_dimension_numbers<[1], [0], [0], [1], [0, 0, 1, 1], [], []>} : vector<120x128xbf16>, vector<128x128xbf16>, vector<120x128xf32> -> vector<120x128xf32>
    %17 = arith.addf %11, %16 : vector<120x128xf32>
    %c0_19 = arith.constant 0 : index
    %c24 = arith.constant 24 : index
    %c0_20 = arith.constant 0 : index
    %18 = vector.load %arg2[%c0_19, %c24, %c0_20] : memref<1x456x128xbf16, #tpu.memory_space<vmem>>, vector<1x120x128xbf16>
    %19 = vector.shape_cast %18 : vector<1x120x128xbf16> to vector<120x128xbf16>
    %c3 = arith.constant 3 : index
    %c0_21 = arith.constant 0 : index
    %c0_22 = arith.constant 0 : index
    %20 = vector.load %arg3[%c3, %c0_21, %c0_22] : memref<9x128x128xbf16, #tpu.memory_space<vmem>>, vector<1x128x128xbf16>
    %21 = vector.shape_cast %20 : vector<1x128x128xbf16> to vector<128x128xbf16>
    %cst_23 = arith.constant dense<0.000000e+00> : vector<120x128xf32>
    %22 = tpu.matmul %19, %21, %cst_23 {dimension_numbers = #tpu.dot_dimension_numbers<[1], [0], [0], [1], [0, 0, 1, 1], [], []>} : vector<120x128xbf16>, vector<128x128xbf16>, vector<120x128xf32> -> vector<120x128xf32>
    %23 = arith.addf %17, %22 : vector<120x128xf32>
    %c0_24 = arith.constant 0 : index
    %c25 = arith.constant 25 : index
    %c0_25 = arith.constant 0 : index
    %24 = vector.load %arg2[%c0_24, %c25, %c0_25] : memref<1x456x128xbf16, #tpu.memory_space<vmem>>, vector<1x120x128xbf16>
    %25 = vector.shape_cast %24 : vector<1x120x128xbf16> to vector<120x128xbf16>
    %c4 = arith.constant 4 : index
    %c0_26 = arith.constant 0 : index
    %c0_27 = arith.constant 0 : index
    %26 = vector.load %arg3[%c4, %c0_26, %c0_27] : memref<9x128x128xbf16, #tpu.memory_space<vmem>>, vector<1x128x128xbf16>
    %27 = vector.shape_cast %26 : vector<1x128x128xbf16> to vector<128x128xbf16>
    %cst_28 = arith.constant dense<0.000000e+00> : vector<120x128xf32>
    %28 = tpu.matmul %25, %27, %cst_28 {dimension_numbers = #tpu.dot_dimension_numbers<[1], [0], [0], [1], [0, 0, 1, 1], [], []>} : vector<120x128xbf16>, vector<128x128xbf16>, vector<120x128xf32> -> vector<120x128xf32>
    %29 = arith.addf %23, %28 : vector<120x128xf32>
    %c0_29 = arith.constant 0 : index
    %c26 = arith.constant 26 : index
    %c0_30 = arith.constant 0 : index
    %30 = vector.load %arg2[%c0_29, %c26, %c0_30] : memref<1x456x128xbf16, #tpu.memory_space<vmem>>, vector<1x120x128xbf16>
    %31 = vector.shape_cast %30 : vector<1x120x128xbf16> to vector<120x128xbf16>
    %c5 = arith.constant 5 : index
    %c0_31 = arith.constant 0 : index
    %c0_32 = arith.constant 0 : index
    %32 = vector.load %arg3[%c5, %c0_31, %c0_32] : memref<9x128x128xbf16, #tpu.memory_space<vmem>>, vector<1x128x128xbf16>
    %33 = vector.shape_cast %32 : vector<1x128x128xbf16> to vector<128x128xbf16>
    %cst_33 = arith.constant dense<0.000000e+00> : vector<120x128xf32>
    %34 = tpu.matmul %31, %33, %cst_33 {dimension_numbers = #tpu.dot_dimension_numbers<[1], [0], [0], [1], [0, 0, 1, 1], [], []>} : vector<120x128xbf16>, vector<128x128xbf16>, vector<120x128xf32> -> vector<120x128xf32>
    %35 = arith.addf %29, %34 : vector<120x128xf32>
    %c0_34 = arith.constant 0 : index
    %c48 = arith.constant 48 : index
    %c0_35 = arith.constant 0 : index
    %36 = vector.load %arg2[%c0_34, %c48, %c0_35] : memref<1x456x128xbf16, #tpu.memory_space<vmem>>, vector<1x120x128xbf16>
    %37 = vector.shape_cast %36 : vector<1x120x128xbf16> to vector<120x128xbf16>
    %c6 = arith.constant 6 : index
    %c0_36 = arith.constant 0 : index
    %c0_37 = arith.constant 0 : index
    %38 = vector.load %arg3[%c6, %c0_36, %c0_37] : memref<9x128x128xbf16, #tpu.memory_space<vmem>>, vector<1x128x128xbf16>
    %39 = vector.shape_cast %38 : vector<1x128x128xbf16> to vector<128x128xbf16>
    %cst_38 = arith.constant dense<0.000000e+00> : vector<120x128xf32>
    %40 = tpu.matmul %37, %39, %cst_38 {dimension_numbers = #tpu.dot_dimension_numbers<[1], [0], [0], [1], [0, 0, 1, 1], [], []>} : vector<120x128xbf16>, vector<128x128xbf16>, vector<120x128xf32> -> vector<120x128xf32>
    %41 = arith.addf %35, %40 : vector<120x128xf32>
    %c0_39 = arith.constant 0 : index
    %c49 = arith.constant 49 : index
    %c0_40 = arith.constant 0 : index
    %42 = vector.load %arg2[%c0_39, %c49, %c0_40] : memref<1x456x128xbf16, #tpu.memory_space<vmem>>, vector<1x120x128xbf16>
    %43 = vector.shape_cast %42 : vector<1x120x128xbf16> to vector<120x128xbf16>
    %c7 = arith.constant 7 : index
    %c0_41 = arith.constant 0 : index
    %c0_42 = arith.constant 0 : index
    %44 = vector.load %arg3[%c7, %c0_41, %c0_42] : memref<9x128x128xbf16, #tpu.memory_space<vmem>>, vector<1x128x128xbf16>
    %45 = vector.shape_cast %44 : vector<1x128x128xbf16> to vector<128x128xbf16>
    %cst_43 = arith.constant dense<0.000000e+00> : vector<120x128xf32>
    %46 = tpu.matmul %43, %45, %cst_43 {dimension_numbers = #tpu.dot_dimension_numbers<[1], [0], [0], [1], [0, 0, 1, 1], [], []>} : vector<120x128xbf16>, vector<128x128xbf16>, vector<120x128xf32> -> vector<120x128xf32>
    %47 = arith.addf %41, %46 : vector<120x128xf32>
    %c0_44 = arith.constant 0 : index
    %c50 = arith.constant 50 : index
    %c0_45 = arith.constant 0 : index
    %48 = vector.load %arg2[%c0_44, %c50, %c0_45] : memref<1x456x128xbf16, #tpu.memory_space<vmem>>, vector<1x120x128xbf16>
    %49 = vector.shape_cast %48 : vector<1x120x128xbf16> to vector<120x128xbf16>
    %c8 = arith.constant 8 : index
    %c0_46 = arith.constant 0 : index
    %c0_47 = arith.constant 0 : index
    %50 = vector.load %arg3[%c8, %c0_46, %c0_47] : memref<9x128x128xbf16, #tpu.memory_space<vmem>>, vector<1x128x128xbf16>
    %51 = vector.shape_cast %50 : vector<1x128x128xbf16> to vector<128x128xbf16>
    %cst_48 = arith.constant dense<0.000000e+00> : vector<120x128xf32>
    %52 = tpu.matmul %49, %51, %cst_48 {dimension_numbers = #tpu.dot_dimension_numbers<[1], [0], [0], [1], [0, 0, 1, 1], [], []>} : vector<120x128xbf16>, vector<128x128xbf16>, vector<120x128xf32> -> vector<120x128xf32>
    %53 = arith.addf %47, %52 : vector<120x128xf32>
    %54 = vector.broadcast %0 : vector<1x128xf32> to vector<120x128xf32>
    %55 = arith.addf %53, %54 : vector<120x128xf32>
    %c0_49 = arith.constant 0 : index
    %c0_50 = arith.constant 0 : index
    %c0_51 = arith.constant 0 : index
    %56 = vector.load %arg5[%c0_49, %c0_50, %c0_51] : memref<1x384x128xf32, #tpu.memory_space<vmem>>, vector<1x120x128xf32>
    %57 = vector.shape_cast %56 : vector<1x120x128xf32> to vector<120x128xf32>
    %58 = vector.shape_cast %55 : vector<120x128xf32> to vector<1x120x128xf32>
    tpu.vector_store %arg5[%c0_49, %c0_50, %c0_51], %58 {strides = array<i32>} : memref<1x384x128xf32, #tpu.memory_space<vmem>>, vector<1x120x128xf32>,
    %c0_52 = arith.constant 0 : index
    %c120 = arith.constant 120 : index
    %c0_53 = arith.constant 0 : index
    %59 = vector.load %arg2[%c0_52, %c120, %c0_53] : memref<1x456x128xbf16, #tpu.memory_space<vmem>>, vector<1x120x128xbf16>
    %60 = vector.shape_cast %59 : vector<1x120x128xbf16> to vector<120x128xbf16>
    %c0_54 = arith.constant 0 : index
    %c0_55 = arith.constant 0 : index
    %c0_56 = arith.constant 0 : index
    %61 = vector.load %arg3[%c0_54, %c0_55, %c0_56] : memref<9x128x128xbf16, #tpu.memory_space<vmem>>, vector<1x128x128xbf16>
    %62 = vector.shape_cast %61 : vector<1x128x128xbf16> to vector<128x128xbf16>
    %cst_57 = arith.constant dense<0.000000e+00> : vector<120x128xf32>
    %63 = tpu.matmul %60, %62, %cst_57 {dimension_numbers = #tpu.dot_dimension_numbers<[1], [0], [0], [1], [0, 0, 1, 1], [], []>} : vector<120x128xbf16>, vector<128x128xbf16>, vector<120x128xf32> -> vector<120x128xf32>
    %c0_58 = arith.constant 0 : index
    %c121 = arith.constant 121 : index
    %c0_59 = arith.constant 0 : index
    %64 = vector.load %arg2[%c0_58, %c121, %c0_59] : memref<1x456x128xbf16, #tpu.memory_space<vmem>>, vector<1x120x128xbf16>
    %65 = vector.shape_cast %64 : vector<1x120x128xbf16> to vector<120x128xbf16>
    %c1_60 = arith.constant 1 : index
    %c0_61 = arith.constant 0 : index
    %c0_62 = arith.constant 0 : index
    %66 = vector.load %arg3[%c1_60, %c0_61, %c0_62] : memref<9x128x128xbf16, #tpu.memory_space<vmem>>, vector<1x128x128xbf16>
    %67 = vector.shape_cast %66 : vector<1x128x128xbf16> to vector<128x128xbf16>
    %cst_63 = arith.constant dense<0.000000e+00> : vector<120x128xf32>
    %68 = tpu.matmul %65, %67, %cst_63 {dimension_numbers = #tpu.dot_dimension_numbers<[1], [0], [0], [1], [0, 0, 1, 1], [], []>} : vector<120x128xbf16>, vector<128x128xbf16>, vector<120x128xf32> -> vector<120x128xf32>
    %69 = arith.addf %63, %68 : vector<120x128xf32>
    %c0_64 = arith.constant 0 : index
    %c122 = arith.constant 122 : index
    %c0_65 = arith.constant 0 : index
    %70 = vector.load %arg2[%c0_64, %c122, %c0_65] : memref<1x456x128xbf16, #tpu.memory_space<vmem>>, vector<1x120x128xbf16>
    %71 = vector.shape_cast %70 : vector<1x120x128xbf16> to vector<120x128xbf16>
    %c2_66 = arith.constant 2 : index
    %c0_67 = arith.constant 0 : index
    %c0_68 = arith.constant 0 : index
    %72 = vector.load %arg3[%c2_66, %c0_67, %c0_68] : memref<9x128x128xbf16, #tpu.memory_space<vmem>>, vector<1x128x128xbf16>
    %73 = vector.shape_cast %72 : vector<1x128x128xbf16> to vector<128x128xbf16>
    %cst_69 = arith.constant dense<0.000000e+00> : vector<120x128xf32>
    %74 = tpu.matmul %71, %73, %cst_69 {dimension_numbers = #tpu.dot_dimension_numbers<[1], [0], [0], [1], [0, 0, 1, 1], [], []>} : vector<120x128xbf16>, vector<128x128xbf16>, vector<120x128xf32> -> vector<120x128xf32>
    %75 = arith.addf %69, %74 : vector<120x128xf32>
    %c0_70 = arith.constant 0 : index
    %c144 = arith.constant 144 : index
    %c0_71 = arith.constant 0 : index
    %76 = vector.load %arg2[%c0_70, %c144, %c0_71] : memref<1x456x128xbf16, #tpu.memory_space<vmem>>, vector<1x120x128xbf16>
    %77 = vector.shape_cast %76 : vector<1x120x128xbf16> to vector<120x128xbf16>
    %c3_72 = arith.constant 3 : index
    %c0_73 = arith.constant 0 : index
    %c0_74 = arith.constant 0 : index
    %78 = vector.load %arg3[%c3_72, %c0_73, %c0_74] : memref<9x128x128xbf16, #tpu.memory_space<vmem>>, vector<1x128x128xbf16>
    %79 = vector.shape_cast %78 : vector<1x128x128xbf16> to vector<128x128xbf16>
    %cst_75 = arith.constant dense<0.000000e+00> : vector<120x128xf32>
    %80 = tpu.matmul %77, %79, %cst_75 {dimension_numbers = #tpu.dot_dimension_numbers<[1], [0], [0], [1], [0, 0, 1, 1], [], []>} : vector<120x128xbf16>, vector<128x128xbf16>, vector<120x128xf32> -> vector<120x128xf32>
    %81 = arith.addf %75, %80 : vector<120x128xf32>
    %c0_76 = arith.constant 0 : index
    %c145 = arith.constant 145 : index
    %c0_77 = arith.constant 0 : index
    %82 = vector.load %arg2[%c0_76, %c145, %c0_77] : memref<1x456x128xbf16, #tpu.memory_space<vmem>>, vector<1x120x128xbf16>
    %83 = vector.shape_cast %82 : vector<1x120x128xbf16> to vector<120x128xbf16>
    %c4_78 = arith.constant 4 : index
    %c0_79 = arith.constant 0 : index
    %c0_80 = arith.constant 0 : index
    %84 = vector.load %arg3[%c4_78, %c0_79, %c0_80] : memref<9x128x128xbf16, #tpu.memory_space<vmem>>, vector<1x128x128xbf16>
    %85 = vector.shape_cast %84 : vector<1x128x128xbf16> to vector<128x128xbf16>
    %cst_81 = arith.constant dense<0.000000e+00> : vector<120x128xf32>
    %86 = tpu.matmul %83, %85, %cst_81 {dimension_numbers = #tpu.dot_dimension_numbers<[1], [0], [0], [1], [0, 0, 1, 1], [], []>} : vector<120x128xbf16>, vector<128x128xbf16>, vector<120x128xf32> -> vector<120x128xf32>
    %87 = arith.addf %81, %86 : vector<120x128xf32>
    %c0_82 = arith.constant 0 : index
    %c146 = arith.constant 146 : index
    %c0_83 = arith.constant 0 : index
    %88 = vector.load %arg2[%c0_82, %c146, %c0_83] : memref<1x456x128xbf16, #tpu.memory_space<vmem>>, vector<1x120x128xbf16>
    %89 = vector.shape_cast %88 : vector<1x120x128xbf16> to vector<120x128xbf16>
    %c5_84 = arith.constant 5 : index
    %c0_85 = arith.constant 0 : index
    %c0_86 = arith.constant 0 : index
    %90 = vector.load %arg3[%c5_84, %c0_85, %c0_86] : memref<9x128x128xbf16, #tpu.memory_space<vmem>>, vector<1x128x128xbf16>
    %91 = vector.shape_cast %90 : vector<1x128x128xbf16> to vector<128x128xbf16>
    %cst_87 = arith.constant dense<0.000000e+00> : vector<120x128xf32>
    %92 = tpu.matmul %89, %91, %cst_87 {dimension_numbers = #tpu.dot_dimension_numbers<[1], [0], [0], [1], [0, 0, 1, 1], [], []>} : vector<120x128xbf16>, vector<128x128xbf16>, vector<120x128xf32> -> vector<120x128xf32>
    %93 = arith.addf %87, %92 : vector<120x128xf32>
    %c0_88 = arith.constant 0 : index
    %c168 = arith.constant 168 : index
    %c0_89 = arith.constant 0 : index
    %94 = vector.load %arg2[%c0_88, %c168, %c0_89] : memref<1x456x128xbf16, #tpu.memory_space<vmem>>, vector<1x120x128xbf16>
    %95 = vector.shape_cast %94 : vector<1x120x128xbf16> to vector<120x128xbf16>
    %c6_90 = arith.constant 6 : index
    %c0_91 = arith.constant 0 : index
    %c0_92 = arith.constant 0 : index
    %96 = vector.load %arg3[%c6_90, %c0_91, %c0_92] : memref<9x128x128xbf16, #tpu.memory_space<vmem>>, vector<1x128x128xbf16>
    %97 = vector.shape_cast %96 : vector<1x128x128xbf16> to vector<128x128xbf16>
    %cst_93 = arith.constant dense<0.000000e+00> : vector<120x128xf32>
    %98 = tpu.matmul %95, %97, %cst_93 {dimension_numbers = #tpu.dot_dimension_numbers<[1], [0], [0], [1], [0, 0, 1, 1], [], []>} : vector<120x128xbf16>, vector<128x128xbf16>, vector<120x128xf32> -> vector<120x128xf32>
    %99 = arith.addf %93, %98 : vector<120x128xf32>
    %c0_94 = arith.constant 0 : index
    %c169 = arith.constant 169 : index
    %c0_95 = arith.constant 0 : index
    %100 = vector.load %arg2[%c0_94, %c169, %c0_95] : memref<1x456x128xbf16, #tpu.memory_space<vmem>>, vector<1x120x128xbf16>
    %101 = vector.shape_cast %100 : vector<1x120x128xbf16> to vector<120x128xbf16>
    %c7_96 = arith.constant 7 : index
    %c0_97 = arith.constant 0 : index
    %c0_98 = arith.constant 0 : index
    %102 = vector.load %arg3[%c7_96, %c0_97, %c0_98] : memref<9x128x128xbf16, #tpu.memory_space<vmem>>, vector<1x128x128xbf16>
    %103 = vector.shape_cast %102 : vector<1x128x128xbf16> to vector<128x128xbf16>
    %cst_99 = arith.constant dense<0.000000e+00> : vector<120x128xf32>
    %104 = tpu.matmul %101, %103, %cst_99 {dimension_numbers = #tpu.dot_dimension_numbers<[1], [0], [0], [1], [0, 0, 1, 1], [], []>} : vector<120x128xbf16>, vector<128x128xbf16>, vector<120x128xf32> -> vector<120x128xf32>
    %105 = arith.addf %99, %104 : vector<120x128xf32>
    %c0_100 = arith.constant 0 : index
    %c170 = arith.constant 170 : index
    %c0_101 = arith.constant 0 : index
    %106 = vector.load %arg2[%c0_100, %c170, %c0_101] : memref<1x456x128xbf16, #tpu.memory_space<vmem>>, vector<1x120x128xbf16>
    %107 = vector.shape_cast %106 : vector<1x120x128xbf16> to vector<120x128xbf16>
    %c8_102 = arith.constant 8 : index
    %c0_103 = arith.constant 0 : index
    %c0_104 = arith.constant 0 : index
    %108 = vector.load %arg3[%c8_102, %c0_103, %c0_104] : memref<9x128x128xbf16, #tpu.memory_space<vmem>>, vector<1x128x128xbf16>
    %109 = vector.shape_cast %108 : vector<1x128x128xbf16> to vector<128x128xbf16>
    %cst_105 = arith.constant dense<0.000000e+00> : vector<120x128xf32>
    %110 = tpu.matmul %107, %109, %cst_105 {dimension_numbers = #tpu.dot_dimension_numbers<[1], [0], [0], [1], [0, 0, 1, 1], [], []>} : vector<120x128xbf16>, vector<128x128xbf16>, vector<120x128xf32> -> vector<120x128xf32>
    %111 = arith.addf %105, %110 : vector<120x128xf32>
    %112 = vector.broadcast %0 : vector<1x128xf32> to vector<120x128xf32>
    %113 = arith.addf %111, %112 : vector<120x128xf32>
    %c0_106 = arith.constant 0 : index
    %c120_107 = arith.constant 120 : index
    %c0_108 = arith.constant 0 : index
    %114 = vector.load %arg5[%c0_106, %c120_107, %c0_108] : memref<1x384x128xf32, #tpu.memory_space<vmem>>, vector<1x120x128xf32>
    %115 = vector.shape_cast %114 : vector<1x120x128xf32> to vector<120x128xf32>
    %116 = vector.shape_cast %113 : vector<120x128xf32> to vector<1x120x128xf32>
    tpu.vector_store %arg5[%c0_106, %c120_107, %c0_108], %116 {strides = array<i32>} : memref<1x384x128xf32, #tpu.memory_space<vmem>>, vector<1x120x128xf32>,
    %c0_109 = arith.constant 0 : index
    %c240 = arith.constant 240 : index
    %c0_110 = arith.constant 0 : index
    %117 = vector.load %arg2[%c0_109, %c240, %c0_110] : memref<1x456x128xbf16, #tpu.memory_space<vmem>>, vector<1x120x128xbf16>
    %118 = vector.shape_cast %117 : vector<1x120x128xbf16> to vector<120x128xbf16>
    %c0_111 = arith.constant 0 : index
    %c0_112 = arith.constant 0 : index
    %c0_113 = arith.constant 0 : index
    %119 = vector.load %arg3[%c0_111, %c0_112, %c0_113] : memref<9x128x128xbf16, #tpu.memory_space<vmem>>, vector<1x128x128xbf16>
    %120 = vector.shape_cast %119 : vector<1x128x128xbf16> to vector<128x128xbf16>
    %cst_114 = arith.constant dense<0.000000e+00> : vector<120x128xf32>
    %121 = tpu.matmul %118, %120, %cst_114 {dimension_numbers = #tpu.dot_dimension_numbers<[1], [0], [0], [1], [0, 0, 1, 1], [], []>} : vector<120x128xbf16>, vector<128x128xbf16>, vector<120x128xf32> -> vector<120x128xf32>
    %c0_115 = arith.constant 0 : index
    %c241 = arith.constant 241 : index
    %c0_116 = arith.constant 0 : index
    %122 = vector.load %arg2[%c0_115, %c241, %c0_116] : memref<1x456x128xbf16, #tpu.memory_space<vmem>>, vector<1x120x128xbf16>
    %123 = vector.shape_cast %122 : vector<1x120x128xbf16> to vector<120x128xbf16>
    %c1_117 = arith.constant 1 : index
    %c0_118 = arith.constant 0 : index
    %c0_119 = arith.constant 0 : index
    %124 = vector.load %arg3[%c1_117, %c0_118, %c0_119] : memref<9x128x128xbf16, #tpu.memory_space<vmem>>, vector<1x128x128xbf16>
    %125 = vector.shape_cast %124 : vector<1x128x128xbf16> to vector<128x128xbf16>
    %cst_120 = arith.constant dense<0.000000e+00> : vector<120x128xf32>
    %126 = tpu.matmul %123, %125, %cst_120 {dimension_numbers = #tpu.dot_dimension_numbers<[1], [0], [0], [1], [0, 0, 1, 1], [], []>} : vector<120x128xbf16>, vector<128x128xbf16>, vector<120x128xf32> -> vector<120x128xf32>
    %127 = arith.addf %121, %126 : vector<120x128xf32>
    %c0_121 = arith.constant 0 : index
    %c242 = arith.constant 242 : index
    %c0_122 = arith.constant 0 : index
    %128 = vector.load %arg2[%c0_121, %c242, %c0_122] : memref<1x456x128xbf16, #tpu.memory_space<vmem>>, vector<1x120x128xbf16>
    %129 = vector.shape_cast %128 : vector<1x120x128xbf16> to vector<120x128xbf16>
    %c2_123 = arith.constant 2 : index
    %c0_124 = arith.constant 0 : index
    %c0_125 = arith.constant 0 : index
    %130 = vector.load %arg3[%c2_123, %c0_124, %c0_125] : memref<9x128x128xbf16, #tpu.memory_space<vmem>>, vector<1x128x128xbf16>
    %131 = vector.shape_cast %130 : vector<1x128x128xbf16> to vector<128x128xbf16>
    %cst_126 = arith.constant dense<0.000000e+00> : vector<120x128xf32>
    %132 = tpu.matmul %129, %131, %cst_126 {dimension_numbers = #tpu.dot_dimension_numbers<[1], [0], [0], [1], [0, 0, 1, 1], [], []>} : vector<120x128xbf16>, vector<128x128xbf16>, vector<120x128xf32> -> vector<120x128xf32>
    %133 = arith.addf %127, %132 : vector<120x128xf32>
    %c0_127 = arith.constant 0 : index
    %c264 = arith.constant 264 : index
    %c0_128 = arith.constant 0 : index
    %134 = vector.load %arg2[%c0_127, %c264, %c0_128] : memref<1x456x128xbf16, #tpu.memory_space<vmem>>, vector<1x120x128xbf16>
    %135 = vector.shape_cast %134 : vector<1x120x128xbf16> to vector<120x128xbf16>
    %c3_129 = arith.constant 3 : index
    %c0_130 = arith.constant 0 : index
    %c0_131 = arith.constant 0 : index
    %136 = vector.load %arg3[%c3_129, %c0_130, %c0_131] : memref<9x128x128xbf16, #tpu.memory_space<vmem>>, vector<1x128x128xbf16>
    %137 = vector.shape_cast %136 : vector<1x128x128xbf16> to vector<128x128xbf16>
    %cst_132 = arith.constant dense<0.000000e+00> : vector<120x128xf32>
    %138 = tpu.matmul %135, %137, %cst_132 {dimension_numbers = #tpu.dot_dimension_numbers<[1], [0], [0], [1], [0, 0, 1, 1], [], []>} : vector<120x128xbf16>, vector<128x128xbf16>, vector<120x128xf32> -> vector<120x128xf32>
    %139 = arith.addf %133, %138 : vector<120x128xf32>
    %c0_133 = arith.constant 0 : index
    %c265 = arith.constant 265 : index
    %c0_134 = arith.constant 0 : index
    %140 = vector.load %arg2[%c0_133, %c265, %c0_134] : memref<1x456x128xbf16, #tpu.memory_space<vmem>>, vector<1x120x128xbf16>
    %141 = vector.shape_cast %140 : vector<1x120x128xbf16> to vector<120x128xbf16>
    %c4_135 = arith.constant 4 : index
    %c0_136 = arith.constant 0 : index
    %c0_137 = arith.constant 0 : index
    %142 = vector.load %arg3[%c4_135, %c0_136, %c0_137] : memref<9x128x128xbf16, #tpu.memory_space<vmem>>, vector<1x128x128xbf16>
    %143 = vector.shape_cast %142 : vector<1x128x128xbf16> to vector<128x128xbf16>
    %cst_138 = arith.constant dense<0.000000e+00> : vector<120x128xf32>
    %144 = tpu.matmul %141, %143, %cst_138 {dimension_numbers = #tpu.dot_dimension_numbers<[1], [0], [0], [1], [0, 0, 1, 1], [], []>} : vector<120x128xbf16>, vector<128x128xbf16>, vector<120x128xf32> -> vector<120x128xf32>
    %145 = arith.addf %139, %144 : vector<120x128xf32>
    %c0_139 = arith.constant 0 : index
    %c266 = arith.constant 266 : index
    %c0_140 = arith.constant 0 : index
    %146 = vector.load %arg2[%c0_139, %c266, %c0_140] : memref<1x456x128xbf16, #tpu.memory_space<vmem>>, vector<1x120x128xbf16>
    %147 = vector.shape_cast %146 : vector<1x120x128xbf16> to vector<120x128xbf16>
    %c5_141 = arith.constant 5 : index
    %c0_142 = arith.constant 0 : index
    %c0_143 = arith.constant 0 : index
    %148 = vector.load %arg3[%c5_141, %c0_142, %c0_143] : memref<9x128x128xbf16, #tpu.memory_space<vmem>>, vector<1x128x128xbf16>
    %149 = vector.shape_cast %148 : vector<1x128x128xbf16> to vector<128x128xbf16>
    %cst_144 = arith.constant dense<0.000000e+00> : vector<120x128xf32>
    %150 = tpu.matmul %147, %149, %cst_144 {dimension_numbers = #tpu.dot_dimension_numbers<[1], [0], [0], [1], [0, 0, 1, 1], [], []>} : vector<120x128xbf16>, vector<128x128xbf16>, vector<120x128xf32> -> vector<120x128xf32>
    %151 = arith.addf %145, %150 : vector<120x128xf32>
    %c0_145 = arith.constant 0 : index
    %c288 = arith.constant 288 : index
    %c0_146 = arith.constant 0 : index
    %152 = vector.load %arg2[%c0_145, %c288, %c0_146] : memref<1x456x128xbf16, #tpu.memory_space<vmem>>, vector<1x120x128xbf16>
    %153 = vector.shape_cast %152 : vector<1x120x128xbf16> to vector<120x128xbf16>
    %c6_147 = arith.constant 6 : index
    %c0_148 = arith.constant 0 : index
    %c0_149 = arith.constant 0 : index
    %154 = vector.load %arg3[%c6_147, %c0_148, %c0_149] : memref<9x128x128xbf16, #tpu.memory_space<vmem>>, vector<1x128x128xbf16>
    %155 = vector.shape_cast %154 : vector<1x128x128xbf16> to vector<128x128xbf16>
    %cst_150 = arith.constant dense<0.000000e+00> : vector<120x128xf32>
    %156 = tpu.matmul %153, %155, %cst_150 {dimension_numbers = #tpu.dot_dimension_numbers<[1], [0], [0], [1], [0, 0, 1, 1], [], []>} : vector<120x128xbf16>, vector<128x128xbf16>, vector<120x128xf32> -> vector<120x128xf32>
    %157 = arith.addf %151, %156 : vector<120x128xf32>
    %c0_151 = arith.constant 0 : index
    %c289 = arith.constant 289 : index
    %c0_152 = arith.constant 0 : index
    %158 = vector.load %arg2[%c0_151, %c289, %c0_152] : memref<1x456x128xbf16, #tpu.memory_space<vmem>>, vector<1x120x128xbf16>
    %159 = vector.shape_cast %158 : vector<1x120x128xbf16> to vector<120x128xbf16>
    %c7_153 = arith.constant 7 : index
    %c0_154 = arith.constant 0 : index
    %c0_155 = arith.constant 0 : index
    %160 = vector.load %arg3[%c7_153, %c0_154, %c0_155] : memref<9x128x128xbf16, #tpu.memory_space<vmem>>, vector<1x128x128xbf16>
    %161 = vector.shape_cast %160 : vector<1x128x128xbf16> to vector<128x128xbf16>
    %cst_156 = arith.constant dense<0.000000e+00> : vector<120x128xf32>
    %162 = tpu.matmul %159, %161, %cst_156 {dimension_numbers = #tpu.dot_dimension_numbers<[1], [0], [0], [1], [0, 0, 1, 1], [], []>} : vector<120x128xbf16>, vector<128x128xbf16>, vector<120x128xf32> -> vector<120x128xf32>
    %163 = arith.addf %157, %162 : vector<120x128xf32>
    %c0_157 = arith.constant 0 : index
    %c290 = arith.constant 290 : index
    %c0_158 = arith.constant 0 : index
    %164 = vector.load %arg2[%c0_157, %c290, %c0_158] : memref<1x456x128xbf16, #tpu.memory_space<vmem>>, vector<1x120x128xbf16>
    %165 = vector.shape_cast %164 : vector<1x120x128xbf16> to vector<120x128xbf16>
    %c8_159 = arith.constant 8 : index
    %c0_160 = arith.constant 0 : index
    %c0_161 = arith.constant 0 : index
    %166 = vector.load %arg3[%c8_159, %c0_160, %c0_161] : memref<9x128x128xbf16, #tpu.memory_space<vmem>>, vector<1x128x128xbf16>
    %167 = vector.shape_cast %166 : vector<1x128x128xbf16> to vector<128x128xbf16>
    %cst_162 = arith.constant dense<0.000000e+00> : vector<120x128xf32>
    %168 = tpu.matmul %165, %167, %cst_162 {dimension_numbers = #tpu.dot_dimension_numbers<[1], [0], [0], [1], [0, 0, 1, 1], [], []>} : vector<120x128xbf16>, vector<128x128xbf16>, vector<120x128xf32> -> vector<120x128xf32>
    %169 = arith.addf %163, %168 : vector<120x128xf32>
    %170 = vector.broadcast %0 : vector<1x128xf32> to vector<120x128xf32>
    %171 = arith.addf %169, %170 : vector<120x128xf32>
    %c0_163 = arith.constant 0 : index
    %c240_164 = arith.constant 240 : index
    %c0_165 = arith.constant 0 : index
    %172 = vector.load %arg5[%c0_163, %c240_164, %c0_165] : memref<1x384x128xf32, #tpu.memory_space<vmem>>, vector<1x120x128xf32>
    %173 = vector.shape_cast %172 : vector<1x120x128xf32> to vector<120x128xf32>
    %174 = vector.shape_cast %171 : vector<120x128xf32> to vector<1x120x128xf32>
    tpu.vector_store %arg5[%c0_163, %c240_164, %c0_165], %174 {strides = array<i32>} : memref<1x384x128xf32, #tpu.memory_space<vmem>>, vector<1x120x128xf32>,
    %c0_166 = arith.constant 0 : index
    %c360 = arith.constant 360 : index
    %c0_167 = arith.constant 0 : index
    %175 = vector.load %arg2[%c0_166, %c360, %c0_167] : memref<1x456x128xbf16, #tpu.memory_space<vmem>>, vector<1x24x128xbf16>
    %176 = vector.shape_cast %175 : vector<1x24x128xbf16> to vector<24x128xbf16>
    %c0_168 = arith.constant 0 : index
    %c0_169 = arith.constant 0 : index
    %c0_170 = arith.constant 0 : index
    %177 = vector.load %arg3[%c0_168, %c0_169, %c0_170] : memref<9x128x128xbf16, #tpu.memory_space<vmem>>, vector<1x128x128xbf16>
    %178 = vector.shape_cast %177 : vector<1x128x128xbf16> to vector<128x128xbf16>
    %cst_171 = arith.constant dense<0.000000e+00> : vector<24x128xf32>
    %179 = tpu.matmul %176, %178, %cst_171 {dimension_numbers = #tpu.dot_dimension_numbers<[1], [0], [0], [1], [0, 0, 1, 1], [], []>} : vector<24x128xbf16>, vector<128x128xbf16>, vector<24x128xf32> -> vector<24x128xf32>
    %c0_172 = arith.constant 0 : index
    %c361 = arith.constant 361 : index
    %c0_173 = arith.constant 0 : index
    %180 = vector.load %arg2[%c0_172, %c361, %c0_173] : memref<1x456x128xbf16, #tpu.memory_space<vmem>>, vector<1x24x128xbf16>
    %181 = vector.shape_cast %180 : vector<1x24x128xbf16> to vector<24x128xbf16>
    %c1_174 = arith.constant 1 : index
    %c0_175 = arith.constant 0 : index
    %c0_176 = arith.constant 0 : index
    %182 = vector.load %arg3[%c1_174, %c0_175, %c0_176] : memref<9x128x128xbf16, #tpu.memory_space<vmem>>, vector<1x128x128xbf16>
    %183 = vector.shape_cast %182 : vector<1x128x128xbf16> to vector<128x128xbf16>
    %cst_177 = arith.constant dense<0.000000e+00> : vector<24x128xf32>
    %184 = tpu.matmul %181, %183, %cst_177 {dimension_numbers = #tpu.dot_dimension_numbers<[1], [0], [0], [1], [0, 0, 1, 1], [], []>} : vector<24x128xbf16>, vector<128x128xbf16>, vector<24x128xf32> -> vector<24x128xf32>
    %185 = arith.addf %179, %184 : vector<24x128xf32>
    %c0_178 = arith.constant 0 : index
    %c362 = arith.constant 362 : index
    %c0_179 = arith.constant 0 : index
    %186 = vector.load %arg2[%c0_178, %c362, %c0_179] : memref<1x456x128xbf16, #tpu.memory_space<vmem>>, vector<1x24x128xbf16>
    %187 = vector.shape_cast %186 : vector<1x24x128xbf16> to vector<24x128xbf16>
    %c2_180 = arith.constant 2 : index
    %c0_181 = arith.constant 0 : index
    %c0_182 = arith.constant 0 : index
    %188 = vector.load %arg3[%c2_180, %c0_181, %c0_182] : memref<9x128x128xbf16, #tpu.memory_space<vmem>>, vector<1x128x128xbf16>
    %189 = vector.shape_cast %188 : vector<1x128x128xbf16> to vector<128x128xbf16>
    %cst_183 = arith.constant dense<0.000000e+00> : vector<24x128xf32>
    %190 = tpu.matmul %187, %189, %cst_183 {dimension_numbers = #tpu.dot_dimension_numbers<[1], [0], [0], [1], [0, 0, 1, 1], [], []>} : vector<24x128xbf16>, vector<128x128xbf16>, vector<24x128xf32> -> vector<24x128xf32>
    %191 = arith.addf %185, %190 : vector<24x128xf32>
    %c0_184 = arith.constant 0 : index
    %c384 = arith.constant 384 : index
    %c0_185 = arith.constant 0 : index
    %192 = vector.load %arg2[%c0_184, %c384, %c0_185] : memref<1x456x128xbf16, #tpu.memory_space<vmem>>, vector<1x24x128xbf16>
    %193 = vector.shape_cast %192 : vector<1x24x128xbf16> to vector<24x128xbf16>
    %c3_186 = arith.constant 3 : index
    %c0_187 = arith.constant 0 : index
    %c0_188 = arith.constant 0 : index
    %194 = vector.load %arg3[%c3_186, %c0_187, %c0_188] : memref<9x128x128xbf16, #tpu.memory_space<vmem>>, vector<1x128x128xbf16>
    %195 = vector.shape_cast %194 : vector<1x128x128xbf16> to vector<128x128xbf16>
    %cst_189 = arith.constant dense<0.000000e+00> : vector<24x128xf32>
    %196 = tpu.matmul %193, %195, %cst_189 {dimension_numbers = #tpu.dot_dimension_numbers<[1], [0], [0], [1], [0, 0, 1, 1], [], []>} : vector<24x128xbf16>, vector<128x128xbf16>, vector<24x128xf32> -> vector<24x128xf32>
    %197 = arith.addf %191, %196 : vector<24x128xf32>
    %c0_190 = arith.constant 0 : index
    %c385 = arith.constant 385 : index
    %c0_191 = arith.constant 0 : index
    %198 = vector.load %arg2[%c0_190, %c385, %c0_191] : memref<1x456x128xbf16, #tpu.memory_space<vmem>>, vector<1x24x128xbf16>
    %199 = vector.shape_cast %198 : vector<1x24x128xbf16> to vector<24x128xbf16>
    %c4_192 = arith.constant 4 : index
    %c0_193 = arith.constant 0 : index
    %c0_194 = arith.constant 0 : index
    %200 = vector.load %arg3[%c4_192, %c0_193, %c0_194] : memref<9x128x128xbf16, #tpu.memory_space<vmem>>, vector<1x128x128xbf16>
    %201 = vector.shape_cast %200 : vector<1x128x128xbf16> to vector<128x128xbf16>
    %cst_195 = arith.constant dense<0.000000e+00> : vector<24x128xf32>
    %202 = tpu.matmul %199, %201, %cst_195 {dimension_numbers = #tpu.dot_dimension_numbers<[1], [0], [0], [1], [0, 0, 1, 1], [], []>} : vector<24x128xbf16>, vector<128x128xbf16>, vector<24x128xf32> -> vector<24x128xf32>
    %203 = arith.addf %197, %202 : vector<24x128xf32>
    %c0_196 = arith.constant 0 : index
    %c386 = arith.constant 386 : index
    %c0_197 = arith.constant 0 : index
    %204 = vector.load %arg2[%c0_196, %c386, %c0_197] : memref<1x456x128xbf16, #tpu.memory_space<vmem>>, vector<1x24x128xbf16>
    %205 = vector.shape_cast %204 : vector<1x24x128xbf16> to vector<24x128xbf16>
    %c5_198 = arith.constant 5 : index
    %c0_199 = arith.constant 0 : index
    %c0_200 = arith.constant 0 : index
    %206 = vector.load %arg3[%c5_198, %c0_199, %c0_200] : memref<9x128x128xbf16, #tpu.memory_space<vmem>>, vector<1x128x128xbf16>
    %207 = vector.shape_cast %206 : vector<1x128x128xbf16> to vector<128x128xbf16>
    %cst_201 = arith.constant dense<0.000000e+00> : vector<24x128xf32>
    %208 = tpu.matmul %205, %207, %cst_201 {dimension_numbers = #tpu.dot_dimension_numbers<[1], [0], [0], [1], [0, 0, 1, 1], [], []>} : vector<24x128xbf16>, vector<128x128xbf16>, vector<24x128xf32> -> vector<24x128xf32>
    %209 = arith.addf %203, %208 : vector<24x128xf32>
    %c0_202 = arith.constant 0 : index
    %c408 = arith.constant 408 : index
    %c0_203 = arith.constant 0 : index
    %210 = vector.load %arg2[%c0_202, %c408, %c0_203] : memref<1x456x128xbf16, #tpu.memory_space<vmem>>, vector<1x24x128xbf16>
    %211 = vector.shape_cast %210 : vector<1x24x128xbf16> to vector<24x128xbf16>
    %c6_204 = arith.constant 6 : index
    %c0_205 = arith.constant 0 : index
    %c0_206 = arith.constant 0 : index
    %212 = vector.load %arg3[%c6_204, %c0_205, %c0_206] : memref<9x128x128xbf16, #tpu.memory_space<vmem>>, vector<1x128x128xbf16>
    %213 = vector.shape_cast %212 : vector<1x128x128xbf16> to vector<128x128xbf16>
    %cst_207 = arith.constant dense<0.000000e+00> : vector<24x128xf32>
    %214 = tpu.matmul %211, %213, %cst_207 {dimension_numbers = #tpu.dot_dimension_numbers<[1], [0], [0], [1], [0, 0, 1, 1], [], []>} : vector<24x128xbf16>, vector<128x128xbf16>, vector<24x128xf32> -> vector<24x128xf32>
    %215 = arith.addf %209, %214 : vector<24x128xf32>
    %c0_208 = arith.constant 0 : index
    %c409 = arith.constant 409 : index
    %c0_209 = arith.constant 0 : index
    %216 = vector.load %arg2[%c0_208, %c409, %c0_209] : memref<1x456x128xbf16, #tpu.memory_space<vmem>>, vector<1x24x128xbf16>
    %217 = vector.shape_cast %216 : vector<1x24x128xbf16> to vector<24x128xbf16>
    %c7_210 = arith.constant 7 : index
    %c0_211 = arith.constant 0 : index
    %c0_212 = arith.constant 0 : index
    %218 = vector.load %arg3[%c7_210, %c0_211, %c0_212] : memref<9x128x128xbf16, #tpu.memory_space<vmem>>, vector<1x128x128xbf16>
    %219 = vector.shape_cast %218 : vector<1x128x128xbf16> to vector<128x128xbf16>
    %cst_213 = arith.constant dense<0.000000e+00> : vector<24x128xf32>
    %220 = tpu.matmul %217, %219, %cst_213 {dimension_numbers = #tpu.dot_dimension_numbers<[1], [0], [0], [1], [0, 0, 1, 1], [], []>} : vector<24x128xbf16>, vector<128x128xbf16>, vector<24x128xf32> -> vector<24x128xf32>
    %221 = arith.addf %215, %220 : vector<24x128xf32>
    %c0_214 = arith.constant 0 : index
    %c410 = arith.constant 410 : index
    %c0_215 = arith.constant 0 : index
    %222 = vector.load %arg2[%c0_214, %c410, %c0_215] : memref<1x456x128xbf16, #tpu.memory_space<vmem>>, vector<1x24x128xbf16>
    %223 = vector.shape_cast %222 : vector<1x24x128xbf16> to vector<24x128xbf16>
    %c8_216 = arith.constant 8 : index
    %c0_217 = arith.constant 0 : index
    %c0_218 = arith.constant 0 : index
    %224 = vector.load %arg3[%c8_216, %c0_217, %c0_218] : memref<9x128x128xbf16, #tpu.memory_space<vmem>>, vector<1x128x128xbf16>
    %225 = vector.shape_cast %224 : vector<1x128x128xbf16> to vector<128x128xbf16>
    %cst_219 = arith.constant dense<0.000000e+00> : vector<24x128xf32>
    %226 = tpu.matmul %223, %225, %cst_219 {dimension_numbers = #tpu.dot_dimension_numbers<[1], [0], [0], [1], [0, 0, 1, 1], [], []>} : vector<24x128xbf16>, vector<128x128xbf16>, vector<24x128xf32> -> vector<24x128xf32>
    %227 = arith.addf %221, %226 : vector<24x128xf32>
    %228 = vector.broadcast %0 : vector<1x128xf32> to vector<24x128xf32>
    %229 = arith.addf %227, %228 : vector<24x128xf32>
    %c0_220 = arith.constant 0 : index
    %c360_221 = arith.constant 360 : index
    %c0_222 = arith.constant 0 : index
    %230 = vector.load %arg5[%c0_220, %c360_221, %c0_222] : memref<1x384x128xf32, #tpu.memory_space<vmem>>, vector<1x24x128xf32>
    %231 = vector.shape_cast %230 : vector<1x24x128xf32> to vector<24x128xf32>
    %232 = vector.shape_cast %229 : vector<24x128xf32> to vector<1x24x128xf32>
    tpu.vector_store %arg5[%c0_220, %c360_221, %c0_222], %232 {strides = array<i32>} : memref<1x384x128xf32, #tpu.memory_space<vmem>>, vector<1x24x128xf32>,
    return
  }
  func.func @transform_0(%arg0: i32, %arg1: i32) -> (i32, i32, i32) {
    %c0_i32 = arith.constant 0 : i32
    %c0_i32_0 = arith.constant 0 : i32
    return %arg0, %c0_i32, %arg1 : i32, i32, i32
  }
  func.func @transform_1(%arg0: i32, %arg1: i32) -> (i32, i32, i32) {
    %c0_i32 = arith.constant 0 : i32
    %c0_i32_0 = arith.constant 0 : i32
    %c0_i32_1 = arith.constant 0 : i32
    return %c0_i32, %arg1, %c0_i32_0 : i32, i32, i32
  }
  func.func @transform_2(%arg0: i32, %arg1: i32) -> (i32, i32) {
    %c0_i32 = arith.constant 0 : i32
    %c0_i32_0 = arith.constant 0 : i32
    %c0_i32_1 = arith.constant 0 : i32
    return %c0_i32, %c0_i32_0 : i32, i32
  }
  func.func @transform_3(%arg0: i32, %arg1: i32) -> (i32, i32, i32) {
    %c0_i32 = arith.constant 0 : i32
    %c0_i32_0 = arith.constant 0 : i32
    %c0_i32_1 = arith.constant 0 : i32
    return %arg0, %c0_i32, %c0_i32_0 : i32, i32, i32
  }
}

</mosaic_0001>

<bundles_post_ra>
// kernel: _lambda_.1
= control target key start
LH: loop header
LB: loop body
LE: loop exit
PB: predicated region body
PF: predicated region fallthrough
CT: control target
= control target key end

     0   :  { %s11036_s12 = smov 0   ;;  %s11038_s13 = smov 0   ;;  %s13599_s0 = inlined_call_operand.vmem [shape: bf16[2,456,128], index: 0, kind: input, shape index: {}]   ;;  %s13600_s1 = inlined_call_operand.vmem [shape: bf16[9,128,128], index: 1, kind: input, shape index: {}]   ;;  %s13601_s2 = inlined_call_operand.vmem [shape: f32[1,128], index: 2, kind: input, shape index: {}]   ;;  %s13602_s3 = inlined_call_operand.vmem [shape: f32[2,384,128], index: 3, kind: output, shape index: {}]  }
   0x1   :  { %s11040_s14 = smov 0  }
   0x2 LB: > { %s25_s15 = sadd.s32 1, %s11010_s13  ;;  %p8012_p0 = scmp.ge.s32.totalorder %s11014_s14, 1  ;;  %s11014_s14 = sphi %s11040_s14, %s13_s14   ;;  %s11010_s13 = sphi %s11038_s13, %s13741_s13   ;;  %s11006_s12 = sphi %s11036_s12, %s13740_s12  }
   0x3   : > { %p27_p1 = scmp.ge.s32.totalorder %s25_s15, 2  ;;  %p165_p2 = scmp.lt.s32.totalorder %s11014_s14, 3 }
   0x5   : > { %s13743_s15 = smov (%p27_p1, %s25_s15), 0  ;;  %p166_p3 = pnand %p8012_p0, %p165_p2 }
   0x7   : > { %169 = sbr.rel (%p166_p3) target bundleno = 795 (0x31b), region = 32 }
   0xc   : > { %v10556_v0 = vld [vmem:[%s13600_s1 + $0x78] sm:$0xff]   ;;  %p197_p4 = scmp.lt.s32.totalorder %s11006_s12, 1  ;;  %v10558_v2 = vld [vmem:[%s13600_s1 + $0x70] sm:$0xff]   ;;  %v10560_v4 = vld [vmem:[%s13600_s1 + $0x68] sm:$0xff]   ;;  %vm307_vm0 = vsmask.f32 7424 }
   0xd   : > { %v10557_v1 = vld [vmem:[%s13600_s1 + $0x38] sm:$0xff]   ;;  %9486 = vmatprep.subr.bf16.mxu0 %v10556_v0  ;;  %v10559_v3 = vld [vmem:[%s13600_s1 + $0x30] sm:$0xff]   ;;  %v10561_v5 = vld [vmem:[%s13600_s1 + $0x28] sm:$0xff]   ;;  %vm697_vm1 = vcmask 1046528  }
   0xe   : > { %9518 = vmatprep.subr.bf16.mxu1 %v10557_v1  ;;  %9487 = vmatpush3.bf16.msra.mxu0 %v10556_v0  ;;  %s13745_s12 = smov (!%p197_p4, %s11006_s12), 1  ;;  %v10562_v6 = vld [vmem:[%s13600_s1 + $0x60] sm:$0xff]   ;;  %v10564_v8 = vld [vmem:[%s13600_s1 + $0x58] sm:$0xff]   ;;  %v10566_v10 = vld [vmem:[%s13600_s1 + $0x50] sm:$0xff]  }
   0xf   : > { %9519 = vmatpush3.bf16.msra.mxu1 %v10557_v1  ;;  %9488 = vmatprep.subr.bf16.mxu0 %v10558_v2  ;;  %v10563_v7 = vld [vmem:[%s13600_s1 + $0x20] sm:$0xff]   ;;  %s10530_s5 = smul.u32 228, %s13745_s12  ;;  %v10565_v9 = vld [vmem:[%s13600_s1 + $0x18] sm:$0xff]   ;;  %v10567_v11 = vld [vmem:[%s13600_s1 + $0x10] sm:$0xff]  }
  0x10   : > { %9520 = vmatprep.subr.bf16.mxu1 %v10559_v3  ;;  %v10568_v17 = vld [vmem:[%s13600_s1 + $0x48] sm:$0xff]   ;;  %v10570_v24 = vld [vmem:[%s13600_s1 + $0x40] sm:$0xff]   ;;  %v10575_v36 = vld [vmem:[%s13600_s1 + $0xb8] sm:$0xff]   ;;  %s10531_s23 = smul.u32 384, %s13745_s12 }
  0x11   : > { %s11090_s16 = scalar_lea.vmem %s13599_s0, %s10530_s5  ;;  %v10569_v21 = vld [vmem:[%s13600_s1 + $0x8] sm:$0xff]   ;;  %v10571_v29 = vld [vmem:[%s13600_s1] sm:$0xff]   ;;  %v10576_v37 = vld [vmem:[%s13600_s1 + $0xf8] sm:$0xff]  }
  0x12   : > { %9489 = vmatpush3.bf16.msra.mxu0 %v10558_v2  ;;  %v218_v12 = vld [vmem:[%s11090_s16] sm:$0xf]  ;;  %v11100_v13 = vld [vmem:[%s11090_s16 + $0x4] sm:$0xf]  ;;  %v11104_v15 = vld [vmem:[%s11090_s16 + $0x8] sm:$0xff]   ;;  %s12365_s4 = scalar_lea.vmem %s13602_s3, %s10531_s23 }
  0x13   : > { %9521 = vmatpush3.bf16.msra.mxu1 %v10559_v3  ;;  %9490 = vmatprep.subr.bf16.mxu0 %v10560_v4  ;;  %v8031_v14 = vcombine.low %v218_v12, %v11100_v13  ;;  %v11107_v16 = vld [vmem:[%s11090_s16 + $0x10] sm:$0xff]   ;;  %v316_v20 = vshll.u32 %v11104_v15, 16  ;;  %v320_v25 = vshrl.u32 %v11104_v15, 16  ;;  %v11122_v28 = vld [vmem:[%s11090_s16 + $0x18] sm:$0xff]   ;;  %v11131_v35 = vld [vmem:[%s11090_s16 + $0x20] sm:$0xff]  }
  0x14   : > { %9522 = vmatprep.subr.bf16.mxu1 %v10561_v5  ;;  %v324_v26 = vshll.u32 %v11107_v16, 16  ;;  %v328_v31 = vshrl.u32 %v11107_v16, 16  ;;  %v332_v32 = vshll.u32 %v11122_v28, 16  ;;  %v11140_v40 = vld [vmem:[%s11090_s16 + $0x28] sm:$0xff]   ;;  %v336_v42 = vshrl.u32 %v11122_v28, 16  ;;  %v10577_v44 = vld [vmem:[%s13600_s1 + $0xb0] sm:$0xff]  }
  0x15   : > { %v309_v18 = vshrl.u32 %v8031_v14, 16  ;;  %v311_v19 = vshll.u32 %v8031_v14, 16  ;;  %9534 = vmatprep.mubr.bf16.mxu1 %v8031_v14  ;;  %v318_v23 = vrot.slane %v316_v20, 1  ;;  %v340_v43 = vshll.u32 %v11131_v35, 16  ;;  %v10578_v45 = vld [vmem:[%s13600_s1 + $0xf0] sm:$0xff]   ;;  %v10581_v47 = vld [vmem:[%s13600_s1 + $0xa8] sm:$0xff]  }
  0x16   : > { %9491 = vmatpush3.bf16.msra.mxu0 %v10560_v4  ;;  %v326_v34 = vrot.slane %v324_v26, 1  ;;  %v334_v39 = vrot.slane %v332_v32, 1  ;;  %v344_v48 = vshrl.u32 %v11131_v35, 16  ;;  %v348_v49 = vshll.u32 %v11140_v40, 16  ;;  %v11159_v52 = vld [vmem:[%s11090_s16 + $0x30] sm:$0xff]   ;;  %v10582_v55 = vld [vmem:[%s13600_s1 + $0xe8] sm:$0xff]  }
  0x17   : > { %9523 = vmatpush3.bf16.msra.mxu1 %v10561_v5  ;;  %9492 = vmatprep.subr.bf16.mxu0 %v10562_v6  ;;  %v313_v22 = vrot.slane %v311_v19, 1  ;;  %v322_v33 = vor.u32 %v320_v25, %v318_v23  ;;  %v342_v51 = vrot.slane %v340_v43, 1  ;;  %v11162_v53 = vld [vmem:[%s11090_s16 + $0x38] sm:$0xf]  ;;  %v249_v54 = vld [vmem:[%s11090_s16 + $0x3c] sm:$0x1] }
  0x18   : > { %9524 = vmatprep.subr.bf16.mxu1 %v10563_v7  ;;  %v330_v38 = vor.u32 %v328_v31, %v326_v34  ;;  %v338_v50 = vor.u32 %v336_v42, %v334_v39  ;;  %v350_v57 = vrot.slane %v348_v49, 1  ;;  %v11170_v58 = vcombine.low %v11162_v53, %v249_v54  ;;  %v10583_v62 = vld [vmem:[%s13600_s1 + $0xa0] sm:$0xff]   ;;  %v10587_v5 = vld [vmem:[%s13600_s1 + $0x98] sm:$0xff]   ;;  %v10590_v12 = vld [vmem:[%s13600_s1 + $0xd0] sm:$0xff]  }
  0x19   : > { %v314_v27 = vor.u32 %v313_v22, %v309_v18  ;;  %v327_v41 = vsel %vm307_vm0, %v322_v33, %v326_v34  ;;  %v346_v56 = vor.u32 %v344_v48, %v342_v51  ;;  %v352_v60 = vshrl.u32 %v11140_v40, 16  ;;  %v10584_v63 = vld [vmem:[%s13600_s1 + $0xe0] sm:$0xff]   ;;  %v10593_v19 = vld [vmem:[%s13600_s1 + $0x88] sm:$0xff]   ;;  %v10602_v33 = vld [vmem:[%s13600_s1 + $0x130] sm:$0xff]  }
  0x1a   : > { %9493 = vmatpush3.bf16.msra.mxu0 %v10562_v6  ;;  %v335_v46 = vsel %vm307_vm0, %v330_v38, %v334_v39  ;;  %v343_v59 = vsel %vm307_vm0, %v338_v50, %v342_v51  ;;  %v356_v61 = vshll.u32 %v11159_v52, 16  ;;  %v360_v1 = vshrl.u32 %v11159_v52, 16  ;;  %v10588_v6 = vld [vmem:[%s13600_s1 + $0xd8] sm:$0xff]   ;;  %v10594_v20 = vld [vmem:[%s13600_s1 + $0xc8] sm:$0xff]   ;;  %v10596_v25 = vld [vmem:[%s13600_s1 + $0xc0] sm:$0xff]  }
  0x1b   : > { %9525 = vmatpush3.bf16.msra.mxu1 %v10563_v7  ;;  %9494 = vmatprep.subr.bf16.mxu0 %v10564_v8  ;;  %v319_v30 = vsel %vm307_vm0, %v314_v27, %v318_v23  ;;  %v351_v0 = vsel %vm307_vm0, %v346_v56, %v350_v57  ;;  %v364_v2 = vshll.u32 %v11170_v58, 16  ;;  %v354_v3 = vor.u32 %v352_v60, %v350_v57  ;;  %v10598_v26 = vld [vmem:[%s11090_s16 + $0xc] sm:$0xff]   ;;  %v10605_v39 = vld [vmem:[%s11090_s16 + $0x24] sm:$0xff]   ;;  %v10612_v50 = vld [vmem:[%s13600_s1 + $0x118] sm:$0xff]  }
  0x1c   : > { %9526 = vmatprep.subr.bf16.mxu1 %v10565_v9  ;;  %9502 = vmatprep.mubr.bf16.mxu0 %v319_v30  ;;  %v358_v4 = vrot.slane %v356_v61, 1  ;;  %v699_v22 = vrot.slane %v11104_v15, 1  ;;  %v8047_v23 = vcombine.low %v11162_v53, %v11162_v53  ;;  %v701_v27 = vrot.slane %v11107_v16, 1  ;;  %v10601_v30 = vld [vmem:[%s13600_s1 + $0x178] sm:$0xff]   ;;  %v10603_v34 = vld [vmem:[%s13600_s1 + $0x170] sm:$0xff]   ;;  %v10606_v38 = vld [vmem:[%s13600_s1 + $0x128] sm:$0xff]  }
  0x1d   : > { %v703_v31 = vrot.slane %v11122_v28, 1  ;;  %v707_v42 = vrot.slane %v11140_v40, 1  ;;  %v1117_v43 = vld [vmem:[%s11090_s16 + $0xc] sm:$0xf]  ;;  %v709_v49 = vrot.slane %v11159_v52, 1  ;;  %v10611_v51 = vld [vmem:[%s11090_s16 + $0x34] sm:$0xff]  }
  0x1e   : > { %9495 = vmatpush3.bf16.msra.mxu0 %v10564_v8  ;;  %v362_v7 = vor.u32 %v360_v1, %v358_v4  ;;  %v366_v8 = vrot.slane %v364_v2, 1  ;;  %v702_v32 = vsel %vm697_vm1, %v699_v22, %v701_v27  ;;  %v10613_v53 = vld [vmem:[%s13600_s1 + $0x158] sm:$0xff]   ;;  %v711_v54 = vrot.slane %v11170_v58, 1  ;;  %v1420_v60 = vld [vmem:[%s11090_s16 + $0xc] sm:$0xe] }
  0x1f   : > { %9527 = vmatpush3.bf16.msra.mxu1 %v10565_v9  ;;  %9496 = vmatprep.subr.bf16.mxu0 %v10566_v10  ;;  %v359_v9 = vsel %vm307_vm0, %v354_v3, %v358_v4  ;;  %v710_v57 = vsel %vm697_vm1, %v707_v42, %v709_v49  ;;  %v10619_v2 = vld [vmem:[%s13600_s1 + $0x148] sm:$0xff]   ;;  %v11290_v4 = vld [vmem:[%s11090_s16 + $0x1c] sm:$0xff]  }
  0x20   : > { %9528 = vmatprep.subr.bf16.mxu1 %v10567_v11  ;;  %v367_v14 = vsel %vm307_vm0, %v362_v7, %v366_v8  ;;  %v712_v61 = vsel %vm697_vm1, %v709_v49, %v711_v54  ;;  %v11351_v49 = vld [vmem:[%s11090_s16 + $0x44] sm:$0x1f]  }
  0x22   : > { %9497 = vmatpush3.bf16.msra.mxu0 %v10566_v10  ;;  %v676_v10 = vld [vmem:[%s11090_s16] sm:$0xe] }
  0x23   : > { %9529 = vmatpush3.bf16.msra.mxu1 %v10567_v11  ;;  %9498 = vmatprep.subr.bf16.mxu0 %v10568_v17  ;;  %v10589_v11 = vld [vmem:[%s13600_s1 + $0x90] sm:$0xff]   ;;  %v8072_v18 = vcombine.low %v676_v10, %v11100_v13  ;;  %v11296_v10 = vld [vmem:[%s11090_s16 + $0x24] sm:$0xff]  }
  0x24   : > { %9530 = vmatprep.subr.bf16.mxu1 %v10569_v21 }
  0x25   : > { %v698_v13 = vrot.slane %v8072_v18, 1  ;;  %v1210_v18 = vshrl.u32 %v11290_v4, 16 }
  0x26   : > { %9499 = vmatpush3.bf16.msra.mxu0 %v10568_v17  ;;  %v368_v17 = vshrl.u32 %v11170_v58, 16  ;;  %v10616_v58 = vld [vmem:[%s11090_s16 + $0x3c] sm:$0xff]  }
  0x27   : > { %9531 = vmatpush3.bf16.msra.mxu1 %v10569_v21  ;;  %9500 = vmatprep.subr.bf16.mxu0 %v10570_v24 }
  0x28   : > { %9532 = vmatprep.subr.bf16.mxu1 %v10571_v29  ;;  %v370_v21 = vor.u32 %v368_v17, %v366_v8  ;;  %v10621_v17 = vld [vmem:[%s13600_s1 + $0x140] sm:$0xff]  }
  0x2a   : > { %9501 = vmatpush3.bf16.msra.mxu0 %v10570_v24  ;;  %v10595_v24 = vld [vmem:[%s13600_s1 + $0x80] sm:$0xff]  }
  0x2b   : > { %9533 = vmatpush3.bf16.msra.mxu1 %v10571_v29  ;;  %9550 = vmatprep.subr.bf16.mxu0 %v10575_v36  ;;  %v10600_v29 = vld [vmem:[%s13600_s1 + $0x138] sm:$0xff]  }
  0x2c   : > { %9582 = vmatprep.subr.bf16.mxu1 %v10576_v37 }
  0x2d   : > { %9503 = vmatmul.mubr.bf16.vlgmr.msra.gmra.mxu0 %v327_v41  ;;  %v10607_v41 = vld [vmem:[%s13600_s1 + $0x168] sm:$0xff]  }
  0x2e   : > { %9535 = vmatmul.mubr.bf16.vlgmr.msra.gmra.mxu1 %v11104_v15  ;;  %9551 = vmatpush3.bf16.msra.mxu0 %v10575_v36  ;;  %v700_v15 = vsel %vm697_vm1, %v698_v13, %v699_v22  ;;  %v10604_v36 = vld [vmem:[%s11090_s16 + $0x1c] sm:$0xff]  }
  0x2f   : > { %9583 = vmatpush3.bf16.msra.mxu1 %v10576_v37  ;;  %9552 = vmatprep.subr.bf16.mxu0 %v10577_v44  ;;  %v705_v37 = vrot.slane %v11131_v35, 1 }
  0x30   : > { %9584 = vmatprep.subr.bf16.mxu1 %v10578_v45  ;;  %9506 = vmatprep.mubr.bf16.mxu0 %v335_v46  ;;  %v10609_v46 = vld [vmem:[%s13600_s1 + $0x160] sm:$0xff]  }
  0x31   : > { %9538 = vmatprep.mubr.bf16.mxu1 %v11107_v16  ;;  %v10599_v16 = vld [vmem:[%s11090_s16 + $0x14] sm:$0xff]  }
  0x32   : > { %9553 = vmatpush3.bf16.msra.mxu0 %v10577_v44  ;;  %v706_v44 = vsel %vm697_vm1, %v703_v31, %v705_v37 }
  0x33   : > { %9585 = vmatpush3.bf16.msra.mxu1 %v10578_v45  ;;  %9554 = vmatprep.subr.bf16.mxu0 %v10581_v47  ;;  %v1118_v45 = vld [vmem:[%s11090_s16 + $0x10] sm:$0xf] }
  0x34   : > { %9586 = vmatprep.subr.bf16.mxu1 %v10582_v55  ;;  %v8129_v48 = vcombine.low %v1117_v43, %v1118_v45  ;;  %v8161_v3 = vcombine.low %v1420_v60, %v1118_v45  ;;  %v10633_v45 = vld [vmem:[%s13600_s1 + $0x1e8] sm:$0xff]  }
  0x35   : > { %9507 = vmatmul.mubr.bf16.gmra.mxu0 %v343_v59  ;;  %v10615_v59 = vld [vmem:[%s13600_s1 + $0x150] sm:$0xff]  }
  0x36   : > { %9539 = vmatmul.mubr.bf16.gmra.mxu1 %v11122_v28  ;;  %9555 = vmatpush3.bf16.msra.mxu0 %v10581_v47  ;;  %v704_v28 = vsel %vm697_vm1, %v701_v27, %v703_v31  ;;  %v10610_v47 = vld [vmem:[%s11090_s16 + $0x2c] sm:$0xff]   ;;  %v1193_v56 = vshll.u32 %v8129_v48, 16 }
  0x37   : > { %9587 = vmatpush3.bf16.msra.mxu1 %v10582_v55  ;;  %9556 = vmatprep.subr.bf16.mxu0 %v10583_v62  ;;  %v11273_v55 = vld [vmem:[%s11090_s16 + $0x14] sm:$0xff]  }
  0x38   : > { %9588 = vmatprep.subr.bf16.mxu1 %v10584_v63  ;;  %9510 = vmatprep.mubr.bf16.mxu0 %v351_v0  ;;  %v1195_v0 = vrot.slane %v1193_v56, 1  ;;  %v1198_v1 = vshll.u32 %v11273_v55, 16  ;;  %v1442_v7 = vrot.slane %v11273_v55, 1  ;;  %v10635_v56 = vld [vmem:[%s13600_s1 + $0x1e0] sm:$0xff]  }
  0x39   : > { %9542 = vmatprep.mubr.bf16.mxu1 %v11131_v35  ;;  %v10608_v35 = vld [vmem:[%s13600_s1 + $0x120] sm:$0xff]  }
  0x3a   : > { %9557 = vmatpush3.bf16.msra.mxu0 %v10583_v62  ;;  %v10618_v62 = vld [vmem:[%s13600_s1 + $0x108] sm:$0xff]  }
  0x3b   : > { %9589 = vmatpush3.bf16.msra.mxu1 %v10584_v63  ;;  %9558 = vmatprep.subr.bf16.mxu0 %v10587_v5  ;;  %v1191_v63 = vshrl.u32 %v8129_v48, 16 }
  0x3c   : > { %9590 = vmatprep.subr.bf16.mxu1 %v10588_v6 }
  0x3d   : > { %9511 = vmatmul.mubr.bf16.gmra.mxu0 %v359_v9  ;;  %v1196_v8 = vor.u32 %v1195_v0, %v1191_v63  ;;  %v1200_v9 = vrot.slane %v1198_v1, 1  ;;  %v10638_v1 = vld [vmem:[%s13600_s1 + $0x198] sm:$0xff]  }
  0x3e   : > { %9543 = vmatmul.mubr.bf16.gmra.mxu1 %v11140_v40  ;;  %9559 = vmatpush3.bf16.msra.mxu0 %v10587_v5  ;;  %v708_v40 = vsel %vm697_vm1, %v705_v37, %v707_v42  ;;  %v10617_v5 = vld [vmem:[%s11090_s16 + $0x44] ss:$0 sps:$4 sm:$0xff]   ;;  %v10629_v37 = vld [vmem:[%s13600_s1 + $0x1f0] sm:$0xff]   ;;  %v10632_v42 = vld [vmem:[%s13600_s1 + $0x1a8] sm:$0xff]  }
  0x3f   : > { %9591 = vmatpush3.bf16.msra.mxu1 %v10588_v6  ;;  %9560 = vmatprep.subr.bf16.mxu0 %v10589_v11  ;;  %v1202_v6 = vshrl.u32 %v11273_v55, 16  ;;  %v10634_v55 = vld [vmem:[%s13600_s1 + $0x1a0] sm:$0xff]  }
  0x40   : > { %9592 = vmatprep.subr.bf16.mxu1 %v10590_v12  ;;  %9514 = vmatprep.mubr.bf16.mxu0 %v367_v14  ;;  %v10620_v14 = vld [vmem:[%s13600_s1 + $0x100] sm:$0xff]  }
  0x41   : > { %9546 = vmatprep.mubr.bf16.mxu1 %v11159_v52  ;;  %v10614_v52 = vld [vmem:[%s13600_s1 + $0x110] sm:$0xff]   ;;  %v1204_v13 = vor.u32 %v1202_v6, %v1200_v9 }
  0x42   : > { %9561 = vmatpush3.bf16.msra.mxu0 %v10589_v11  ;;  %v1441_v11 = vrot.slane %v8161_v3, 1 }
  0x43   : > { %9593 = vmatpush3.bf16.msra.mxu1 %v10590_v12  ;;  %9562 = vmatprep.subr.bf16.mxu0 %v10593_v19  ;;  %v1206_v12 = vshll.u32 %v11290_v4, 16 }
  0x44   : > { %9594 = vmatprep.subr.bf16.mxu1 %v10594_v20  ;;  %v1443_v22 = vsel %vm697_vm1, %v1441_v11, %v1442_v7  ;;  %v10641_v11 = vld [vmem:[%s13600_s1 + $0x1d0] sm:$0xff]  }
  0x45   : > { %9515 = vmatmul.mubr.bf16.gmra.mxu0 %v370_v21  ;;  %v11309_v21 = vld [vmem:[%s11090_s16 + $0x2c] sm:$0xff]  }
  0x46   : > { %9547 = vmatmul.mubr.bf16.gmra.mxu1 %v8047_v23  ;;  %9563 = vmatpush3.bf16.msra.mxu0 %v10593_v19  ;;  %v1201_v19 = vsel %vm307_vm0, %v1196_v8, %v1200_v9  ;;  %v1208_v23 = vrot.slane %v1206_v12, 1  ;;  %v1454_v8 = vrot.slane %v11351_v49, 1  ;;  %v1250_v12 = vshrl.u32 %v11351_v49, 16 }
  0x47   : > { %9595 = vmatpush3.bf16.msra.mxu1 %v10594_v20  ;;  %9564 = vmatprep.subr.bf16.mxu0 %v10595_v24  ;;  %v1214_v20 = vshll.u32 %v11296_v10, 16 }
  0x48   : > { %9596 = vmatprep.subr.bf16.mxu1 %v10596_v25  ;;  %9566 = vmatprep.mubr.bf16.mxu0 %v700_v15  ;;  %v10626_v15 = vld [vmem:[%s13600_s1 + $0x1b8] sm:$0xff]   ;;  %v1212_v27 = vor.u32 %v1210_v18, %v1208_v23  ;;  %v1209_v31 = vsel %vm307_vm0, %v1204_v13, %v1208_v23  ;;  %v11397_v13 = vld [vmem:[%s11090_s16 + $0x28] sm:$0xff]  }
  0x49   : > { %9598 = vmatprep.mubr.bf16.mxu1 %v10598_v26  ;;  %v10627_v26 = vld [vmem:[%s13600_s1 + $0x1f8] sm:$0xff]  }
  0x4a   : > { %9565 = vmatpush3.bf16.msra.mxu0 %v10595_v24  ;;  %v11313_v24 = vld [vmem:[%s11090_s16 + $0x34] sm:$0xff]  }
  0x4b   : > { %9597 = vmatpush3.bf16.msra.mxu1 %v10596_v25  ;;  %9614 = vmatprep.subr.bf16.mxu0 %v10600_v29  ;;  %v1444_v25 = vrot.slane %v11290_v4, 1 }
  0x4c   : > { %9646 = vmatprep.subr.bf16.mxu1 %v10601_v30 }
  0x4d   : > { %9567 = vmatmul.mubr.bf16.vlgmr.msra.gmra.mxu0 %v702_v32  ;;  %v10628_v32 = vld [vmem:[%s13600_s1 + $0x1b0] sm:$0xff]  }
  0x4e   : > { %9599 = vmatmul.mubr.bf16.vlgmr.msra.gmra.mxu1 %v10599_v16  ;;  %9615 = vmatpush3.bf16.msra.mxu0 %v10600_v29  ;;  %v1216_v29 = vrot.slane %v1214_v20, 1  ;;  %v1446_v16 = vrot.slane %v11296_v10, 1 }
  0x4f   : > { %9647 = vmatpush3.bf16.msra.mxu1 %v10601_v30  ;;  %9616 = vmatprep.subr.bf16.mxu0 %v10602_v33  ;;  %v1222_v30 = vshll.u32 %v11309_v21, 16 }
  0x50   : > { %9648 = vmatprep.subr.bf16.mxu1 %v10603_v34  ;;  %9570 = vmatprep.mubr.bf16.mxu0 %v704_v28  ;;  %v11331_v28 = vld [vmem:[%s11090_s16 + $0x3c] sm:$0xff]   ;;  %v1447_v43 = vsel %vm697_vm1, %v1444_v25, %v1446_v16 }
  0x51   : > { %9602 = vmatprep.mubr.bf16.mxu1 %v10604_v36  ;;  %v1445_v36 = vsel %vm697_vm1, %v1442_v7, %v1444_v25  ;;  %v1238_v48 = vshll.u32 %v11331_v28, 16  ;;  %v1242_v60 = vshrl.u32 %v11331_v28, 16  ;;  %v1452_v0 = vrot.slane %v11331_v28, 1  ;;  %v10646_v25 = vld [vmem:[%s13600_s1 + $0x1c0] sm:$0xff]  }
  0x52   : > { %9617 = vmatpush3.bf16.msra.mxu0 %v10602_v33  ;;  %v1218_v33 = vshrl.u32 %v11296_v10, 16  ;;  %v10640_v10 = vld [vmem:[%s13600_s1 + $0x190] sm:$0xff]  }
  0x53   : > { %9649 = vmatpush3.bf16.msra.mxu1 %v10603_v34  ;;  %9618 = vmatprep.subr.bf16.mxu0 %v10606_v38  ;;  %v1230_v34 = vshll.u32 %v11313_v24, 16  ;;  %v1240_v63 = vrot.slane %v1238_v48, 1 }
  0x54   : > { %9650 = vmatprep.subr.bf16.mxu1 %v10607_v41 }
  0x55   : > { %9571 = vmatmul.mubr.bf16.gmra.mxu0 %v706_v44  ;;  %v1220_v44 = vor.u32 %v1218_v33, %v1216_v29  ;;  %v1244_v4 = vor.u32 %v1242_v60, %v1240_v63  ;;  %v10653_v33 = vld [vmem:[%s13600_s1 + $0x78] sm:$0xff]  }
  0x56   : > { %9603 = vmatmul.mubr.bf16.gmra.mxu1 %v10605_v39  ;;  %9619 = vmatpush3.bf16.msra.mxu0 %v10606_v38  ;;  %v1448_v38 = vrot.slane %v11309_v21, 1  ;;  %v1217_v39 = vsel %vm307_vm0, %v1212_v27, %v1216_v29  ;;  %v11409_v27 = vld [vmem:[%s11090_s16 + $0x30] sm:$0xff]  }
  0x57   : > { %9651 = vmatpush3.bf16.msra.mxu1 %v10607_v41  ;;  %9620 = vmatprep.subr.bf16.mxu0 %v10608_v35  ;;  %v1224_v41 = vrot.slane %v1222_v30, 1  ;;  %v1949_v30 = vshll.u32 %v11397_v13, 16  ;;  %v1957_v28 = vshll.u32 %v11409_v27, 16 }
  0x58   : > { %9652 = vmatprep.subr.bf16.mxu1 %v10609_v46  ;;  %9574 = vmatprep.mubr.bf16.mxu0 %v708_v40  ;;  %v1234_v40 = vshrl.u32 %v11313_v24, 16 }
  0x59   : > { %9606 = vmatprep.mubr.bf16.mxu1 %v10610_v47  ;;  %v1232_v47 = vrot.slane %v1230_v34, 1  ;;  %v1953_v34 = vshrl.u32 %v11397_v13, 16 }
  0x5a   : > { %9621 = vmatpush3.bf16.msra.mxu0 %v10608_v35  ;;  %v1226_v35 = vshrl.u32 %v11309_v21, 16  ;;  %v1455_v21 = vsel %vm697_vm1, %v1452_v0, %v1454_v8 }
  0x5b   : > { %9653 = vmatpush3.bf16.msra.mxu1 %v10609_v46  ;;  %9622 = vmatprep.subr.bf16.mxu0 %v10612_v50  ;;  %v1450_v46 = vrot.slane %v11313_v24, 1  ;;  %v10645_v24 = vld [vmem:[%s13600_s1 + $0x180] sm:$0xff]  }
  0x5c   : > { %9654 = vmatprep.subr.bf16.mxu1 %v10613_v53 }
  0x5d   : > { %9575 = vmatmul.mubr.bf16.gmra.mxu0 %v710_v57  ;;  %v1246_v57 = vshll.u32 %v11351_v49, 16  ;;  %v1453_v9 = vsel %vm697_vm1, %v1450_v46, %v1452_v0  ;;  %v11442_v49 = vld [vmem:[%s11090_s16 + $0x48] sm:$0xff]  }
  0x5e   : > { %9607 = vmatmul.mubr.bf16.gmra.mxu1 %v10611_v51  ;;  %9623 = vmatpush3.bf16.msra.mxu0 %v10612_v50  ;;  %v1228_v50 = vor.u32 %v1226_v35, %v1224_v41  ;;  %v1860_v51 = vld [vmem:[%s11090_s16 + $0x18] sm:$0xf]  ;;  %v10655_v35 = vld [vmem:[%s13600_s1 + $0x70] sm:$0xff]  }
  0x5f   : > { %9655 = vmatpush3.bf16.msra.mxu1 %v10613_v53  ;;  %9624 = vmatprep.subr.bf16.mxu0 %v10614_v52  ;;  %v1225_v53 = vsel %vm307_vm0, %v1220_v44, %v1224_v41  ;;  %v1248_v3 = vrot.slane %v1246_v57, 1  ;;  %v10650_v41 = vld [vmem:[%s11090_s16 + $0x20] sm:$0xff]  }
  0x60   : > { %9656 = vmatprep.subr.bf16.mxu1 %v10615_v59  ;;  %9578 = vmatprep.mubr.bf16.mxu0 %v712_v61  ;;  %v1451_v61 = vsel %vm697_vm1, %v1448_v38, %v1450_v46 }
  0x61   : > { %9610 = vmatprep.mubr.bf16.mxu1 %v10616_v58  ;;  %v1252_v23 = vor.u32 %v1250_v12, %v1248_v3 }
  0x62   : > { %9625 = vmatpush3.bf16.msra.mxu0 %v10614_v52  ;;  %v1449_v52 = vsel %vm697_vm1, %v1446_v16, %v1448_v38  ;;  %v10652_v16 = vld [vmem:[%s13600_s1 + $0x238] sm:$0xff]  }
  0x63   : > { %9657 = vmatpush3.bf16.msra.mxu1 %v10615_v59  ;;  %9626 = vmatprep.subr.bf16.mxu0 %v10618_v62  ;;  %v1233_v59 = vsel %vm307_vm0, %v1228_v50, %v1232_v47  ;;  %v11424_v38 = vld [vmem:[%s11090_s16 + $0x38] sm:$0xff]   ;;  %v10660_v50 = vld [vmem:[%s13600_s1 + $0x228] sm:$0xff]  }
  0x64   : > { %9658 = vmatprep.subr.bf16.mxu1 %v10619_v2 }
  0x65   : > { %9579 = vmatmul.mubr.bf16.gmra.mxu0 %v711_v54  ;;  %v11356_v54 = vld [vmem:[%s11090_s16 + $0x1c] sm:$0xf] }
  0x66   : > { %9611 = vmatmul.mubr.bf16.gmra.mxu1 %v10617_v5  ;;  %9627 = vmatpush3.bf16.msra.mxu0 %v10618_v62  ;;  %v8218_v58 = vcombine.low %v1860_v51, %v11356_v54  ;;  %v1236_v62 = vor.u32 %v1234_v40, %v1232_v47  ;;  %v11378_v5 = vld [vmem:[%s11090_s16 + $0x20] sm:$0xff]   ;;  %v1961_v40 = vshrl.u32 %v11409_v27, 16  ;;  %v1965_v47 = vshll.u32 %v11424_v38, 16 }
  0x67   : > { %9659 = vmatpush3.bf16.msra.mxu1 %v10619_v2  ;;  %9628 = vmatprep.subr.bf16.mxu0 %v10620_v14  ;;  %v10639_v2 = vld [vmem:[%s13600_s1 + $0x1d8] sm:$0xff]   ;;  %v1941_v20 = vshll.u32 %v11378_v5, 16  ;;  %v1945_v29 = vshrl.u32 %v11378_v5, 16 }
  0x68   : > { %9660 = vmatprep.subr.bf16.mxu1 %v10621_v17  ;;  %9630 = vmatprep.mubr.bf16.mxu0 %v1201_v19  ;;  %v1936_v6 = vshll.u32 %v8218_v58, 16  ;;  %v1241_v7 = vsel %vm307_vm0, %v1236_v62, %v1240_v63  ;;  %v1934_v18 = vshrl.u32 %v8218_v58, 16  ;;  %v1967_v57 = vrot.slane %v1965_v47, 1  ;;  %v11459_v62 = vld [vmem:[%s11090_s16 + $0x50] sm:$0x1f]   ;;  %v10663_v63 = vld [vmem:[%s13600_s1 + $0x60] sm:$0xff]  }
  0x69   : > { %9662 = vmatprep.mubr.bf16.mxu1 %v1443_v22  ;;  %v10644_v22 = vld [vmem:[%s13600_s1 + $0x1c8] sm:$0xff]   ;;  %v1981_v58 = vshll.u32 %v11442_v49, 16 }
  0x6a   : > { %9629 = vmatpush3.bf16.msra.mxu0 %v10620_v14  ;;  %v1249_v14 = vsel %vm307_vm0, %v1244_v4, %v1248_v3  ;;  %v1938_v19 = vrot.slane %v1936_v6, 1  ;;  %v11467_v3 = vld [vmem:[%s11090_s16 + $0x40] sm:$0xf]  ;;  %v10664_v4 = vld [vmem:[%s11090_s16 + $0x38] sm:$0xff]   ;;  %v1989_v6 = vshll.u32 %v11459_v62, 16 }
  0x6b   : > { %9661 = vmatpush3.bf16.msra.mxu1 %v10621_v17  ;;  %9678 = vmatprep.subr.bf16.mxu0 %v10626_v15  ;;  %v10643_v17 = vld [vmem:[%s13600_s1 + $0x188] sm:$0xff]   ;;  %v1983_v12 = vrot.slane %v1981_v58, 1 }
  0x6c   : > { %9710 = vmatprep.subr.bf16.mxu1 %v10627_v26 }
  0x6d   : > { %9631 = vmatmul.mubr.bf16.vlgmr.msra.gmra.mxu0 %v1209_v31  ;;  %v10647_v31 = vld [vmem:[%s11090_s16 + $0x18] sm:$0xff]  }
  0x6e   : > { %9663 = vmatmul.mubr.bf16.vlgmr.msra.gmra.mxu1 %v1445_v36  ;;  %9679 = vmatpush3.bf16.msra.mxu0 %v10626_v15  ;;  %v1939_v15 = vor.u32 %v1938_v19, %v1934_v18  ;;  %v10670_v18 = vld [vmem:[%s13600_s1 + $0x210] sm:$0xff]   ;;  %v1991_v19 = vrot.slane %v1989_v6, 1 }
  0x6f   : > { %9711 = vmatpush3.bf16.msra.mxu1 %v10627_v26  ;;  %9680 = vmatprep.subr.bf16.mxu0 %v10628_v32  ;;  %v1943_v26 = vrot.slane %v1941_v20, 1 }
  0x70   : > { %9712 = vmatprep.subr.bf16.mxu1 %v10629_v37  ;;  %9634 = vmatprep.mubr.bf16.mxu0 %v1217_v39  ;;  %v11427_v39 = vld [vmem:[%s11090_s16 + $0x40] sm:$0xff]  }
  0x71   : > { %9666 = vmatprep.mubr.bf16.mxu1 %v1447_v43  ;;  %v1947_v36 = vor.u32 %v1945_v29, %v1943_v26  ;;  %v10656_v43 = vld [vmem:[%s11090_s16 + $0x28] sm:$0xff]   ;;  %v1973_v48 = vshll.u32 %v11427_v39, 16 }
  0x72   : > { %9681 = vmatpush3.bf16.msra.mxu0 %v10628_v32  ;;  %v1944_v32 = vsel %vm307_vm0, %v1939_v15, %v1943_v26  ;;  %v10672_v15 = vld [vmem:[%s11090_s16 + $0x48] sm:$0xff]   ;;  %v1993_v26 = vshrl.u32 %v11459_v62, 16 }
  0x73   : > { %9713 = vmatpush3.bf16.msra.mxu1 %v10629_v37  ;;  %9682 = vmatprep.subr.bf16.mxu0 %v10632_v42  ;;  %v1951_v37 = vrot.slane %v1949_v30, 1  ;;  %v1975_v60 = vrot.slane %v1973_v48, 1  ;;  %v2187_v48 = vrot.slane %v11397_v13, 1  ;;  %v10684_v13 = vld [vmem:[%s13600_s1 + $0xb8] sm:$0xff]  }
  0x74   : > { %9714 = vmatprep.subr.bf16.mxu1 %v10633_v45 }
  0x75   : > { %9635 = vmatmul.mubr.bf16.gmra.mxu0 %v1225_v53  ;;  %v1955_v44 = vor.u32 %v1953_v34, %v1951_v37  ;;  %v1952_v46 = vsel %vm307_vm0, %v1947_v36, %v1951_v37  ;;  %v10661_v53 = vld [vmem:[%s13600_s1 + $0x68] sm:$0xff]   ;;  %v10674_v34 = vld [vmem:[%s11090_s16 + $0x50] ss:$0 sps:$4 sm:$0xff]   ;;  %v2185_v36 = vrot.slane %v11378_v5, 1  ;;  %v10677_v37 = vld [vmem:[%s13600_s1 + $0x200] sm:$0xff]  }
  0x76   : > { %9667 = vmatmul.mubr.bf16.gmra.mxu1 %v1449_v52  ;;  %9683 = vmatpush3.bf16.msra.mxu0 %v10632_v42  ;;  %v10654_v42 = vld [vmem:[%s13600_s1 + $0x230] sm:$0xff]   ;;  %v1969_v52 = vshrl.u32 %v11424_v38, 16 }
  0x77   : > { %9715 = vmatpush3.bf16.msra.mxu1 %v10633_v45  ;;  %9684 = vmatprep.subr.bf16.mxu0 %v10634_v55  ;;  %v1959_v45 = vrot.slane %v1957_v28, 1  ;;  %v11506_v28 = vld [vmem:[%s11090_s16 + $0x4c] sm:$0xff]   ;;  %v2188_v58 = vsel %vm697_vm1, %v2185_v36, %v2187_v48 }
  0x78   : > { %9716 = vmatprep.subr.bf16.mxu1 %v10635_v56  ;;  %9638 = vmatprep.mubr.bf16.mxu0 %v1233_v59  ;;  %v1977_v59 = vshrl.u32 %v11427_v39, 16  ;;  %v1971_v0 = vor.u32 %v1969_v52, %v1967_v57 }
  0x79   : > { %9670 = vmatprep.mubr.bf16.mxu1 %v1451_v61  ;;  %v1960_v51 = vsel %vm307_vm0, %v1955_v44, %v1959_v45  ;;  %v10662_v61 = vld [vmem:[%s13600_s1 + $0x220] sm:$0xff]  }
  0x7a   : > { %9685 = vmatpush3.bf16.msra.mxu0 %v10634_v55  ;;  %v10658_v55 = vld [vmem:[%s11090_s16 + $0x30] sm:$0xff]  }
  0x7b   : > { %9717 = vmatpush3.bf16.msra.mxu1 %v10635_v56  ;;  %9686 = vmatprep.subr.bf16.mxu0 %v10638_v1  ;;  %v1963_v56 = vor.u32 %v1961_v40, %v1959_v45  ;;  %v11519_v45 = vld [vmem:[%s11090_s16 + $0x54] sm:$0xff]   ;;  %v11524_v40 = vld [vmem:[%s11090_s16 + $0x5c] sm:$0xff]  }
  0x7c   : > { %9718 = vmatprep.subr.bf16.mxu1 %v10639_v2  ;;  %v2514_v52 = vshll.u32 %v11519_v45, 16  ;;  %v2526_v6 = vshrl.u32 %v11524_v40, 16 }
  0x7d   : > { %9639 = vmatmul.mubr.bf16.gmra.mxu0 %v1241_v7  ;;  %v1976_v7 = vsel %vm307_vm0, %v1971_v0, %v1975_v60 }
  0x7e   : > { %9671 = vmatmul.mubr.bf16.gmra.mxu1 %v1453_v9  ;;  %9687 = vmatpush3.bf16.msra.mxu0 %v10638_v1  ;;  %v2402_v1 = vld [vmem:[%s11090_s16 + $0x3c] sm:$0xf]  ;;  %v2516_v0 = vrot.slane %v2514_v52, 1  ;;  %v10701_v52 = vld [vmem:[%s13600_s1 + $0x88] sm:$0xff]  }
  0x7f   : > { %9719 = vmatpush3.bf16.msra.mxu1 %v10639_v2  ;;  %9688 = vmatprep.subr.bf16.mxu0 %v10640_v10  ;;  %v1968_v2 = vsel %vm307_vm0, %v1963_v56, %v1967_v57  ;;  %v11474_v9 = vcombine.low %v2402_v1, %v11467_v3  ;;  %v10683_v57 = vld [vmem:[%s13600_s1 + $0x38] sm:$0xff]  }
  0x80   : > { %9720 = vmatprep.subr.bf16.mxu1 %v10641_v11  ;;  %9642 = vmatprep.mubr.bf16.mxu0 %v1249_v14  ;;  %v10668_v14 = vld [vmem:[%s13600_s1 + $0x218] sm:$0xff]  }
  0x81   : > { %9674 = vmatprep.mubr.bf16.mxu1 %v1455_v21  ;;  %v2163_v21 = vld [vmem:[%s11090_s16 + $0x18] sm:$0xe] }
  0x82   : > { %9689 = vmatpush3.bf16.msra.mxu0 %v10640_v10  ;;  %v10666_v10 = vld [vmem:[%s11090_s16 + $0x40] sm:$0xff]   ;;  %v8250_v29 = vcombine.low %v2163_v21, %v11356_v54  ;;  %v10676_v54 = vld [vmem:[%s13600_s1 + $0x48] sm:$0xff]  }
  0x83   : > { %9721 = vmatpush3.bf16.msra.mxu1 %v10641_v11  ;;  %9690 = vmatprep.subr.bf16.mxu0 %v10643_v17  ;;  %v1979_v11 = vor.u32 %v1977_v59, %v1975_v60  ;;  %v2191_v59 = vrot.slane %v11424_v38, 1  ;;  %v11541_v60 = vld [vmem:[%s11090_s16 + $0x64] sm:$0xff]   ;;  %v10686_v38 = vld [vmem:[%s13600_s1 + $0xb0] sm:$0xff]  }
  0x84   : > { %9722 = vmatprep.subr.bf16.mxu1 %v10644_v22 }
  0x85   : > { %9643 = vmatmul.mubr.bf16.gmra.mxu0 %v1252_v23  ;;  %v2493_v23 = vshll.u32 %v11474_v9, 16 }
  0x86   : > { %9675 = vmatmul.mubr.bf16.gmra.mxu1 %v1454_v8  ;;  %9691 = vmatpush3.bf16.msra.mxu0 %v10643_v17  ;;  %v1985_v8 = vshrl.u32 %v11442_v49, 16  ;;  %v10669_v17 = vld [vmem:[%s13600_s1 + $0x58] sm:$0xff]  }
  0x87   : > { %9723 = vmatpush3.bf16.msra.mxu1 %v10644_v22  ;;  %9692 = vmatprep.subr.bf16.mxu0 %v10645_v24  ;;  %v11488_v22 = vld [vmem:[%s11090_s16 + $0x44] sm:$0xff]  }
  0x88   : > { %9724 = vmatprep.subr.bf16.mxu1 %v10646_v25  ;;  %9694 = vmatprep.mubr.bf16.mxu0 %v10647_v31  ;;  %v1987_v20 = vor.u32 %v1985_v8, %v1983_v12  ;;  %v10675_v31 = vld [vmem:[%s13600_s1 + $0x208] sm:$0xff]   ;;  %v2502_v5 = vshrl.u32 %v11488_v22, 16 }
  0x89   : > { %9726 = vmatprep.mubr.bf16.mxu1 %v1944_v32  ;;  %v2491_v32 = vshrl.u32 %v11474_v9, 16  ;;  %v10689_v8 = vld [vmem:[%s13600_s1 + $0x28] sm:$0xff]  }
  0x8a   : > { %9693 = vmatpush3.bf16.msra.mxu0 %v10645_v24  ;;  %v1984_v24 = vsel %vm307_vm0, %v1979_v11, %v1983_v12  ;;  %v1992_v30 = vsel %vm307_vm0, %v1987_v20, %v1991_v19  ;;  %v11559_v11 = vld [vmem:[%s11090_s16 + $0x6c] sm:$0xff]   ;;  %v2193_v20 = vrot.slane %v11427_v39, 1 }
  0x8b   : > { %9725 = vmatpush3.bf16.msra.mxu1 %v10646_v25  ;;  %9742 = vmatprep.subr.bf16.mxu0 %v10652_v16  ;;  %v10671_v25 = vld [vmem:[%s13600_s1 + $0x50] sm:$0xff]   ;;  %v2538_v39 = vshll.u32 %v11559_v11, 16 }
  0x8c   : > { %9774 = vmatprep.subr.bf16.mxu1 %v10653_v33 }
  0x8d   : > { %9695 = vmatmul.mubr.bf16.vlgmr.msra.gmra.mxu0 %v10650_v41  ;;  %v2184_v41 = vrot.slane %v8250_v29, 1  ;;  %v2534_v29 = vshrl.u32 %v11541_v60, 16 }
  0x8e   : > { %9727 = vmatmul.mubr.bf16.vlgmr.msra.gmra.mxu1 %v1952_v46  ;;  %9743 = vmatpush3.bf16.msra.mxu0 %v10652_v16  ;;  %v2495_v16 = vrot.slane %v2493_v23, 1  ;;  %v2506_v46 = vshll.u32 %v11506_v28, 16  ;;  %v10691_v23 = vld [vmem:[%s13600_s1 + $0x20] sm:$0xff]  }
  0x8f   : > { %9775 = vmatpush3.bf16.msra.mxu1 %v10653_v33  ;;  %9744 = vmatprep.subr.bf16.mxu0 %v10654_v42  ;;  %v2498_v33 = vshll.u32 %v11488_v22, 16  ;;  %v2186_v47 = vsel %vm697_vm1, %v2184_v41, %v2185_v36  ;;  %v2540_v36 = vrot.slane %v2538_v39, 1  ;;  %v10696_v41 = vld [vmem:[%s13600_s1 + $0x98] sm:$0xff]  }
  0x90   : > { %9776 = vmatprep.subr.bf16.mxu1 %v10655_v35  ;;  %9698 = vmatprep.mubr.bf16.mxu0 %v10656_v43  ;;  %v2496_v43 = vor.u32 %v2495_v16, %v2491_v32  ;;  %v2508_v56 = vrot.slane %v2506_v46, 1  ;;  %v2195_v16 = vrot.slane %v11442_v49, 1  ;;  %v2197_v49 = vrot.slane %v11459_v62, 1  ;;  %v2858_v46 = vld [vmem:[%s11090_s16 + $0x3c] sm:$0xe] }
  0x91   : > { %9730 = vmatprep.mubr.bf16.mxu1 %v1960_v51  ;;  %v2500_v44 = vrot.slane %v2498_v33, 1  ;;  %v2542_v33 = vshrl.u32 %v11559_v11, 16 }
  0x92   : > { %9745 = vmatpush3.bf16.msra.mxu0 %v10654_v42  ;;  %v1995_v42 = vor.u32 %v1993_v26, %v1991_v19  ;;  %v10690_v19 = vld [vmem:[%s13600_s1 + $0xa8] sm:$0xff]   ;;  %v2198_v62 = vsel %vm697_vm1, %v2195_v16, %v2197_v49 }
  0x93   : > { %9777 = vmatpush3.bf16.msra.mxu1 %v10655_v35  ;;  %9746 = vmatprep.subr.bf16.mxu0 %v10660_v50  ;;  %v10678_v35 = vld [vmem:[%s13600_s1 + $0x40] sm:$0xff]   ;;  %v2501_v51 = vsel %vm307_vm0, %v2496_v43, %v2500_v44  ;;  %v2544_v43 = vor.u32 %v2542_v33, %v2540_v36 }
  0x94   : > { %9778 = vmatprep.subr.bf16.mxu1 %v10661_v53  ;;  %v10720_v33 = vld [vmem:[%s13600_s1 + $0xc0] sm:$0xff]  }
  0x95   : > { %9699 = vmatmul.mubr.bf16.gmra.mxu0 %v10658_v55  ;;  %v2504_v55 = vor.u32 %v2502_v5, %v2500_v44 }
  0x96   : > { %9731 = vmatmul.mubr.bf16.gmra.mxu1 %v1968_v2  ;;  %9747 = vmatpush3.bf16.msra.mxu0 %v10660_v50  ;;  %v2189_v50 = vrot.slane %v11409_v27, 1  ;;  %v2522_v27 = vshll.u32 %v11524_v40, 16  ;;  %v2518_v2 = vshrl.u32 %v11519_v45, 16 }
  0x97   : > { %9779 = vmatpush3.bf16.msra.mxu1 %v10661_v53  ;;  %9748 = vmatprep.subr.bf16.mxu0 %v10662_v61  ;;  %v2510_v53 = vshrl.u32 %v11506_v28, 16  ;;  %v2509_v1 = vsel %vm307_vm0, %v2504_v55, %v2508_v56 }
  0x98   : > { %9780 = vmatprep.subr.bf16.mxu1 %v10663_v63  ;;  %9702 = vmatprep.mubr.bf16.mxu0 %v10664_v4  ;;  %v2524_v4 = vrot.slane %v2522_v27, 1  ;;  %v2192_v21 = vsel %vm697_vm1, %v2189_v50, %v2191_v59 }
  0x99   : > { %9734 = vmatprep.mubr.bf16.mxu1 %v1976_v7  ;;  %v2190_v7 = vsel %vm697_vm1, %v2187_v48, %v2189_v50 }
  0x9a   : > { %9749 = vmatpush3.bf16.msra.mxu0 %v10662_v61  ;;  %v10685_v61 = vld [vmem:[%s13600_s1 + $0x30] sm:$0xff]  }
  0x9b   : > { %9781 = vmatpush3.bf16.msra.mxu1 %v10663_v63  ;;  %9750 = vmatprep.subr.bf16.mxu0 %v10668_v14  ;;  %v2512_v63 = vor.u32 %v2510_v53, %v2508_v56  ;;  %v10700_v53 = vld [vmem:[%s13600_s1 + $0x8] sm:$0xff]  }
  0x9c   : > { %9782 = vmatprep.subr.bf16.mxu1 %v10669_v17 }
  0x9d   : > { %9703 = vmatmul.mubr.bf16.gmra.mxu0 %v10666_v10  ;;  %v2530_v10 = vshll.u32 %v11541_v60, 16  ;;  %v2517_v12 = vsel %vm307_vm0, %v2512_v63, %v2516_v0  ;;  %v2883_v63 = vrot.slane %v11519_v45, 1 }
  0x9e   : > { %9735 = vmatmul.mubr.bf16.gmra.mxu1 %v1984_v24  ;;  %9751 = vmatpush3.bf16.msra.mxu0 %v10668_v14  ;;  %v11563_v14 = vld [vmem:[%s11090_s16 + $0x74] sm:$0xf]  ;;  %v2528_v24 = vor.u32 %v2526_v6, %v2524_v4  ;;  %v10711_v6 = vld [vmem:[%s13600_s1 + $0xe0] sm:$0xff]  }
  0x9f   : > { %9783 = vmatpush3.bf16.msra.mxu1 %v10669_v17  ;;  %9752 = vmatprep.subr.bf16.mxu0 %v10670_v18  ;;  %v2520_v17 = vor.u32 %v2518_v2, %v2516_v0  ;;  %v2885_v2 = vrot.slane %v11524_v40, 1 }
  0xa0   : > { %9784 = vmatprep.subr.bf16.mxu1 %v10671_v25  ;;  %9706 = vmatprep.mubr.bf16.mxu0 %v10672_v15 }
  0xa1   : > { %9738 = vmatprep.mubr.bf16.mxu1 %v1992_v30  ;;  %v2525_v26 = vsel %vm307_vm0, %v2520_v17, %v2524_v4  ;;  %v10692_v30 = vld [vmem:[%s13600_s1 + $0xa0] sm:$0xff]   ;;  %v10709_v4 = vld [vmem:[%s13600_s1 + $0xe8] sm:$0xff]  }
  0xa2   : > { %9753 = vmatpush3.bf16.msra.mxu0 %v10670_v18  ;;  %v2433_v18 = vld [vmem:[%s11090_s16 + $0x78] sm:$0x1] }
  0xa3   : > { %9785 = vmatpush3.bf16.msra.mxu1 %v10671_v25  ;;  %9754 = vmatprep.subr.bf16.mxu0 %v10675_v31  ;;  %v2532_v25 = vrot.slane %v2530_v10, 1  ;;  %v11575_v15 = vcombine.low %v11563_v14, %v2433_v18  ;;  %v2886_v10 = vsel %vm697_vm1, %v2883_v63, %v2885_v2 }
  0xa4   : > { %9786 = vmatprep.subr.bf16.mxu1 %v10676_v54 }
  0xa5   : > { %9707 = vmatmul.mubr.bf16.gmra.mxu0 %v10674_v34  ;;  %v2533_v32 = vsel %vm307_vm0, %v2528_v24, %v2532_v25  ;;  %v2546_v34 = vshll.u32 %v11575_v15, 16  ;;  %v2550_v50 = vshrl.u32 %v11575_v15, 16 }
  0xa6   : > { %9739 = vmatmul.mubr.bf16.gmra.mxu1 %v1995_v42  ;;  %9755 = vmatpush3.bf16.msra.mxu0 %v10675_v31  ;;  %v2194_v31 = vsel %vm697_vm1, %v2191_v59, %v2193_v20  ;;  %v2196_v42 = vsel %vm697_vm1, %v2193_v20, %v2195_v16  ;;  %v2881_v59 = vrot.slane %v11506_v28, 1  ;;  %v10713_v20 = vld [vmem:[%s13600_s1 + $0xd8] sm:$0xff]   ;;  %v8292_v16 = vcombine.low %v11563_v14, %v11563_v14 }
  0xa7   : > { %9787 = vmatpush3.bf16.msra.mxu1 %v10676_v54  ;;  %9756 = vmatprep.subr.bf16.mxu0 %v10677_v37  ;;  %v2536_v54 = vor.u32 %v2534_v29, %v2532_v25  ;;  %v2548_v44 = vrot.slane %v2546_v34, 1  ;;  %v10721_v34 = vld [vmem:[%s13600_s1 + $0x100] sm:$0xff]  }
  0xa8   : > { %9788 = vmatprep.subr.bf16.mxu1 %v10678_v35  ;;  %9758 = vmatprep.mubr.bf16.mxu0 %v2186_v47  ;;  %v10698_v47 = vld [vmem:[%s13600_s1 + $0x90] sm:$0xff]  }
  0xa9   : > { %9790 = vmatprep.mubr.bf16.mxu1 %v2501_v51  ;;  %v2541_v5 = vsel %vm307_vm0, %v2536_v54, %v2540_v36  ;;  %v2549_v48 = vsel %vm307_vm0, %v2544_v43, %v2548_v44  ;;  %v8317_v51 = vcombine.low %v2858_v46, %v11467_v3  ;;  %v2552_v55 = vor.u32 %v2550_v50, %v2548_v44  ;;  %v10702_v3 = vld [vmem:[%s13600_s1] sm:$0xff]   ;;  %v11716_v46 = vld [vmem:[%s11090_s16 + $0x68] sm:$0xff]  }
  0xaa   : > { %9757 = vmatpush3.bf16.msra.mxu0 %v10677_v37  ;;  %v10695_v37 = vld [vmem:[%s13600_s1 + $0x18] sm:$0xff]  }
  0xab   : > { %9789 = vmatpush3.bf16.msra.mxu1 %v10678_v35  ;;  %9806 = vmatprep.subr.bf16.mxu0 %v10683_v57  ;;  %v10697_v35 = vld [vmem:[%s13600_s1 + $0x10] sm:$0xff]   ;;  %v2878_v56 = vrot.slane %v8317_v51, 1 }
  0xac   : > { %9838 = vmatprep.subr.bf16.mxu1 %v10684_v13 }
  0xad   : > { %9759 = vmatmul.mubr.bf16.vlgmr.msra.gmra.mxu0 %v2188_v58  ;;  %v10705_v58 = vld [vmem:[%s13600_s1 + $0xf8] sm:$0xff]  }
  0xae   : > { %9791 = vmatmul.mubr.bf16.vlgmr.msra.gmra.mxu1 %v2509_v1  ;;  %9807 = vmatpush3.bf16.msra.mxu0 %v10683_v57  ;;  %v2879_v57 = vrot.slane %v11488_v22, 1  ;;  %v10707_v1 = vld [vmem:[%s13600_s1 + $0xf0] sm:$0xff]  }
  0xaf   : > { %9839 = vmatpush3.bf16.msra.mxu1 %v10684_v13  ;;  %9808 = vmatprep.subr.bf16.mxu0 %v10685_v61  ;;  %v10703_v13 = vld [vmem:[%s13600_s1 + $0x80] sm:$0xff]  }
  0xb0   : > { %9840 = vmatprep.subr.bf16.mxu1 %v10686_v38  ;;  %9762 = vmatprep.mubr.bf16.mxu0 %v2190_v7  ;;  %v2880_v27 = vsel %vm697_vm1, %v2878_v56, %v2879_v57  ;;  %v2882_v0 = vsel %vm697_vm1, %v2879_v57, %v2881_v59  ;;  %v2887_v7 = vrot.slane %v11541_v60, 1  ;;  %v3400_v57 = vshll.u32 %v11716_v46, 16 }
  0xb1   : > { %9794 = vmatprep.mubr.bf16.mxu1 %v2517_v12  ;;  %v11655_v12 = vld [vmem:[%s11090_s16 + $0x4c] sm:$0xf] }
  0xb2   : > { %9809 = vmatpush3.bf16.msra.mxu0 %v10685_v61  ;;  %v10706_v61 = vld [vmem:[%s13600_s1 + $0x138] sm:$0xff]   ;;  %v2888_v17 = vsel %vm697_vm1, %v2885_v2, %v2887_v7  ;;  %v3402_v2 = vrot.slane %v3400_v57, 1 }
  0xb3   : > { %9841 = vmatpush3.bf16.msra.mxu1 %v10686_v38  ;;  %9810 = vmatprep.subr.bf16.mxu0 %v10689_v8  ;;  %v10708_v38 = vld [vmem:[%s13600_s1 + $0x130] sm:$0xff]  }
  0xb4   : > { %9842 = vmatprep.subr.bf16.mxu1 %v10690_v19 }
  0xb5   : > { %9763 = vmatmul.mubr.bf16.gmra.mxu0 %v2192_v21  ;;  %v2891_v21 = vrot.slane %v11575_v15, 1  ;;  %v10718_v15 = vld [vmem:[%s13600_s1 + $0xc8] sm:$0xff]  }
  0xb6   : > { %9795 = vmatmul.mubr.bf16.gmra.mxu1 %v2525_v26  ;;  %9811 = vmatpush3.bf16.msra.mxu0 %v10689_v8  ;;  %v3296_v8 = vld [vmem:[%s11090_s16 + $0x48] sm:$0xf]  ;;  %v10716_v26 = vld [vmem:[%s13600_s1 + $0x110] sm:$0xff]  }
  0xb7   : > { %9843 = vmatpush3.bf16.msra.mxu1 %v10690_v19  ;;  %9812 = vmatprep.subr.bf16.mxu0 %v10691_v23  ;;  %v8374_v18 = vcombine.low %v3296_v8, %v11655_v12  ;;  %v2889_v19 = vrot.slane %v11559_v11, 1  ;;  %v10733_v8 = vld [vmem:[%s11090_s16 + $0x60] sm:$0xff]  }
  0xb8   : > { %9844 = vmatprep.subr.bf16.mxu1 %v10692_v30  ;;  %9766 = vmatprep.mubr.bf16.mxu0 %v2194_v31 }
  0xb9   : > { %9798 = vmatprep.mubr.bf16.mxu1 %v2533_v32  ;;  %v3371_v24 = vshll.u32 %v8374_v18, 16  ;;  %v2890_v25 = vsel %vm697_vm1, %v2887_v7, %v2889_v19  ;;  %v3369_v29 = vshrl.u32 %v8374_v18, 16  ;;  %v2892_v39 = vsel %vm697_vm1, %v2889_v19, %v2891_v21  ;;  %v11689_v32 = vld [vmem:[%s11090_s16 + $0x58] sm:$0xff]   ;;  %v11753_v18 = vld [vmem:[%s11090_s16 + $0x80] sm:$0x1f]  }
  0xba   : > { %9813 = vmatpush3.bf16.msra.mxu0 %v10691_v23  ;;  %v11673_v23 = vld [vmem:[%s11090_s16 + $0x50] sm:$0xff]   ;;  %v3384_v14 = vshll.u32 %v11689_v32, 16 }
  0xbb   : > { %9845 = vmatpush3.bf16.msra.mxu1 %v10692_v30  ;;  %9814 = vmatprep.subr.bf16.mxu0 %v10695_v37  ;;  %v3373_v30 = vrot.slane %v3371_v24, 1  ;;  %v3376_v31 = vshll.u32 %v11673_v23, 16 }
  0xbc   : > { %9846 = vmatprep.subr.bf16.mxu1 %v10696_v41 }
  0xbd   : > { %9767 = vmatmul.mubr.bf16.gmra.mxu0 %v2196_v42  ;;  %v3374_v54 = vor.u32 %v3373_v30, %v3369_v29  ;;  %v3378_v36 = vrot.slane %v3376_v31, 1 }
  0xbe   : > { %9799 = vmatmul.mubr.bf16.gmra.mxu1 %v2541_v5  ;;  %9815 = vmatpush3.bf16.msra.mxu0 %v10695_v37  ;;  %v3380_v37 = vshrl.u32 %v11673_v23, 16  ;;  %v3386_v5 = vrot.slane %v3384_v14, 1  ;;  %v10743_v14 = vld [vmem:[%s13600_s1 + $0x158] sm:$0xff]  }
  0xbf   : > { %9847 = vmatpush3.bf16.msra.mxu1 %v10696_v41  ;;  %9816 = vmatprep.subr.bf16.mxu0 %v10697_v35  ;;  %v10722_v41 = vld [vmem:[%s11090_s16 + $0x48] sm:$0xff]   ;;  %v3379_v42 = vsel %vm307_vm0, %v3374_v54, %v3378_v36  ;;  %v10741_v54 = vld [vmem:[%s11090_s16 + $0x70] sm:$0xff]  }
  0xc0   : > { %9848 = vmatprep.subr.bf16.mxu1 %v10698_v47  ;;  %9770 = vmatprep.mubr.bf16.mxu0 %v2198_v62  ;;  %v3382_v44 = vor.u32 %v3380_v37, %v3378_v36  ;;  %v10728_v62 = vld [vmem:[%s13600_s1 + $0x1b8] sm:$0xff]  }
  0xc1   : > { %9802 = vmatprep.mubr.bf16.mxu1 %v2549_v48  ;;  %v11723_v48 = vld [vmem:[%s11090_s16 + $0x70] sm:$0xff]  }
  0xc2   : > { %9817 = vmatpush3.bf16.msra.mxu0 %v10697_v35  ;;  %v3388_v35 = vshrl.u32 %v11689_v32, 16  ;;  %v3412_v24 = vshrl.u32 %v11723_v48, 16 }
  0xc3   : > { %9849 = vmatpush3.bf16.msra.mxu1 %v10698_v47  ;;  %9818 = vmatprep.subr.bf16.mxu0 %v10700_v53  ;;  %v10725_v47 = vld [vmem:[%s11090_s16 + $0x50] sm:$0xff]  }
  0xc4   : > { %9850 = vmatprep.subr.bf16.mxu1 %v10701_v52  ;;  %v3390_v50 = vor.u32 %v3388_v35, %v3386_v5 }
  0xc5   : > { %9771 = vmatmul.mubr.bf16.gmra.mxu0 %v2197_v49  ;;  %v10727_v49 = vld [vmem:[%s13600_s1 + $0x178] sm:$0xff]  }
  0xc6   : > { %9803 = vmatmul.mubr.bf16.gmra.mxu1 %v2552_v55  ;;  %9819 = vmatpush3.bf16.msra.mxu0 %v10700_v53  ;;  %v3387_v53 = vsel %vm307_vm0, %v3382_v44, %v3386_v5  ;;  %v10730_v55 = vld [vmem:[%s13600_s1 + $0x1b0] sm:$0xff]  }
  0xc7   : > { %9851 = vmatpush3.bf16.msra.mxu1 %v10701_v52  ;;  %9820 = vmatprep.subr.bf16.mxu0 %v10702_v3  ;;  %v10729_v52 = vld [vmem:[%s13600_s1 + $0x170] sm:$0xff]  }
  0xc8   : > { %9852 = vmatprep.subr.bf16.mxu1 %v10703_v13  ;;  %9822 = vmatprep.mubr.bf16.mxu0 %v11474_v9  ;;  %v2884_v9 = vsel %vm697_vm1, %v2881_v59, %v2883_v63  ;;  %v3408_v59 = vshll.u32 %v11723_v48, 16  ;;  %v10736_v63 = vld [vmem:[%s13600_s1 + $0x1a8] sm:$0xff]   ;;  %v10746_v5 = vld [vmem:[%s13600_s1 + $0x190] sm:$0xff]  }
  0xc9   : > { %9854 = vmatprep.mubr.bf16.mxu1 %v2880_v27  ;;  %v10735_v27 = vld [vmem:[%s13600_s1 + $0x168] sm:$0xff]  }
  0xca   : > { %9821 = vmatpush3.bf16.msra.mxu0 %v10702_v3  ;;  %v10731_v3 = vld [vmem:[%s11090_s16 + $0x58] sm:$0xff]  }
  0xcb   : > { %9853 = vmatpush3.bf16.msra.mxu1 %v10703_v13  ;;  %9870 = vmatprep.subr.bf16.mxu0 %v10705_v58 }
  0xcc   : > { %9902 = vmatprep.subr.bf16.mxu1 %v10706_v61 }
  0xcd   : > { %9823 = vmatmul.mubr.bf16.vlgmr.msra.gmra.mxu0 %v11488_v22  ;;  %v10710_v22 = vld [vmem:[%s13600_s1 + $0x128] sm:$0xff]  }
  0xce   : > { %9855 = vmatmul.mubr.bf16.vlgmr.msra.gmra.mxu1 %v2882_v0  ;;  %9871 = vmatpush3.bf16.msra.mxu0 %v10705_v58  ;;  %v3404_v0 = vshrl.u32 %v11716_v46, 16 }
  0xcf   : > { %9903 = vmatpush3.bf16.msra.mxu1 %v10706_v61  ;;  %9872 = vmatprep.subr.bf16.mxu0 %v10707_v1 }
  0xd0   : > { %9904 = vmatprep.subr.bf16.mxu1 %v10708_v38  ;;  %9826 = vmatprep.mubr.bf16.mxu0 %v11506_v28  ;;  %v10712_v28 = vld [vmem:[%s13600_s1 + $0x120] sm:$0xff]  }
  0xd1   : > { %9858 = vmatprep.mubr.bf16.mxu1 %v2884_v9 }
  0xd2   : > { %9873 = vmatpush3.bf16.msra.mxu0 %v10707_v1 }
  0xd3   : > { %9905 = vmatpush3.bf16.msra.mxu1 %v10708_v38  ;;  %9874 = vmatprep.subr.bf16.mxu0 %v10709_v4 }
  0xd4   : > { %9906 = vmatprep.subr.bf16.mxu1 %v10710_v22 }
  0xd5   : > { %9827 = vmatmul.mubr.bf16.gmra.mxu0 %v11519_v45  ;;  %v10714_v45 = vld [vmem:[%s13600_s1 + $0x118] sm:$0xff]  }
  0xd6   : > { %9859 = vmatmul.mubr.bf16.gmra.mxu1 %v2886_v10  ;;  %9875 = vmatpush3.bf16.msra.mxu0 %v10709_v4  ;;  %v11747_v4 = vld [vmem:[%s11090_s16 + $0x78] sm:$0xff]   ;;  %v3410_v10 = vrot.slane %v3408_v59, 1 }
  0xd7   : > { %9907 = vmatpush3.bf16.msra.mxu1 %v10710_v22  ;;  %9876 = vmatprep.subr.bf16.mxu0 %v10711_v6 }
  0xd8   : > { %9908 = vmatprep.subr.bf16.mxu1 %v10712_v28  ;;  %9830 = vmatprep.mubr.bf16.mxu0 %v11524_v40  ;;  %v10715_v40 = vld [vmem:[%s13600_s1 + $0xd0] sm:$0xff]   ;;  %v3414_v36 = vor.u32 %v3412_v24, %v3410_v10  ;;  %v10753_v24 = vld [vmem:[%s13600_s1 + $0x180] sm:$0xff]  }
  0xd9   : > { %9862 = vmatprep.mubr.bf16.mxu1 %v2888_v17  ;;  %v3406_v17 = vor.u32 %v3404_v0, %v3402_v2  ;;  %v10750_v0 = vld [vmem:[%s13600_s1 + $0x148] sm:$0xff]  }
  0xda   : > { %9877 = vmatpush3.bf16.msra.mxu0 %v10711_v6 }
  0xdb   : > { %9909 = vmatpush3.bf16.msra.mxu1 %v10712_v28  ;;  %9878 = vmatprep.subr.bf16.mxu0 %v10713_v20  ;;  %v3411_v31 = vsel %vm307_vm0, %v3406_v17, %v3410_v10 }
  0xdc   : > { %9910 = vmatprep.subr.bf16.mxu1 %v10714_v45 }
  0xdd   : > { %9831 = vmatmul.mubr.bf16.gmra.mxu0 %v11541_v60  ;;  %v10719_v60 = vld [vmem:[%s13600_s1 + $0x108] sm:$0xff]  }
  0xde   : > { %9863 = vmatmul.mubr.bf16.gmra.mxu1 %v2890_v25  ;;  %9879 = vmatpush3.bf16.msra.mxu0 %v10713_v20  ;;  %v3416_v25 = vshll.u32 %v11747_v4, 16 }
  0xdf   : > { %9911 = vmatpush3.bf16.msra.mxu1 %v10714_v45  ;;  %9880 = vmatprep.subr.bf16.mxu0 %v10715_v40 }
  0xe0   : > { %9912 = vmatprep.subr.bf16.mxu1 %v10716_v26  ;;  %9834 = vmatprep.mubr.bf16.mxu0 %v11559_v11  ;;  %v11704_v11 = vld [vmem:[%s11090_s16 + $0x60] sm:$0xff]   ;;  %v3418_v37 = vrot.slane %v3416_v25, 1 }
  0xe1   : > { %9866 = vmatprep.mubr.bf16.mxu1 %v2892_v39  ;;  %v3392_v43 = vshll.u32 %v11704_v11, 16  ;;  %v3396_v56 = vshrl.u32 %v11704_v11, 16 }
  0xe2   : > { %9881 = vmatpush3.bf16.msra.mxu0 %v10715_v40 }
  0xe3   : > { %9913 = vmatpush3.bf16.msra.mxu1 %v10716_v26  ;;  %9882 = vmatprep.subr.bf16.mxu0 %v10718_v15  ;;  %v3394_v51 = vrot.slane %v3392_v43, 1  ;;  %v10738_v26 = vld [vmem:[%s13600_s1 + $0x1a0] sm:$0xff]   ;;  %v10745_v43 = vld [vmem:[%s13600_s1 + $0x150] sm:$0xff]  }
  0xe4   : > { %9914 = vmatprep.subr.bf16.mxu1 %v10719_v60 }
  0xe5   : > { %9835 = vmatmul.mubr.bf16.gmra.mxu0 %v8292_v16  ;;  %v3395_v61 = vsel %vm307_vm0, %v3390_v50, %v3394_v51  ;;  %v3398_v9 = vor.u32 %v3396_v56, %v3394_v51  ;;  %v3424_v16 = vshll.u32 %v11753_v18, 16  ;;  %v3598_v50 = vld [vmem:[%s11090_s16 + $0x48] sm:$0xe]  ;;  %v10747_v56 = vld [vmem:[%s11090_s16 + $0x78] sm:$0xff]  }
  0xe6   : > { %9867 = vmatmul.mubr.bf16.gmra.mxu1 %v2891_v21  ;;  %9883 = vmatpush3.bf16.msra.mxu0 %v10718_v15  ;;  %v10737_v21 = vld [vmem:[%s13600_s1 + $0x160] sm:$0xff]   ;;  %v10739_v15 = vld [vmem:[%s11090_s16 + $0x68] sm:$0xff]  }
  0xe7   : > { %9915 = vmatpush3.bf16.msra.mxu1 %v10719_v60  ;;  %9884 = vmatprep.subr.bf16.mxu0 %v10720_v33  ;;  %v3403_v45 = vsel %vm307_vm0, %v3398_v9, %v3402_v2  ;;  %v3420_v60 = vshrl.u32 %v11747_v4, 16  ;;  %v10751_v9 = vld [vmem:[%s13600_s1 + $0x188] sm:$0xff]  }
  0xe8   : > { %9916 = vmatprep.subr.bf16.mxu1 %v10721_v34  ;;  %9886 = vmatprep.mubr.bf16.mxu0 %v10722_v41 }
  0xe9   : > { %9918 = vmatprep.mubr.bf16.mxu1 %v3379_v42 }
  0xea   : > { %9885 = vmatpush3.bf16.msra.mxu0 %v10720_v33 }
  0xeb   : > { %9917 = vmatpush3.bf16.msra.mxu1 %v10721_v34  ;;  %9934 = vmatprep.subr.bf16.mxu0 %v10727_v49 }
  0xec   : > { %9966 = vmatprep.subr.bf16.mxu1 %v10728_v62 }
  0xed   : > { %v9504_v13 = vpop.f32.mrf.mxu0  ;;  %9887 = vmatmul.mubr.bf16.vlgmr.msra.gmra.mxu0 %v10725_v47  ;;  %v3422_v47 = vor.u32 %v3420_v60, %v3418_v37  ;;  %v10757_v60 = vld [vmem:[%s13600_s1 + $0x1f8] sm:$0xff]  }
  0xee   : > { %v9536_v58 = vpop.f32.mrf.mxu1  ;;  %9919 = vmatmul.mubr.bf16.vlgmr.msra.gmra.mxu1 %v3387_v53  ;;  %9935 = vmatpush3.bf16.msra.mxu0 %v10727_v49  ;;  %v10744_v49 = vld [vmem:[%s13600_s1 + $0x198] sm:$0xff]  }
  0xef   : > { %v11744_v1 = vadd.f32 %v9536_v58, %v9504_v13  ;;  %9967 = vmatpush3.bf16.msra.mxu1 %v10728_v62  ;;  %v461_v38 = vpop.f32.mrf.mxu0  ;;  %9936 = vmatprep.subr.bf16.mxu0 %v10729_v52  ;;  %v3426_v62 = vrot.slane %v3424_v16, 1  ;;  %v8406_v13 = vcombine.low %v3598_v50, %v11655_v12  ;;  %v3428_v58 = vshrl.u32 %v11753_v18, 16  ;;  %v10749_v12 = vld [vmem:[%s11090_s16 + $0x80] ss:$0 sps:$4 sm:$0xff]  }
  0xf0   : > { %v614_v22 = vpop.f32.mrf.mxu1  ;;  %9968 = vmatprep.subr.bf16.mxu1 %v10730_v55  ;;  %9890 = vmatprep.mubr.bf16.mxu0 %v10731_v3 }
  0xf1   : > { %v11749_v6 = vadd.f32 %v614_v22, %v461_v38  ;;  %v9505_v7 = vpop.f32.mrf.mxu0  ;;  %9922 = vmatprep.mubr.bf16.mxu1 %v3395_v61  ;;  %v3427_v59 = vsel %vm307_vm0, %v3422_v47, %v3426_v62 }
  0xf2   : > { %v9537_v28 = vpop.f32.mrf.mxu1  ;;  %9937 = vmatpush3.bf16.msra.mxu0 %v10729_v52  ;;  %v3419_v52 = vsel %vm307_vm0, %v3414_v36, %v3418_v37  ;;  %v3623_v36 = vrot.slane %v11704_v11, 1 }
  0xf3   : > { %v11755_v19 = vadd.f32 %v9537_v28, %v9505_v7  ;;  %9969 = vmatpush3.bf16.msra.mxu1 %v10730_v55  ;;  %v464_v20 = vpop.f32.mrf.mxu0  ;;  %9938 = vmatprep.subr.bf16.mxu0 %v10735_v27  ;;  %v3618_v7 = vrot.slane %v8406_v13, 1  ;;  %v3430_v28 = vor.u32 %v3428_v58, %v3426_v62  ;;  %v10761_v62 = vld [vmem:[%s11090_s16 + $0x64] sm:$0xff]  }
  0xf4   : > { %v617_v40 = vpop.f32.mrf.mxu1  ;;  %9970 = vmatprep.subr.bf16.mxu1 %v10736_v63 }
  0xf5   : > { %v11767_v29 = vadd.f32 %v617_v40, %v464_v20  ;;  %v9508_v39 = vpop.f32.mrf.mxu0  ;;  %9891 = vmatmul.mubr.bf16.gmra.mxu0 %v10733_v8  ;;  %v3619_v8 = vrot.slane %v11673_v23, 1 }
  0xf6   : > { %v9540_v30 = vpop.f32.mrf.mxu1  ;;  %9923 = vmatmul.mubr.bf16.gmra.mxu1 %v3403_v45  ;;  %9939 = vmatpush3.bf16.msra.mxu0 %v10735_v27  ;;  %v10752_v45 = vld [vmem:[%s13600_s1 + $0x140] sm:$0xff]  }
  0xf7   : > { %v11772_v33 = vadd.f32 %v9540_v30, %v9508_v39  ;;  %9971 = vmatpush3.bf16.msra.mxu1 %v10736_v63  ;;  %v477_v34 = vpop.f32.mrf.mxu0  ;;  %9940 = vmatprep.subr.bf16.mxu0 %v10737_v21  ;;  %v3620_v40 = vsel %vm697_vm1, %v3618_v7, %v3619_v8  ;;  %v3621_v39 = vrot.slane %v11689_v32, 1 }
  0xf8   : > { %v630_v41 = vpop.f32.mrf.mxu1  ;;  %9972 = vmatprep.subr.bf16.mxu1 %v10738_v26  ;;  %9894 = vmatprep.mubr.bf16.mxu0 %v10739_v15 }
  0xf9   : > { %v11781_v42 = vadd.f32 %v630_v41, %v477_v34  ;;  %v9509_v35 = vpop.f32.mrf.mxu0  ;;  %9926 = vmatprep.mubr.bf16.mxu1 %v3411_v31  ;;  %v10758_v34 = vld [vmem:[%s13600_s1 + $0x238] sm:$0xff]   ;;  %v3624_v47 = vsel %vm697_vm1, %v3621_v39, %v3623_v36 }
  0xfa   : > { %v9541_v44 = vpop.f32.mrf.mxu1  ;;  %9941 = vmatpush3.bf16.msra.mxu0 %v10737_v21  ;;  %v10756_v41 = vld [vmem:[%s11090_s16 + $0x5c] sm:$0xff]  }
  0xfb   : > { %v11790_v51 = vadd.f32 %v9541_v44, %v9509_v35  ;;  %9973 = vmatpush3.bf16.msra.mxu1 %v10738_v26  ;;  %v480_v53 = vpop.f32.mrf.mxu0  ;;  %9942 = vmatprep.subr.bf16.mxu0 %v10743_v14  ;;  %v10755_v26 = vld [vmem:[%s11090_s16 + $0x54] sm:$0xff]  }
  0xfc   : > { %v633_v55 = vpop.f32.mrf.mxu1  ;;  %9974 = vmatprep.subr.bf16.mxu1 %v10744_v49  ;;  %v10759_v35 = vld [vmem:[%s13600_s1 + $0x1f0] sm:$0xff]  }
  0xfd   : > { %v11794_v57 = vadd.f32 %v633_v55, %v480_v53  ;;  %v9512_v3 = vpop.f32.mrf.mxu0  ;;  %9895 = vmatmul.mubr.bf16.gmra.mxu0 %v10741_v54  ;;  %v10760_v44 = vld [vmem:[%s13600_s1 + $0x230] sm:$0xff]  }
  0xfe   : > { %v9544_v27 = vpop.f32.mrf.mxu1  ;;  %9927 = vmatmul.mubr.bf16.gmra.mxu1 %v3419_v52  ;;  %9943 = vmatpush3.bf16.msra.mxu0 %v10743_v14  ;;  %v3622_v14 = vsel %vm697_vm1, %v3619_v8, %v3621_v39  ;;  %v3625_v52 = vrot.slane %v11716_v46, 1  ;;  %v10764_v46 = vld [vmem:[%s13600_s1 + $0x228] sm:$0xff]  }
  0xff   : > { %v11799_v61 = vadd.f32 %v9544_v27, %v9512_v3  ;;  %9975 = vmatpush3.bf16.msra.mxu1 %v10744_v49  ;;  %v493_v63 = vpop.f32.mrf.mxu0  ;;  %9944 = vmatprep.subr.bf16.mxu0 %v10745_v43 }
 0x100   : > { %v646_v38 = vpop.f32.mrf.mxu1  ;;  %9976 = vmatprep.subr.bf16.mxu1 %v10746_v5  ;;  %9898 = vmatprep.mubr.bf16.mxu0 %v10747_v56  ;;  %v10763_v56 = vld [vmem:[%s13600_s1 + $0x1e8] sm:$0xff]  }
 0x101   : > { %v11808_v2 = vadd.f32 %v646_v38, %v493_v63  ;;  %v9513_v22 = vpop.f32.mrf.mxu0  ;;  %9930 = vmatprep.mubr.bf16.mxu1 %v3427_v59  ;;  %v3627_v59 = vrot.slane %v11723_v48, 1  ;;  %v4036_v63 = vld [vmem:[%s11090_s16 + $0x54] sm:$0xf]  ;;  %v10765_v48 = vld [vmem:[%s13600_s1 + $0x1e0] sm:$0xff]  }
 0x102   : > { %v9545_v10 = vpop.f32.mrf.mxu1  ;;  %9945 = vmatpush3.bf16.msra.mxu0 %v10745_v43 }
 0x103   : > { %v11811_v17 = vadd.f32 %v9545_v10, %v9513_v22  ;;  %9977 = vmatpush3.bf16.msra.mxu1 %v10746_v5  ;;  %v496_v20 = vpop.f32.mrf.mxu0  ;;  %9946 = vmatprep.subr.bf16.mxu0 %v10750_v0 }
 0x104   : > { %v649_v21 = vpop.f32.mrf.mxu1  ;;  %9978 = vmatprep.subr.bf16.mxu1 %v10751_v9 }
 0x105   : > { %v11819_v23 = vadd.f32 %v649_v21, %v496_v20  ;;  %v9516_v25 = vpop.f32.mrf.mxu0  ;;  %9899 = vmatmul.mubr.bf16.gmra.mxu0 %v10749_v12  ;;  %v3628_v20 = vsel %vm697_vm1, %v3625_v52, %v3627_v59 }
 0x106   : > { %v9548_v15 = vpop.f32.mrf.mxu1  ;;  %9931 = vmatmul.mubr.bf16.gmra.mxu1 %v3430_v28  ;;  %9947 = vmatpush3.bf16.msra.mxu0 %v10750_v0 }
 0x107   : > { %v11824_v30 = vadd.f32 %v9548_v15, %v9516_v25  ;;  %9979 = vmatpush3.bf16.msra.mxu1 %v10751_v9  ;;  %v509_v31 = vpop.f32.mrf.mxu0  ;;  %9948 = vmatprep.subr.bf16.mxu0 %v10752_v45  ;;  %v11866_v9 = vld [vmem:[%s11090_s16 + $0x58] sm:$0xf] }
 0x108   : > { %v662_v16 = vpop.f32.mrf.mxu1  ;;  %9980 = vmatprep.subr.bf16.mxu1 %v10753_v24  ;;  %9950 = vmatprep.mubr.bf16.mxu0 %v3620_v40  ;;  %v11880_v21 = vcombine.low %v4036_v63, %v11866_v9  ;;  %v10769_v15 = vld [vmem:[%s13600_s1 + $0x1d8] sm:$0xff]   ;;  %v10776_v63 = vld [vmem:[%s13600_s1 + $0x208] sm:$0xff]  }
 0x109   : > { %v11832_v54 = vadd.f32 %v662_v16, %v509_v31  ;;  %v9517_v32 = vpop.f32.mrf.mxu0  ;;  %9982 = vmatprep.mubr.bf16.mxu1 %v10755_v26 }
 0x10a   : > { %v9549_v37 = vpop.f32.mrf.mxu1  ;;  %9949 = vmatpush3.bf16.msra.mxu0 %v10752_v45  ;;  %v10767_v45 = vld [vmem:[%s11090_s16 + $0x74] sm:$0xff]   ;;  %v4111_v32 = vshll.u32 %v11880_v21, 16 }
 0x10b   : > { %9981 = vmatpush3.bf16.msra.mxu1 %v10753_v24  ;;  %v512_v49 = vpop.f32.mrf.mxu0  ;;  %9998 = vmatprep.subr.bf16.mxu0 %v10757_v60 }
 0x10c   : > { %v665_v43 = vpop.f32.mrf.mxu1  ;;  %10030 = vmatprep.subr.bf16.mxu1 %v10758_v34 }
 0x10d   : > { %v11843_v11 = vadd.f32 %v665_v43, %v512_v49  ;;  %v9568_v5 = vpop.f32.mrf.mxu0  ;;  %9951 = vmatmul.mubr.bf16.vlgmr.msra.gmra.mxu0 %v3622_v14  ;;  %v10771_v49 = vld [vmem:[%s13600_s1 + $0x1d0] sm:$0xff]  }
 0x10e   : > { %v867_v50 = vadd.f32 %v9568_v5, %v11744_v1  ;;  %v9600_v53 = vpop.f32.mrf.mxu1  ;;  %9983 = vmatmul.mubr.bf16.vlgmr.msra.gmra.mxu1 %v10756_v41  ;;  %9999 = vmatpush3.bf16.msra.mxu0 %v10757_v60  ;;  %v10762_v1 = vld [vmem:[%s11090_s16 + $0x6c] sm:$0xff]   ;;  %v10768_v41 = vld [vmem:[%s11090_s16 + $0x7c] sm:$0xff]   ;;  %v4338_v43 = vld [vmem:[%s11090_s16 + $0x54] sm:$0xe] }
 0x10f   : > { %10031 = vmatpush3.bf16.msra.mxu1 %v10758_v34  ;;  %v803_v55 = vpop.f32.mrf.mxu0  ;;  %10000 = vmatprep.subr.bf16.mxu0 %v10759_v35  ;;  %v11897_v34 = vld [vmem:[%s11090_s16 + $0x5c] sm:$0xff]  }
 0x110   : > { %v11852_v3 = vadd.f32 %v9600_v53, %v867_v50  ;;  %v865_v13 = vadd.f32 %v803_v55, %v11749_v6  ;;  %v1040_v27 = vpop.f32.mrf.mxu1  ;;  %10032 = vmatprep.subr.bf16.mxu1 %v10760_v44  ;;  %9954 = vmatprep.mubr.bf16.mxu0 %v3624_v47  ;;  %v3626_v6 = vsel %vm697_vm1, %v3623_v36, %v3625_v52  ;;  %v4109_v50 = vshrl.u32 %v11880_v21, 16 }
 0x111   : > { %v9569_v58 = vpop.f32.mrf.mxu0  ;;  %9986 = vmatprep.mubr.bf16.mxu1 %v10761_v62  ;;  %v10773_v62 = vld [vmem:[%s11090_s16 + $0x84] sm:$0xff]   ;;  %v4113_v55 = vrot.slane %v4111_v32, 1  ;;  %v11962_v32 = vld [vmem:[%s11090_s16 + $0x74] sm:$0xff]  }
 0x112   : > { %v11861_v0 = vadd.f32 %v1040_v27, %v865_v13  ;;  %v868_v38 = vadd.f32 %v9569_v58, %v11755_v19  ;;  %v9601_v12 = vpop.f32.mrf.mxu1  ;;  %10001 = vmatpush3.bf16.msra.mxu0 %v10759_v35  ;;  %v10766_v19 = vld [vmem:[%s13600_s1 + $0x220] sm:$0xff]  }
 0x113   : > { %10033 = vmatpush3.bf16.msra.mxu1 %v10760_v44  ;;  %v806_v22 = vpop.f32.mrf.mxu0  ;;  %10002 = vmatprep.subr.bf16.mxu0 %v10763_v56 }
 0x114   : > { %v11871_v7 = vadd.f32 %v9601_v12, %v868_v38  ;;  %v866_v8 = vadd.f32 %v806_v22, %v11767_v29  ;;  %v1043_v10 = vpop.f32.mrf.mxu1  ;;  %10034 = vmatprep.subr.bf16.mxu1 %v10764_v46  ;;  %v3629_v29 = vrot.slane %v11747_v4, 1  ;;  %v3631_v4 = vrot.slane %v11753_v18, 1  ;;  %v10783_v18 = vld [vmem:[%s13600_s1 + $0x78] sm:$0xff]  }
 0x115   : > { %v9572_v28 = vpop.f32.mrf.mxu0  ;;  %9955 = vmatmul.mubr.bf16.gmra.mxu0 %v3626_v6  ;;  %v10774_v6 = vld [vmem:[%s11090_s16 + $0x8c] ss:$0 sps:$4 sm:$0xff]   ;;  %v4359_v22 = vrot.slane %v11897_v34, 1 }
 0x116   : > { %v11882_v24 = vadd.f32 %v1043_v10, %v866_v8  ;;  %v871_v25 = vadd.f32 %v9572_v28, %v11772_v33  ;;  %v9604_v40 = vpop.f32.mrf.mxu1  ;;  %9987 = vmatmul.mubr.bf16.gmra.mxu1 %v10762_v1  ;;  %10003 = vmatpush3.bf16.msra.mxu0 %v10763_v56  ;;  %v10770_v33 = vld [vmem:[%s13600_s1 + $0x218] sm:$0xff]   ;;  %v3630_v14 = vsel %vm697_vm1, %v3627_v59, %v3629_v29  ;;  %v4116_v56 = vshll.u32 %v11897_v34, 16  ;;  %v11929_v59 = vld [vmem:[%s11090_s16 + $0x64] sm:$0xff]  }
 0x117   : > { %10035 = vmatpush3.bf16.msra.mxu1 %v10764_v46  ;;  %v819_v26 = vpop.f32.mrf.mxu0  ;;  %10004 = vmatprep.subr.bf16.mxu0 %v10765_v48  ;;  %v3632_v52 = vsel %vm697_vm1, %v3629_v29, %v3631_v4  ;;  %v8495_v46 = vcombine.low %v4338_v43, %v11866_v9  ;;  %v4120_v9 = vshrl.u32 %v11897_v34, 16  ;;  %v4114_v8 = vor.u32 %v4113_v55, %v4109_v50 }
 0x118   : > { %v11889_v39 = vadd.f32 %v9604_v40, %v871_v25  ;;  %v869_v31 = vadd.f32 %v819_v26, %v11781_v42  ;;  %v1056_v60 = vpop.f32.mrf.mxu1  ;;  %10036 = vmatprep.subr.bf16.mxu1 %v10766_v19  ;;  %9958 = vmatprep.mubr.bf16.mxu0 %v3628_v20  ;;  %v4118_v10 = vrot.slane %v4116_v56, 1  ;;  %v4124_v21 = vshll.u32 %v11929_v59, 16  ;;  %v10777_v40 = vld [vmem:[%s13600_s1 + $0x1c0] sm:$0xff]   ;;  %v10785_v56 = vld [vmem:[%s13600_s1 + $0x70] sm:$0xff]  }
 0x119   : > { %v9573_v16 = vpop.f32.mrf.mxu0  ;;  %9990 = vmatprep.mubr.bf16.mxu1 %v10767_v45 }
 0x11a   : > { %v11900_v36 = vadd.f32 %v1056_v60, %v869_v31  ;;  %v872_v42 = vadd.f32 %v9573_v16, %v11790_v51  ;;  %v9605_v37 = vpop.f32.mrf.mxu1  ;;  %10005 = vmatpush3.bf16.msra.mxu0 %v10765_v48  ;;  %v10772_v51 = vld [vmem:[%s13600_s1 + $0x210] sm:$0xff]   ;;  %v4128_v31 = vshrl.u32 %v11929_v59, 16  ;;  %v4122_v16 = vor.u32 %v4120_v9, %v4118_v10 }
 0x11b   : > { %10037 = vmatpush3.bf16.msra.mxu1 %v10766_v19  ;;  %v822_v35 = vpop.f32.mrf.mxu0  ;;  %10006 = vmatprep.subr.bf16.mxu0 %v10769_v15  ;;  %v11941_v19 = vld [vmem:[%s11090_s16 + $0x6c] sm:$0xff]  }
 0x11c   : > { %v11909_v44 = vadd.f32 %v9605_v37, %v872_v42  ;;  %v870_v5 = vadd.f32 %v822_v35, %v11794_v57  ;;  %v1059_v47 = vpop.f32.mrf.mxu1  ;;  %10038 = vmatprep.subr.bf16.mxu1 %v10770_v33  ;;  %v10775_v57 = vld [vmem:[%s13600_s1 + $0x1c8] sm:$0xff]   ;;  %v4132_v34 = vshll.u32 %v11941_v19, 16  ;;  %v11973_v35 = vld [vmem:[%s11090_s16 + $0x7c] sm:$0xff]  }
 0x11d   : > { %v9576_v53 = vpop.f32.mrf.mxu0  ;;  %9959 = vmatmul.mubr.bf16.gmra.mxu0 %v3630_v14 }
 0x11e   : > { %v11924_v13 = vadd.f32 %v1059_v47, %v870_v5  ;;  %v875_v27 = vadd.f32 %v9576_v53, %v11799_v61  ;;  %v9608_v1 = vpop.f32.mrf.mxu1  ;;  %9991 = vmatmul.mubr.bf16.gmra.mxu1 %v10768_v41  ;;  %10007 = vmatpush3.bf16.msra.mxu0 %v10769_v15  ;;  %v4126_v41 = vrot.slane %v4124_v21, 1  ;;  %v10784_v47 = vld [vmem:[%s13600_s1 + $0x38] sm:$0xff]   ;;  %v4134_v53 = vrot.slane %v4132_v34, 1 }
 0x11f   : > { %10039 = vmatpush3.bf16.msra.mxu1 %v10770_v33  ;;  %v835_v58 = vpop.f32.mrf.mxu0  ;;  %10008 = vmatprep.subr.bf16.mxu0 %v10771_v49  ;;  %v4119_v33 = vsel %vm307_vm0, %v4114_v8, %v4118_v10  ;;  %v4144_v10 = vshrl.u32 %v11962_v32, 16  ;;  %v4367_v21 = vrot.slane %v11973_v35, 1 }
 0x120   : > { %v11934_v38 = vadd.f32 %v9608_v1, %v875_v27  ;;  %v873_v12 = vadd.f32 %v835_v58, %v11808_v2  ;;  %v1072_v61 = vpop.f32.mrf.mxu1  ;;  %10040 = vmatprep.subr.bf16.mxu1 %v10772_v51  ;;  %9962 = vmatprep.mubr.bf16.mxu0 %v3632_v52  ;;  %v4358_v2 = vrot.slane %v8495_v46, 1  ;;  %v4130_v50 = vor.u32 %v4128_v31, %v4126_v41  ;;  %v11993_v58 = vld [vmem:[%s11090_s16 + $0x84] sm:$0xff]   ;;  %v12023_v31 = vld [vmem:[%s11090_s16 + $0x8c] sm:$0x1f]  }
 0x121   : > { %v9577_v48 = vpop.f32.mrf.mxu0  ;;  %9994 = vmatprep.mubr.bf16.mxu1 %v10773_v62  ;;  %v4140_v52 = vshll.u32 %v11962_v32, 16  ;;  %v4136_v27 = vshrl.u32 %v11941_v19, 16 }
 0x122   : > { %v11943_v28 = vadd.f32 %v1072_v61, %v873_v12  ;;  %v876_v20 = vadd.f32 %v9577_v48, %v11811_v17  ;;  %v9609_v45 = vpop.f32.mrf.mxu1  ;;  %10009 = vmatpush3.bf16.msra.mxu0 %v10771_v49  ;;  %v10778_v17 = vld [vmem:[%s13600_s1 + $0x200] sm:$0xff]   ;;  %v4360_v14 = vsel %vm697_vm1, %v4358_v2, %v4359_v22  ;;  %v4361_v49 = vrot.slane %v11929_v59, 1  ;;  %v10786_v61 = vld [vmem:[%s13600_s1 + $0x30] sm:$0xff]   ;;  %v10790_v2 = vld [vmem:[%s13600_s1 + $0x28] sm:$0xff]  }
 0x123   : > { %10041 = vmatpush3.bf16.msra.mxu1 %v10772_v51  ;;  %v838_v25 = vpop.f32.mrf.mxu0  ;;  %10010 = vmatprep.subr.bf16.mxu0 %v10775_v57  ;;  %v4363_v51 = vrot.slane %v11941_v19, 1  ;;  %v4148_v59 = vshll.u32 %v11973_v35, 16  ;;  %v4142_v8 = vrot.slane %v4140_v52, 1 }
 0x124   : > { %v11950_v29 = vadd.f32 %v9609_v45, %v876_v20  ;;  %v874_v26 = vadd.f32 %v838_v25, %v11819_v23  ;;  %v1075_v15 = vpop.f32.mrf.mxu1  ;;  %10042 = vmatprep.subr.bf16.mxu1 %v10776_v63  ;;  %v4362_v46 = vsel %vm697_vm1, %v4359_v22, %v4361_v49  ;;  %v4135_v22 = vsel %vm307_vm0, %v4130_v50, %v4134_v53 }
 0x125   : > { %v9580_v60 = vpop.f32.mrf.mxu0  ;;  %9963 = vmatmul.mubr.bf16.gmra.mxu0 %v3631_v4  ;;  %v4364_v48 = vsel %vm697_vm1, %v4361_v49, %v4363_v51  ;;  %v4138_v45 = vor.u32 %v4136_v27, %v4134_v53  ;;  %v4152_v25 = vshrl.u32 %v11973_v35, 16  ;;  %v10796_v27 = vld [vmem:[%s13600_s1 + $0x18] sm:$0xff]  }
 0x126   : > { %13605 = vst [vmem:[#allocation2_spill] sm:$0xff] %v11950_v29  ;;  %v11964_v23 = vadd.f32 %v1075_v15, %v874_v26  ;;  %v879_v42 = vadd.f32 %v9580_v60, %v11824_v30  ;;  %v9612_v37 = vpop.f32.mrf.mxu1  ;;  %9995 = vmatmul.mubr.bf16.gmra.mxu1 %v10774_v6  ;;  %10011 = vmatpush3.bf16.msra.mxu0 %v10775_v57  ;;  %v4365_v6 = vrot.slane %v11962_v32, 1  ;;  %v4150_v26 = vrot.slane %v4148_v59, 1  ;;  %v10820_v29 = vld [vmem:[%s13600_s1 + $0xd8] sm:$0xff]  }
 0x127   : > { %10043 = vmatpush3.bf16.msra.mxu1 %v10776_v63  ;;  %v851_v4 = vpop.f32.mrf.mxu0  ;;  %10012 = vmatprep.subr.bf16.mxu0 %v10777_v40  ;;  %v4156_v15 = vshll.u32 %v11993_v58, 16  ;;  %v4143_v32 = vsel %vm307_vm0, %v4138_v45, %v4142_v8  ;;  %v4168_v45 = vshrl.u32 %v12023_v31, 16 }
 0x128   : > { %13606 = vst [vmem:[#allocation3_spill] sm:$0xff] %v11964_v23  ;;  %v11975_v43 = vadd.f32 %v9612_v37, %v879_v42  ;;  %v877_v30 = vadd.f32 %v851_v4, %v11832_v54  ;;  %v1088_v5 = vpop.f32.mrf.mxu1  ;;  %10044 = vmatprep.subr.bf16.mxu1 %v10778_v17  ;;  %10014 = vmatprep.mubr.bf16.mxu0 %v4119_v33  ;;  %v12032_v42 = vld [vmem:[%s11090_s16 + $0x7c] sm:$0xf]  ;;  %v10792_v4 = vld [vmem:[%s13600_s1 + $0x20] sm:$0xff]  }
 0x129   : > { %v9581_v62 = vpop.f32.mrf.mxu0  ;;  %10046 = vmatprep.mubr.bf16.mxu1 %v4360_v14  ;;  %v4127_v54 = vsel %vm307_vm0, %v4122_v16, %v4126_v41  ;;  %v4146_v33 = vor.u32 %v4144_v10, %v4142_v8  ;;  %v4570_v16 = vld [vmem:[%s11090_s16 + $0x78] sm:$0xf]  ;;  %v4366_v14 = vsel %vm697_vm1, %v4363_v51, %v4365_v6  ;;  %v10791_v41 = vld [vmem:[%s13600_s1 + $0x60] sm:$0xff]   ;;  %v4154_v50 = vor.u32 %v4152_v25, %v4150_v26 }
 0x12a   : > { %13607 = vst [vmem:[#allocation4_spill] sm:$0xff] %v11975_v43  ;;  %v11983_v57 = vadd.f32 %v1088_v5, %v877_v30  ;;  %v9613_v55 = vpop.f32.mrf.mxu1  ;;  %10013 = vmatpush3.bf16.msra.mxu0 %v10777_v40  ;;  %v4160_v30 = vshrl.u32 %v11993_v58, 16  ;;  %v4164_v5 = vshll.u32 %v12023_v31, 16  ;;  %v4368_v62 = vsel %vm697_vm1, %v4365_v6, %v4367_v21  ;;  %v10797_v6 = vld [vmem:[%s13600_s1 + $0x50] sm:$0xff]  }
 0x12b   : > { %10045 = vmatpush3.bf16.msra.mxu1 %v10778_v17  ;;  %v854_v1 = vpop.f32.mrf.mxu0  ;;  %10062 = vmatprep.subr.bf16.mxu0 %v10783_v18  ;;  %v4151_v35 = vsel %vm307_vm0, %v4146_v33, %v4150_v26  ;;  %v4158_v53 = vrot.slane %v4156_v15, 1  ;;  %v4369_v55 = vrot.slane %v11993_v58, 1 }
 0x12c   : > { %13608 = vst [vmem:[#allocation5_spill] sm:$0xff] %v11983_v57  ;;  %v878_v63 = vadd.f32 %v854_v1, %v11843_v11  ;;  %v1091_v12 = vpop.f32.mrf.mxu1  ;;  %10094 = vmatprep.subr.bf16.mxu1 %v10784_v47  ;;  %v10789_v11 = vld [vmem:[%s13600_s1 + $0x68] sm:$0xff]   ;;  %v4166_v59 = vrot.slane %v4164_v5, 1  ;;  %v10802_v5 = vld [vmem:[%s13600_s1 + $0x40] sm:$0xff]  }
 0x12d   : > { %v12000_v9 = vpop.f32.mrf.mxu0  ;;  %10015 = vmatmul.mubr.bf16.vlgmr.msra.gmra.mxu0 %v4127_v54  ;;  %v10795_v54 = vld [vmem:[%s13600_s1 + $0x58] sm:$0xff]   ;;  %v4370_v8 = vsel %vm697_vm1, %v4367_v21, %v4369_v55 }
 0x12e   : > { %v12008_v19 = vadd.f32 %v1091_v12, %v878_v63  ;;  %v12010_v20 = vpop.f32.mrf.mxu1  ;;  %10047 = vmatmul.mubr.bf16.vlgmr.msra.gmra.mxu1 %v4362_v46  ;;  %10063 = vmatpush3.bf16.msra.mxu0 %v10783_v18  ;;  %v4162_v46 = vor.u32 %v4160_v30, %v4158_v53  ;;  %v12070_v63 = vld [vmem:[%s11090_s16 + $0x80] sm:$0xff]   ;;  %v4170_v30 = vor.u32 %v4168_v45, %v4166_v59 }
 0x12f   : > { %10095 = vmatpush3.bf16.msra.mxu1 %v10784_v47  ;;  %v12017_v40 = vpop.f32.mrf.mxu0  ;;  %10064 = vmatprep.subr.bf16.mxu0 %v10785_v56  ;;  %v12051_v47 = vcombine.low %v4570_v16, %v12032_v42  ;;  %v4666_v21 = vshll.u32 %v12070_v63, 16 }
 0x130   : > { %13609 = vst [vmem:[#allocation6_spill] sm:$0xff] %v12008_v19  ;;  %v12020_v17 = vpop.f32.mrf.mxu1  ;;  %10096 = vmatprep.subr.bf16.mxu1 %v10786_v61  ;;  %10018 = vmatprep.mubr.bf16.mxu0 %v4135_v22  ;;  %v4371_v22 = vrot.slane %v12023_v31, 1  ;;  %v4167_v26 = vsel %vm307_vm0, %v4162_v46, %v4166_v59  ;;  %v10803_v59 = vld [vmem:[%s13600_s1] sm:$0xff]  }
 0x131   : > { %v12025_v60 = vpop.f32.mrf.mxu0  ;;  %10050 = vmatprep.mubr.bf16.mxu1 %v4364_v48  ;;  %v4661_v58 = vshll.u32 %v12051_v47, 16 }
 0x132   : > { %v12028_v34 = vpop.f32.mrf.mxu1  ;;  %10065 = vmatpush3.bf16.msra.mxu0 %v10785_v56  ;;  %v4372_v16 = vsel %vm697_vm1, %v4369_v55, %v4371_v22 }
 0x133   : > { %10097 = vmatpush3.bf16.msra.mxu1 %v10786_v61  ;;  %v12034_v37 = vpop.f32.mrf.mxu0  ;;  %10066 = vmatprep.subr.bf16.mxu0 %v10789_v11  ;;  %v4159_v61 = vsel %vm307_vm0, %v4154_v50, %v4158_v53  ;;  %v4663_v15 = vrot.slane %v4661_v58, 1  ;;  %v4668_v50 = vrot.slane %v4666_v21, 1  ;;  %v12116_v53 = vld [vmem:[%s11090_s16 + $0x90] sm:$0xff]   ;;  %v10807_v21 = vld [vmem:[%s13600_s1 + $0xb8] sm:$0xff]  }
 0x134   : > { %v12040_v18 = vpop.f32.mrf.mxu1  ;;  %10098 = vmatprep.subr.bf16.mxu1 %v10790_v2 }
 0x135   : > { %v12045_v49 = vpop.f32.mrf.mxu0  ;;  %10019 = vmatmul.mubr.bf16.gmra.mxu0 %v4143_v32  ;;  %v12098_v32 = vld [vmem:[%s11090_s16 + $0x88] sm:$0xff]  }
 0x136   : > { %v12053_v51 = vpop.f32.mrf.mxu1  ;;  %10051 = vmatmul.mubr.bf16.gmra.mxu1 %v4366_v14  ;;  %10067 = vmatpush3.bf16.msra.mxu0 %v10789_v11  ;;  %v10798_v11 = vld [vmem:[%s13600_s1 + $0x10] sm:$0xff]   ;;  %v10800_v14 = vld [vmem:[%s13600_s1 + $0x48] sm:$0xff]   ;;  %v4678_v45 = vshrl.u32 %v12098_v32, 16 }
 0x137   : > { %10099 = vmatpush3.bf16.msra.mxu1 %v10790_v2  ;;  %v12056_v52 = vpop.f32.mrf.mxu0  ;;  %10068 = vmatprep.subr.bf16.mxu0 %v10791_v41  ;;  %v4659_v2 = vshrl.u32 %v12051_v47, 16 }
 0x138   : > { %v12062_v56 = vpop.f32.mrf.mxu1  ;;  %10100 = vmatprep.subr.bf16.mxu1 %v10792_v4  ;;  %10022 = vmatprep.mubr.bf16.mxu0 %v4151_v35 }
 0x139   : > { %v12067_v1 = vpop.f32.mrf.mxu0  ;;  %10054 = vmatprep.mubr.bf16.mxu1 %v4368_v62  ;;  %v4664_v62 = vor.u32 %v4663_v15, %v4659_v2 }
 0x13a   : > { %v12073_v12 = vpop.f32.mrf.mxu1  ;;  %10069 = vmatpush3.bf16.msra.mxu0 %v10791_v41 }
 0x13b   : > { %10101 = vmatpush3.bf16.msra.mxu1 %v10792_v4  ;;  %v12080_v48 = vpop.f32.mrf.mxu0  ;;  %10070 = vmatprep.subr.bf16.mxu0 %v10795_v54  ;;  %v10801_v4 = vld [vmem:[%s13600_s1 + $0x8] sm:$0xff]  }
 0x13c   : > { %v12086_v10 = vpop.f32.mrf.mxu1  ;;  %10102 = vmatprep.subr.bf16.mxu1 %v10796_v27 }
 0x13d   : > { %v12090_v25 = vpop.f32.mrf.mxu0  ;;  %10023 = vmatmul.mubr.bf16.gmra.mxu0 %v4159_v61  ;;  %v12130_v61 = vld [vmem:[%s11090_s16 + $0x98] sm:$0xff]  }
 0x13e   : > { %v12094_v33 = vpop.f32.mrf.mxu1  ;;  %10055 = vmatmul.mubr.bf16.gmra.mxu1 %v4370_v8  ;;  %10071 = vmatpush3.bf16.msra.mxu0 %v10795_v54  ;;  %v4670_v54 = vshrl.u32 %v12070_v63, 16 }
 0x13f   : > { %13610 = vst [vmem:[#allocation7_spill] sm:$0xff] %v12094_v33  ;;  %10103 = vmatpush3.bf16.msra.mxu1 %v10796_v27  ;;  %v12100_v31 = vpop.f32.mrf.mxu0  ;;  %10072 = vmatprep.subr.bf16.mxu0 %v10797_v6  ;;  %v4674_v27 = vshll.u32 %v12098_v32, 16  ;;  %v5026_v33 = vld [vmem:[%s11090_s16 + $0x78] sm:$0xe] }
 0x140   : > { %v12105_v41 = vpop.f32.mrf.mxu1  ;;  %10104 = vmatprep.subr.bf16.mxu1 %v10798_v11  ;;  %10026 = vmatprep.mubr.bf16.mxu0 %v4167_v26  ;;  %v4672_v26 = vor.u32 %v4670_v54, %v4668_v50 }
 0x141   : > { %13611 = vst [vmem:[#allocation8_spill] sm:$0xff] %v12105_v41  ;;  %v12110_v35 = vpop.f32.mrf.mxu0  ;;  %10058 = vmatprep.mubr.bf16.mxu1 %v4372_v16  ;;  %v4676_v15 = vrot.slane %v4674_v27, 1 }
 0x142   : > { %13612 = vst [vmem:[#allocation9_spill] sm:$0xff] %v12110_v35  ;;  %v12118_v55 = vpop.f32.mrf.mxu1  ;;  %10073 = vmatpush3.bf16.msra.mxu0 %v10797_v6  ;;  %v4669_v6 = vsel %vm307_vm0, %v4664_v62, %v4668_v50 }
 0x143   : > { %13613 = vst [vmem:[#allocation10_spill] sm:$0xff] %v12118_v55  ;;  %10105 = vmatpush3.bf16.msra.mxu1 %v10798_v11  ;;  %v12122_v46 = vpop.f32.mrf.mxu0  ;;  %10074 = vmatprep.subr.bf16.mxu0 %v10800_v14  ;;  %v4682_v11 = vshll.u32 %v12116_v53, 16  ;;  %v4680_v54 = vor.u32 %v4678_v45, %v4676_v15  ;;  %v4677_v19 = vsel %vm307_vm0, %v4672_v26, %v4676_v15  ;;  %v12169_v15 = vld [vmem:[%s11090_s16 + $0xa8] sm:$0xff]  }
 0x144   : > { %13614 = vst [vmem:[#allocation11_spill] sm:$0xff] %v12122_v46  ;;  %v12127_v58 = vpop.f32.mrf.mxu1  ;;  %10106 = vmatprep.subr.bf16.mxu1 %v10801_v4  ;;  %v4706_v43 = vshll.u32 %v12169_v15, 16 }
 0x145   : > { %13615 = vst [vmem:[#allocation12_spill] sm:$0xff] %v12127_v58  ;;  %v12132_v8 = vpop.f32.mrf.mxu0  ;;  %10027 = vmatmul.mubr.bf16.gmra.mxu0 %v4170_v30  ;;  %v10808_v30 = vld [vmem:[%s13600_s1 + $0xf8] sm:$0xff]  }
 0x146   : > { %13616 = vst [vmem:[#allocation13_spill] sm:$0xff] %v12132_v8  ;;  %v12137_v2 = vpop.f32.mrf.mxu1  ;;  %10059 = vmatmul.mubr.bf16.gmra.mxu1 %v4371_v22  ;;  %10075 = vmatpush3.bf16.msra.mxu0 %v10800_v14  ;;  %v4690_v22 = vshll.u32 %v12130_v61, 16  ;;  %v12151_v14 = vld [vmem:[%s11090_s16 + $0xa0] sm:$0xff]   ;;  %v4708_v41 = vrot.slane %v4706_v43, 1 }
 0x147   : > { %13617 = vst [vmem:[#allocation14_spill] sm:$0xff] %v12137_v2  ;;  %10107 = vmatpush3.bf16.msra.mxu1 %v10801_v4  ;;  %v12142_v16 = vpop.f32.mrf.mxu0  ;;  %10076 = vmatprep.subr.bf16.mxu0 %v10802_v5  ;;  %v4684_v4 = vrot.slane %v4682_v11, 1  ;;  %v4694_v11 = vshrl.u32 %v12130_v61, 16  ;;  %v4698_v26 = vshll.u32 %v12151_v14, 16 }
 0x148   : > { %13618 = vst [vmem:[#allocation15_spill] sm:$0xff] %v12142_v16  ;;  %v12147_v62 = vpop.f32.mrf.mxu1  ;;  %10108 = vmatprep.subr.bf16.mxu1 %v10803_v59  ;;  %10078 = vmatprep.mubr.bf16.mxu0 %v4669_v6  ;;  %v4686_v6 = vshrl.u32 %v12116_v53, 16  ;;  %v10813_v16 = vld [vmem:[%s13600_s1 + $0xa8] sm:$0xff]  }
 0x149   : > { %13619 = vst [vmem:[#allocation16_spill] sm:$0xff] %v12147_v62  ;;  %v9645_v50 = vpop.f32.mrf.mxu0  ;;  %10110 = vmatprep.mubr.bf16.mxu1 %v12051_v47  ;;  %v10809_v62 = vld [vmem:[%s13600_s1 + $0xb0] sm:$0xff]  }
 0x14a   : > { %v9677_v27 = vpop.f32.mrf.mxu1  ;;  %10077 = vmatpush3.bf16.msra.mxu0 %v10802_v5  ;;  %v10810_v47 = vld [vmem:[%s13600_s1 + $0xf0] sm:$0xff]   ;;  %v4692_v5 = vrot.slane %v4690_v22, 1 }
 0x14b   : > { %10109 = vmatpush3.bf16.msra.mxu1 %v10803_v59  ;;  %v12159_v2 = vpop.f32.mrf.mxu0  ;;  %10126 = vmatprep.subr.bf16.mxu0 %v10807_v21  ;;  %v4685_v59 = vsel %vm307_vm0, %v4680_v54, %v4684_v4  ;;  %v12175_v27 = vld [vmem:[%s11090_s16 + $0xb0] sm:$0xf]  ;;  %v4601_v22 = vld [vmem:[%s11090_s16 + $0xb4] sm:$0x1]  ;;  %v10814_v54 = vld [vmem:[%s13600_s1 + $0xe8] sm:$0xff]  }
 0x14c   : > { %13620 = vst [vmem:[#allocation17_spill] sm:$0xff] %v12159_v2  ;;  %v12164_v45 = vpop.f32.mrf.mxu1  ;;  %10158 = vmatprep.subr.bf16.mxu1 %v10808_v30 }
 0x14d   : > { %13621 = vst [vmem:[#allocation18_spill] sm:$0xff] %v12164_v45  ;;  %v12171_v50 = vpop.f32.mrf.mxu0  ;;  %10079 = vmatmul.mubr.bf16.vlgmr.msra.gmra.mxu0 %v4677_v19  ;;  %v4688_v45 = vor.u32 %v4686_v6, %v4684_v4  ;;  %v12195_v4 = vcombine.low %v12175_v27, %v4601_v22 }
 0x14e   : > { %v12177_v2 = vpop.f32.mrf.mxu1  ;;  %10111 = vmatmul.mubr.bf16.vlgmr.msra.gmra.mxu1 %v12070_v63  ;;  %10127 = vmatpush3.bf16.msra.mxu0 %v10807_v21  ;;  %v4696_v21 = vor.u32 %v4694_v11, %v4692_v5  ;;  %v10815_v11 = vld [vmem:[%s13600_s1 + $0xa0] sm:$0xff]  }
 0x14f   : > { %10159 = vmatpush3.bf16.msra.mxu1 %v10808_v30  ;;  %v12181_v58 = vpop.f32.mrf.mxu0  ;;  %10128 = vmatprep.subr.bf16.mxu0 %v10809_v62  ;;  %v4700_v30 = vrot.slane %v4698_v26, 1  ;;  %v4693_v8 = vsel %vm307_vm0, %v4688_v45, %v4692_v5  ;;  %v10816_v26 = vld [vmem:[%s13600_s1 + $0xe0] sm:$0xff]   ;;  %v4714_v5 = vshll.u32 %v12195_v4, 16 }
 0x150   : > { %v12186_v19 = vpop.f32.mrf.mxu1  ;;  %10160 = vmatprep.subr.bf16.mxu1 %v10810_v47  ;;  %10082 = vmatprep.mubr.bf16.mxu0 %v4685_v59  ;;  %v4702_v59 = vshrl.u32 %v12151_v14, 16 }
 0x151   : > { %v12191_v57 = vpop.f32.mrf.mxu0  ;;  %10114 = vmatprep.mubr.bf16.mxu1 %v12098_v32  ;;  %v4701_v45 = vsel %vm307_vm0, %v4696_v21, %v4700_v30 }
 0x152   : > { %v12197_v6 = vpop.f32.mrf.mxu1  ;;  %10129 = vmatpush3.bf16.msra.mxu0 %v10809_v62  ;;  %v4704_v23 = vor.u32 %v4702_v59, %v4700_v30 }
 0x153   : > { %10161 = vmatpush3.bf16.msra.mxu1 %v10810_v47  ;;  %v12202_v55 = vpop.f32.mrf.mxu0  ;;  %10130 = vmatprep.subr.bf16.mxu0 %v10813_v16  ;;  %v4710_v47 = vshrl.u32 %v12169_v15, 16 }
 0x154   : > { %v12210_v22 = vpop.f32.mrf.mxu1  ;;  %10162 = vmatprep.subr.bf16.mxu1 %v10814_v54  ;;  %v4709_v59 = vsel %vm307_vm0, %v4704_v23, %v4708_v41 }
 0x155   : > { %v12212_v62 = vpop.f32.mrf.mxu0  ;;  %10083 = vmatmul.mubr.bf16.gmra.mxu0 %v4693_v8  ;;  %v10819_v8 = vld [vmem:[%s13600_s1 + $0x98] sm:$0xff]   ;;  %v4712_v43 = vor.u32 %v4710_v47, %v4708_v41  ;;  %v10822_v47 = vld [vmem:[%s13600_s1 + $0xd0] sm:$0xff]   ;;  %v4718_v41 = vshrl.u32 %v12195_v4, 16 }
 0x156   : > { %v12217_v46 = vpop.f32.mrf.mxu1  ;;  %10115 = vmatmul.mubr.bf16.gmra.mxu1 %v12116_v53  ;;  %10131 = vmatpush3.bf16.msra.mxu0 %v10813_v16 }
 0x157   : > { %13622 = vst [vmem:[#allocation19_spill] sm:$0xff] %v12217_v46  ;;  %10163 = vmatpush3.bf16.msra.mxu1 %v10814_v54  ;;  %v12220_v35 = vpop.f32.mrf.mxu0  ;;  %10132 = vmatprep.subr.bf16.mxu0 %v10815_v11  ;;  %v4716_v54 = vrot.slane %v4714_v5, 1 }
 0x158   : > { %v12225_v21 = vpop.f32.mrf.mxu1  ;;  %10164 = vmatprep.subr.bf16.mxu1 %v10816_v26  ;;  %10086 = vmatprep.mubr.bf16.mxu0 %v4701_v45  ;;  %v10821_v45 = vld [vmem:[%s13600_s1 + $0x90] sm:$0xff]  }
 0x159   : > { %13623 = vst [vmem:[#allocation20_spill] sm:$0xff] %v12225_v21  ;;  %v12230_v16 = vpop.f32.mrf.mxu0  ;;  %10118 = vmatprep.mubr.bf16.mxu1 %v12130_v61  ;;  %v4717_v23 = vsel %vm307_vm0, %v4712_v43, %v4716_v54  ;;  %v5047_v43 = vrot.slane %v12070_v63, 1  ;;  %v1405_v63 = vadd.f32 %v12017_v40, %v11861_v0  ;;  %v5049_v0 = vrot.slane %v12098_v32, 1  ;;  %v10832_v40 = vld [vmem:[%s13600_s1 + $0x138] sm:$0xff]  }
 0x15a   : > { %v12233_v30 = vpop.f32.mrf.mxu1  ;;  %10133 = vmatpush3.bf16.msra.mxu0 %v10815_v11  ;;  %v8561_v11 = vcombine.low %v5026_v33, %v12032_v42  ;;  %v10826_v42 = vld [vmem:[%s13600_s1 + $0xc8] sm:$0xff]   ;;  %v10833_v32 = vld [vmem:[%s13600_s1 + $0x178] sm:$0xff]  }
 0x15b   : > { %10165 = vmatpush3.bf16.msra.mxu1 %v10816_v26  ;;  %v12237_v21 = vpop.f32.mrf.mxu0  ;;  %10134 = vmatprep.subr.bf16.mxu0 %v10819_v8 }
 0x15c   : > { %v12242_v46 = vpop.f32.mrf.mxu1  ;;  %10166 = vmatprep.subr.bf16.mxu1 %v10820_v29 }
 0x15d   : > { %13624 = vst [vmem:[#allocation21_spill] sm:$0xff] %v12242_v46  ;;  %v12247_v5 = vpop.f32.mrf.mxu0  ;;  %10087 = vmatmul.mubr.bf16.gmra.mxu0 %v4709_v59 }
 0x15e   : > { %13625 = vst [vmem:[#allocation22_spill] sm:$0xff] %v12247_v5  ;;  %v12252_v26 = vpop.f32.mrf.mxu1  ;;  %10119 = vmatmul.mubr.bf16.gmra.mxu1 %v12151_v14  ;;  %10135 = vmatpush3.bf16.msra.mxu0 %v10819_v8  ;;  %v10825_v5 = vld [vmem:[%s13600_s1 + $0x88] sm:$0xff]   ;;  %v5046_v8 = vrot.slane %v8561_v11, 1 }
 0x15f   : > { %13626 = vst [vmem:[#allocation23_spill] sm:$0xff] %v12252_v26  ;;  %10167 = vmatpush3.bf16.msra.mxu1 %v10820_v29  ;;  %v12255_v46 = vpop.f32.mrf.mxu0  ;;  %10136 = vmatprep.subr.bf16.mxu0 %v10821_v45  ;;  %v4720_v29 = vor.u32 %v4718_v41, %v4716_v54  ;;  %v1407_v26 = vadd.f32 %v12000_v9, %v11852_v3  ;;  %v10827_v54 = vld [vmem:[%s13600_s1 + $0x80] sm:$0xff]  }
 0x160   : > { %13627 = vst [vmem:[#allocation24_spill] sm:$0xff] %v12255_v46  ;;  %v12260_v59 = vpop.f32.mrf.mxu1  ;;  %10168 = vmatprep.subr.bf16.mxu1 %v10822_v47  ;;  %10090 = vmatprep.mubr.bf16.mxu0 %v4717_v23  ;;  %v8536_v23 = vcombine.low %v12175_v27, %v12175_v27  ;;  %v10828_v3 = vld [vmem:[%s13600_s1 + $0xc0] sm:$0xff]   ;;  %v1408_v27 = vadd.f32 %v12025_v60, %v11871_v7 }
 0x161   : > { %13628 = vst [vmem:[#allocation25_spill] sm:$0xff] %v12260_v59  ;;  %v12265_v33 = vpop.f32.mrf.mxu0  ;;  %10122 = vmatprep.mubr.bf16.mxu1 %v12169_v15  ;;  %v10830_v9 = vld [vmem:[%s11090_s16 + $0x84] sm:$0xff]   ;;  %v1610_v11 = vadd.f32 %v12010_v20, %v1407_v26  ;;  %v1608_v60 = vadd.f32 %v12020_v17, %v1405_v63  ;;  %v1406_v20 = vadd.f32 %v12034_v37, %v11882_v24  ;;  %v5055_v37 = vrot.slane %v12151_v14, 1 }
 0x162   : > { %v12271_v46 = vpop.f32.mrf.mxu1  ;;  %10137 = vmatpush3.bf16.msra.mxu0 %v10821_v45  ;;  %v1411_v17 = vadd.f32 %v12045_v49, %v11889_v39  ;;  %v1409_v63 = vadd.f32 %v12056_v52, %v11900_v36  ;;  %v12329_v39 = vld [vmem:[%s13601_s2] ss:$0 sm:$0xff]  ;;  %v10834_v49 = vld [vmem:[%s13600_s1 + $0x130] sm:$0xff]  }
 0x163   : > { %13629 = vst [vmem:[#allocation26_spill] sm:$0xff] %v12271_v46  ;;  %10169 = vmatpush3.bf16.msra.mxu1 %v10822_v47  ;;  %v12275_v59 = vpop.f32.mrf.mxu0  ;;  %10138 = vmatprep.subr.bf16.mxu0 %v10825_v5  ;;  %v5048_v47 = vsel %vm697_vm1, %v5046_v8, %v5047_v43  ;;  %v5050_v8 = vsel %vm697_vm1, %v5047_v43, %v5049_v0  ;;  %v10835_v52 = vld [vmem:[%s13600_s1 + $0x170] sm:$0xff]  }
 0x164   : > { %v12282_v41 = vpop.f32.mrf.mxu1  ;;  %10170 = vmatprep.subr.bf16.mxu1 %v10826_v42 }
 0x165   : > { %13630 = vst [vmem:[#allocation27_spill] sm:$0xff] %v12282_v41  ;;  %v12290_v45 = vpop.f32.mrf.mxu0  ;;  %10091 = vmatmul.mubr.bf16.gmra.mxu0 %v4720_v29  ;;  %v5051_v41 = vrot.slane %v12116_v53, 1  ;;  %v5053_v53 = vrot.slane %v12130_v61, 1 }
 0x166   : > { %v12294_v46 = vpop.f32.mrf.mxu1  ;;  %10123 = vmatmul.mubr.bf16.gmra.mxu1 %v8536_v23  ;;  %10139 = vmatpush3.bf16.msra.mxu0 %v10825_v5  ;;  %v1847_v5 = vadd.f32 %v12171_v50, %v1610_v11  ;;  %v1845_v50 = vadd.f32 %v12181_v58, %v1608_v60  ;;  %v10831_v23 = vld [vmem:[%s11090_s16 + $0x8c] sm:$0xff]   ;;  %v1609_v58 = vadd.f32 %v12040_v18, %v1406_v20  ;;  %v5464_v60 = vld [vmem:[%s11090_s16 + $0x84] sm:$0xf]  ;;  %v12379_v20 = vld [vmem:[%s11090_s16 + $0x88] sm:$0xf] }
 0x167   : > { %10171 = vmatpush3.bf16.msra.mxu1 %v10826_v42  ;;  %v12301_v7 = vpop.f32.mrf.mxu0  ;;  %10140 = vmatprep.subr.bf16.mxu0 %v10827_v54  ;;  %v1611_v42 = vadd.f32 %v12028_v34, %v1408_v27  ;;  %v5052_v14 = vsel %vm697_vm1, %v5049_v0, %v5051_v41  ;;  %v12343_v43 = vsel %vm697_vm1, %v5051_v41, %v5053_v53  ;;  %v5057_v27 = vrot.slane %v12169_v15, 1 }
 0x168   : > { %v12307_v26 = vpop.f32.mrf.mxu1  ;;  %10172 = vmatprep.subr.bf16.mxu1 %v10828_v3  ;;  %10142 = vmatprep.mubr.bf16.mxu0 %v5048_v47  ;;  %v2150_v36 = vadd.f32 %v12177_v2, %v1847_v5  ;;  %v10836_v2 = vld [vmem:[%s11090_s16 + $0x94] sm:$0xff]   ;;  %v2148_v47 = vadd.f32 %v12186_v19, %v1845_v50  ;;  %v1846_v11 = vadd.f32 %v12202_v55, %v1609_v58  ;;  %v10838_v19 = vld [vmem:[%s13600_s1 + $0x128] sm:$0xff]   ;;  %v10841_v58 = vld [vmem:[%s13600_s1 + $0x160] sm:$0xff]  }
 0x169   : > { %v9709_v24 = vpop.f32.mrf.mxu0  ;;  %10174 = vmatprep.mubr.bf16.mxu1 %v10830_v9  ;;  %v1848_v61 = vadd.f32 %v12191_v57, %v1611_v42  ;;  %v12350_v9 = vsel %vm697_vm1, %v5053_v53, %v5055_v37  ;;  %v10837_v42 = vld [vmem:[%s11090_s16 + $0x9c] sm:$0xff]  }
 0x16a   : > { %v9741_v29 = vpop.f32.mrf.mxu1  ;;  %10141 = vmatpush3.bf16.msra.mxu0 %v10827_v54  ;;  %v1614_v54 = vadd.f32 %v12053_v51, %v1411_v17  ;;  %v5059_v51 = vrot.slane %v12195_v4, 1  ;;  %v12387_v17 = vsel %vm697_vm1, %v5055_v37, %v5057_v27  ;;  %v2149_v24 = vadd.f32 %v12210_v22, %v1846_v11  ;;  %v10840_v37 = vld [vmem:[%s13600_s1 + $0x120] sm:$0xff]  }
 0x16b   : > { %10173 = vmatpush3.bf16.msra.mxu1 %v10828_v3  ;;  %v12323_v34 = vpop.f32.mrf.mxu0  ;;  %10190 = vmatprep.subr.bf16.mxu0 %v10832_v40  ;;  %v1412_v3 = vadd.f32 %v12067_v1, %v11909_v44  ;;  %v1612_v44 = vadd.f32 %v12062_v56, %v1409_v63  ;;  %v1410_v1 = vadd.f32 %v12080_v48, %v11924_v13  ;;  %v12559_v4 = vld [vmem:[%s11090_s16 + $0xa4] sm:$0xff]  }
 0x16c   : > { %v12336_v57 = vpop.f32.mrf.mxu1  ;;  %10222 = vmatprep.subr.bf16.mxu1 %v10833_v32  ;;  %v2151_v15 = vadd.f32 %v12197_v6, %v1848_v61  ;;  %v1851_v56 = vadd.f32 %v12212_v62, %v1614_v54  ;;  %v10839_v6 = vld [vmem:[%s13600_s1 + $0x168] sm:$0xff]   ;;  %v1415_v62 = vadd.f32 %v12090_v25, %v11934_v38  ;;  %v12397_v38 = vsel %vm697_vm1, %v5057_v27, %v5059_v51  ;;  %v13634_v54 = vld [vmem:[#allocation9_spill] sm:$0xff] }
 0x16d   : > { %v9760_v18 = vpop.f32.mrf.mxu0  ;;  %10143 = vmatmul.mubr.bf16.vlgmr.msra.gmra.mxu0 %v5050_v8  ;;  %v1615_v5 = vadd.f32 %v12073_v12, %v1412_v3  ;;  %v12400_v12 = vld [vmem:[%s11090_s16 + $0x84] sm:$0xe]  ;;  %v1413_v25 = vadd.f32 %v12100_v31, %v11943_v28  ;;  %v1613_v63 = vadd.f32 %v12086_v10, %v1410_v1  ;;  %v13631_v61 = vld [vmem:[#allocation19_spill] sm:$0xff]  ;;  %v13635_v10 = vld [vmem:[#allocation20_spill] sm:$0xff] }
 0x16e   : > { %v2353_v0 = vadd.f32 %v9760_v18, %v2150_v36  ;;  %v12355_v41 = vpop.f32.mrf.mxu1  ;;  %10175 = vmatmul.mubr.bf16.vlgmr.msra.gmra.mxu1 %v10831_v23  ;;  %10191 = vmatpush3.bf16.msra.mxu0 %v10832_v40  ;;  %v12409_v23 = vcombine.low %v5464_v60, %v12379_v20  ;;  %v13632_v36 = vld [vmem:[#allocation7_spill] sm:$0xff]  ;;  %v8650_v11 = vcombine.low %v12400_v12, %v12379_v20 }
 0x16f   : > { %10223 = vmatpush3.bf16.msra.mxu1 %v10833_v32  ;;  %v2289_v55 = vpop.f32.mrf.mxu0  ;;  %10192 = vmatprep.subr.bf16.mxu0 %v10834_v49  ;;  %v1849_v32 = vadd.f32 %v12220_v35, %v1612_v44  ;;  %v1852_v35 = vadd.f32 %v12230_v16, %v1615_v5  ;;  %v10842_v27 = vld [vmem:[%s11090_s16 + $0xa4] sm:$0xff]  }
 0x170   : > { %v2374_v40 = vadd.f32 %v12329_v39, %v2353_v0  ;;  %v2351_v13 = vadd.f32 %v2289_v55, %v2148_v47  ;;  %v12372_v48 = vpop.f32.mrf.mxu1  ;;  %10224 = vmatprep.subr.bf16.mxu1 %v10835_v52  ;;  %10146 = vmatprep.mubr.bf16.mxu0 %v5052_v14  ;;  %v13633_v14 = vld [vmem:[#allocation2_spill] sm:$0xff]  ;;  %v12429_v47 = vld [vmem:[%s13600_s1 + $0x118] sm:$0xff]   ;;  %v1850_v0 = vadd.f32 %v12237_v21, %v1613_v63  ;;  %v12443_v21 = vld [vmem:[%s11090_s16 + $0x8c] sm:$0xff]  }
 0x171   : > { %v9761_v53 = vpop.f32.mrf.mxu0  ;;  %10178 = vmatprep.mubr.bf16.mxu1 %v10836_v2  ;;  %v1416_v3 = vadd.f32 %v13634_v54, %v13633_v14  ;;  %v2152_v18 = vadd.f32 %v13635_v10, %v1849_v32  ;;  %v2155_v60 = vadd.f32 %v12233_v30, %v1852_v35  ;;  %v13639_v5 = vld [vmem:[#allocation22_spill] sm:$0xff]  ;;  %v10845_v30 = vld [vmem:[%s13600_s1 + $0x158] sm:$0xff]   ;;  %v12462_v63 = vld [vmem:[%s13600_s1 + $0x110] sm:$0xff]   ;;  %v5537_v14 = vshrl.u32 %v12409_v23, 16 }
 0x172   : > { %2389 = vst [vmem:[%s12365_s4 + $0x10] sm:$0xff] %v2374_v40  ;;  %v2372_v50 = vadd.f32 %v12329_v39, %v2351_v13  ;;  %v2354_v29 = vadd.f32 %v9761_v53, %v2151_v15  ;;  %v12392_v8 = vpop.f32.mrf.mxu1  ;;  %10193 = vmatpush3.bf16.msra.mxu0 %v10834_v49  ;;  %v2154_v49 = vadd.f32 %v13631_v61, %v1851_v56  ;;  %v13637_v56 = vld [vmem:[#allocation3_spill] sm:$0xff]  ;;  %v13644_v61 = vld [vmem:[#allocation21_spill] sm:$0xff] }
 0x173   : > { %10225 = vmatpush3.bf16.msra.mxu1 %v10835_v52  ;;  %v2292_v22 = vpop.f32.mrf.mxu0  ;;  %10194 = vmatprep.subr.bf16.mxu0 %v10838_v19  ;;  %v1618_v52 = vadd.f32 %v13632_v36, %v1415_v62  ;;  %v13638_v40 = vld [vmem:[#allocation11_spill] sm:$0xff]  ;;  %v13645_v54 = vld [vmem:[#allocation5_spill] sm:$0xff] }
 0x174   : > { %2387 = vst [vmem:[%s12365_s4] sm:$0xff] %v2372_v50  ;;  %v2375_v28 = vadd.f32 %v12329_v39, %v2354_v29  ;;  %v2352_v31 = vadd.f32 %v2292_v22, %v2149_v24  ;;  %v12415_v16 = vpop.f32.mrf.mxu1  ;;  %10226 = vmatprep.subr.bf16.mxu1 %v10839_v6  ;;  %v1414_v13 = vadd.f32 %v13638_v40, %v13637_v56  ;;  %v13641_v50 = vld [vmem:[#allocation4_spill] sm:$0xff]  ;;  %v13642_v29 = vld [vmem:[#allocation13_spill] sm:$0xff] }
 0x175   : > { %v9764_v2 = vpop.f32.mrf.mxu0  ;;  %10147 = vmatmul.mubr.bf16.gmra.mxu0 %v12343_v43  ;;  %v13636_v43 = vld [vmem:[#allocation8_spill] sm:$0xff]  ;;  %v1855_v62 = vadd.f32 %v13639_v5, %v1618_v52  ;;  %v1419_v12 = vadd.f32 %v13642_v29, %v13641_v50  ;;  %v5787_v29 = vrot.slane %v12443_v21, 1 }
 0x176   : > { %2390 = vst [vmem:[%s12365_s4 + $0x18] sm:$0xff] %v2375_v28  ;;  %v2373_v44 = vadd.f32 %v12329_v39, %v2352_v31  ;;  %v2357_v1 = vadd.f32 %v9764_v2, %v2154_v49  ;;  %v12436_v15 = vpop.f32.mrf.mxu1  ;;  %10179 = vmatmul.mubr.bf16.gmra.mxu1 %v10837_v42  ;;  %10195 = vmatpush3.bf16.msra.mxu0 %v10838_v19  ;;  %v10843_v42 = vld [vmem:[%s11090_s16 + $0xac] sm:$0xff]  }
 0x177   : > { %v1616_v55 = vadd.f32 %v13636_v43, %v1413_v25  ;;  %10227 = vmatpush3.bf16.msra.mxu1 %v10839_v6  ;;  %v2305_v20 = vpop.f32.mrf.mxu0  ;;  %10196 = vmatprep.subr.bf16.mxu0 %v10840_v37  ;;  %v13640_v6 = vld [vmem:[#allocation10_spill] sm:$0xff]  ;;  %v13643_v25 = vld [vmem:[#allocation24_spill] sm:$0xff]  ;;  %v2153_v49 = vadd.f32 %v13644_v61, %v1850_v0  ;;  %v5544_v0 = vshll.u32 %v12443_v21, 16  ;;  %v13648_v43 = vld [vmem:[#allocation23_spill] sm:$0xff] }
 0x178   : > { %2388 = vst [vmem:[%s12365_s4 + $0x8] sm:$0xff] %v2373_v44  ;;  %v2378_v32 = vadd.f32 %v12329_v39, %v2357_v1  ;;  %v2355_v53 = vadd.f32 %v2305_v20, %v2152_v18  ;;  %v12448_v19 = vpop.f32.mrf.mxu1  ;;  %10228 = vmatprep.subr.bf16.mxu1 %v10841_v58  ;;  %10150 = vmatprep.mubr.bf16.mxu0 %v12350_v9  ;;  %v5539_v9 = vshll.u32 %v12409_v23, 16  ;;  %v10847_v52 = vld [vmem:[%s13600_s1 + $0x150] sm:$0xff]   ;;  %v13650_v20 = vld [vmem:[#allocation25_spill] sm:$0xff] }
 0x179   : > { %v1619_v24 = vadd.f32 %v13640_v6, %v1416_v3  ;;  %v1853_v35 = vadd.f32 %v13643_v25, %v1616_v55  ;;  %v9765_v22 = vpop.f32.mrf.mxu0  ;;  %10182 = vmatprep.mubr.bf16.mxu1 %v10842_v27  ;;  %v13646_v3 = vld [vmem:[#allocation15_spill] sm:$0xff]  ;;  %v10848_v27 = vld [vmem:[%s11090_s16 + $0xb4] sm:$0xff]   ;;  %v2158_v23 = vadd.f32 %v13648_v43, %v1855_v62  ;;  %v5546_v61 = vrot.slane %v5544_v0, 1  ;;  %v10849_v43 = vld [vmem:[%s11090_s16 + $0xbc] ss:$0 sps:$4 sm:$0xff]  }
 0x17a   : > { %2393 = vst [vmem:[%s12365_s4 + $0x30] sm:$0xff] %v2378_v32  ;;  %v2376_v28 = vadd.f32 %v12329_v39, %v2355_v53  ;;  %v2358_v31 = vadd.f32 %v9765_v22, %v2155_v60  ;;  %v12468_v36 = vpop.f32.mrf.mxu1  ;;  %10197 = vmatpush3.bf16.msra.mxu0 %v10840_v37  ;;  %v1417_v10 = vadd.f32 %v13646_v3, %v13645_v54  ;;  %v5548_v37 = vshrl.u32 %v12443_v21, 16  ;;  %v13647_v44 = vld [vmem:[#allocation12_spill] sm:$0xff] }
 0x17b   : > { %v1856_v18 = vadd.f32 %v12265_v33, %v1619_v24  ;;  %10229 = vmatpush3.bf16.msra.mxu1 %v10841_v58  ;;  %v2308_v2 = vpop.f32.mrf.mxu0  ;;  %10198 = vmatprep.subr.bf16.mxu0 %v12429_v47  ;;  %v1617_v1 = vadd.f32 %v13647_v44, %v1414_v13  ;;  %v12488_v33 = vld [vmem:[%s11090_s16 + $0x94] sm:$0xff]   ;;  %v13649_v58 = vld [vmem:[#allocation14_spill] sm:$0xff]  ;;  %v2156_v5 = vadd.f32 %v13650_v20, %v1853_v35  ;;  %v5541_v53 = vrot.slane %v5539_v9, 1 }
 0x17c   : > { %2391 = vst [vmem:[%s12365_s4 + $0x20] sm:$0xff] %v2376_v28  ;;  %v2379_v55 = vadd.f32 %v12329_v39, %v2358_v31  ;;  %v2356_v56 = vadd.f32 %v2308_v2, %v2153_v49  ;;  %v12485_v40 = vpop.f32.mrf.mxu1  ;;  %10230 = vmatprep.subr.bf16.mxu1 %v10845_v30  ;;  %v1622_v60 = vadd.f32 %v13649_v58, %v1419_v12  ;;  %v5786_v13 = vrot.slane %v8650_v11, 1  ;;  %v13651_v12 = vld [vmem:[#allocation16_spill] sm:$0xff]  ;;  %v13652_v35 = vld [vmem:[#allocation6_spill] sm:$0xff]  ;;  %v13655_v2 = vld [vmem:[#allocation27_spill] sm:$0xff] }
 0x17d   : > { %v9768_v32 = vpop.f32.mrf.mxu0  ;;  %10151 = vmatmul.mubr.bf16.gmra.mxu0 %v12387_v17  ;;  %v1854_v62 = vadd.f32 %v12275_v59, %v1617_v1  ;;  %v1620_v25 = vadd.f32 %v13651_v12, %v1417_v10  ;;  %v13653_v17 = vld [vmem:[#allocation17_spill] sm:$0xff]  ;;  %v13654_v11 = vld [vmem:[#allocation26_spill] sm:$0xff]  ;;  %v5542_v10 = vor.u32 %v5541_v53, %v5537_v14 }
 0x17e   : > { %2394 = vst [vmem:[%s12365_s4 + $0x38] sm:$0xff] %v2379_v55  ;;  %v2377_v6 = vadd.f32 %v12329_v39, %v2356_v56  ;;  %v2361_v24 = vadd.f32 %v9768_v32, %v2158_v23  ;;  %v12496_v50 = vpop.f32.mrf.mxu1  ;;  %10183 = vmatmul.mubr.bf16.gmra.mxu1 %v10843_v42  ;;  %10199 = vmatpush3.bf16.msra.mxu0 %v12429_v47  ;;  %v10850_v42 = vld [vmem:[%s13600_s1 + $0x108] sm:$0xff]   ;;  %v10852_v14 = vld [vmem:[%s13600_s1 + $0x100] sm:$0xff]   ;;  %v5556_v55 = vshrl.u32 %v12488_v33, 16 }
 0x17f   : > { %v1418_v22 = vadd.f32 %v13653_v17, %v13652_v35  ;;  %v2159_v9 = vadd.f32 %v13654_v11, %v1856_v18  ;;  %10231 = vmatpush3.bf16.msra.mxu1 %v10845_v30  ;;  %v2321_v59 = vpop.f32.mrf.mxu0  ;;  %10200 = vmatprep.subr.bf16.mxu0 %v12462_v63  ;;  %v1859_v47 = vadd.f32 %v12290_v45, %v1622_v60  ;;  %v10851_v30 = vld [vmem:[%s13600_s1 + $0x148] sm:$0xff]   ;;  %v5552_v45 = vshll.u32 %v12488_v33, 16  ;;  %v12520_v18 = vld [vmem:[%s11090_s16 + $0x9c] sm:$0xff]  }
 0x180   : > { %2392 = vst [vmem:[%s12365_s4 + $0x28] sm:$0xff] %v2377_v6  ;;  %v2382_v49 = vadd.f32 %v12329_v39, %v2361_v24  ;;  %v2359_v28 = vadd.f32 %v2321_v59, %v2156_v5  ;;  %v12511_v31 = vpop.f32.mrf.mxu1  ;;  %10232 = vmatprep.subr.bf16.mxu1 %v10847_v52  ;;  %10154 = vmatprep.mubr.bf16.mxu0 %v12397_v38  ;;  %v13656_v56 = vld [vmem:[#allocation18_spill] sm:$0xff]  ;;  %v12570_v11 = vld [vmem:[%s11090_s16 + $0xac] sm:$0xff]  }
 0x181   : > { %v1857_v54 = vadd.f32 %v12301_v7, %v1620_v25  ;;  %v9769_v3 = vpop.f32.mrf.mxu0  ;;  %10186 = vmatprep.mubr.bf16.mxu1 %v10848_v27  ;;  %v2157_v0 = vadd.f32 %v13655_v2, %v1854_v62  ;;  %v5550_v27 = vor.u32 %v5548_v37, %v5546_v61  ;;  %v5788_v23 = vsel %vm697_vm1, %v5786_v13, %v5787_v29  ;;  %v10853_v37 = vld [vmem:[%s13600_s1 + $0x140] sm:$0xff]   ;;  %v10858_v13 = vld [vmem:[%s13600_s1 + $0x1b8] sm:$0xff]  }
 0x182   : > { %2397 = vst [vmem:[%s12365_s4 + $0x50] sm:$0xff] %v2382_v49  ;;  %v2380_v44 = vadd.f32 %v12329_v39, %v2359_v28  ;;  %v2362_v38 = vadd.f32 %v9769_v3, %v2159_v9  ;;  %v12525_v1 = vpop.f32.mrf.mxu1  ;;  %10201 = vmatpush3.bf16.msra.mxu0 %v12462_v63  ;;  %v1621_v58 = vadd.f32 %v13656_v56, %v1418_v22  ;;  %v5554_v53 = vrot.slane %v5552_v45, 1 }
 0x183   : > { %10233 = vmatpush3.bf16.msra.mxu1 %v10847_v52  ;;  %v2324_v7 = vpop.f32.mrf.mxu0  ;;  %10202 = vmatprep.subr.bf16.mxu0 %v10850_v42  ;;  %v2162_v63 = vadd.f32 %v12294_v46, %v1859_v47  ;;  %v2160_v5 = vadd.f32 %v12307_v26, %v1857_v54  ;;  %v5547_v46 = vsel %vm307_vm0, %v5542_v10, %v5546_v61  ;;  %v5560_v62 = vshll.u32 %v12520_v18, 16 }
 0x184   : > { %2395 = vst [vmem:[%s12365_s4 + $0x40] sm:$0xff] %v2380_v44  ;;  %v2383_v52 = vadd.f32 %v12329_v39, %v2362_v38  ;;  %v2360_v60 = vadd.f32 %v2324_v7, %v2157_v0  ;;  %v12540_v20 = vpop.f32.mrf.mxu1  ;;  %10234 = vmatprep.subr.bf16.mxu1 %v10851_v30  ;;  %v1858_v6 = vadd.f32 %v12323_v34, %v1621_v58  ;;  %v5789_v25 = vrot.slane %v12488_v33, 1  ;;  %v10859_v34 = vld [vmem:[%s13600_s1 + $0x1f8] sm:$0xff]   ;;  %v10860_v33 = vld [vmem:[%s13600_s1 + $0x1b0] sm:$0xff]  }
 0x185   : > { %v9772_v32 = vpop.f32.mrf.mxu0  ;;  %10155 = vmatmul.mubr.bf16.gmra.mxu0 %v5059_v51  ;;  %v5555_v59 = vsel %vm307_vm0, %v5550_v27, %v5554_v53  ;;  %v5562_v61 = vrot.slane %v5560_v62, 1  ;;  %v5791_v47 = vrot.slane %v12520_v18, 1  ;;  %v5564_v54 = vshrl.u32 %v12520_v18, 16  ;;  %v12602_v58 = vld [vmem:[%s11090_s16 + $0xb4] sm:$0xff]  }
 0x186   : > { %2398 = vst [vmem:[%s12365_s4 + $0x58] sm:$0xff] %v2383_v52  ;;  %v2381_v24 = vadd.f32 %v12329_v39, %v2360_v60  ;;  %v2365_v26 = vadd.f32 %v9772_v32, %v2162_v63  ;;  %v12556_v12 = vpop.f32.mrf.mxu1  ;;  %10187 = vmatmul.mubr.bf16.gmra.mxu1 %v10849_v43  ;;  %10203 = vmatpush3.bf16.msra.mxu0 %v10850_v42  ;;  %v5568_v3 = vshll.u32 %v12559_v4, 16  ;;  %v5793_v18 = vrot.slane %v12559_v4, 1  ;;  %v10864_v43 = vld [vmem:[%s13600_s1 + $0x1a8] sm:$0xff]  }
 0x187   : > { %10235 = vmatpush3.bf16.msra.mxu1 %v10851_v30  ;;  %v2337_v51 = vpop.f32.mrf.mxu0  ;;  %10204 = vmatprep.subr.bf16.mxu0 %v10852_v14  ;;  %v5558_v42 = vor.u32 %v5556_v55, %v5554_v53  ;;  %v2161_v49 = vadd.f32 %v12336_v57, %v1858_v6  ;;  %v5790_v45 = vsel %vm697_vm1, %v5787_v29, %v5789_v25  ;;  %v10861_v57 = vld [vmem:[%s13600_s1 + $0x1f0] sm:$0xff]   ;;  %v5576_v44 = vshll.u32 %v12570_v11, 16  ;;  %v10865_v52 = vld [vmem:[%s13600_s1 + $0x1e8] sm:$0xff]  }
 0x188   : > { %2396 = vst [vmem:[%s12365_s4 + $0x48] sm:$0xff] %v2381_v24  ;;  %v2386_v35 = vadd.f32 %v12329_v39, %v2365_v26  ;;  %v2363_v17 = vadd.f32 %v2337_v51, %v2160_v5  ;;  %v12567_v22 = vpop.f32.mrf.mxu1  ;;  %10236 = vmatprep.subr.bf16.mxu1 %v10853_v37  ;;  %10206 = vmatprep.mubr.bf16.mxu0 %v5547_v46  ;;  %v5572_v7 = vshrl.u32 %v12559_v4, 16  ;;  %v5570_v56 = vrot.slane %v5568_v3, 1  ;;  %v10866_v26 = vld [vmem:[%s13600_s1 + $0x1a0] sm:$0xff]  }
 0x189   : > { %v9773_v9 = vpop.f32.mrf.mxu0  ;;  %10238 = vmatprep.mubr.bf16.mxu1 %v5788_v23  ;;  %v5563_v21 = vsel %vm307_vm0, %v5558_v42, %v5562_v61  ;;  %v5792_v29 = vsel %vm697_vm1, %v5789_v25, %v5791_v47  ;;  %v5566_v55 = vor.u32 %v5564_v54, %v5562_v61  ;;  %v5795_v60 = vrot.slane %v12570_v11, 1 }
 0x18a   : > { %2401 = vst [vmem:[%s12365_s4 + $0x70] sm:$0xff] %v2386_v35  ;;  %v2384_v28 = vadd.f32 %v12329_v39, %v2363_v17  ;;  %v9805_v30 = vpop.f32.mrf.mxu1  ;;  %10205 = vmatpush3.bf16.msra.mxu0 %v10852_v14  ;;  %v5578_v5 = vrot.slane %v5576_v44, 1  ;;  %v5580_v32 = vshrl.u32 %v12570_v11, 16  ;;  %v5574_v53 = vor.u32 %v5572_v7, %v5570_v56  ;;  %v12627_v35 = vld [vmem:[%s11090_s16 + $0x94] sm:$0xf] }
 0x18b   : > { %10237 = vmatpush3.bf16.msra.mxu1 %v10853_v37  ;;  %v2340_v10 = vpop.f32.mrf.mxu0  ;;  %10254 = vmatprep.subr.bf16.mxu0 %v10858_v13  ;;  %v5584_v4 = vshll.u32 %v12602_v58, 16  ;;  %v5794_v25 = vsel %vm697_vm1, %v5791_v47, %v5793_v18 }
 0x18c   : > { %2399 = vst [vmem:[%s12365_s4 + $0x60] sm:$0xff] %v2384_v28  ;;  %v2364_v2 = vadd.f32 %v2340_v10, %v2161_v49  ;;  %v12589_v0 = vpop.f32.mrf.mxu1  ;;  %10286 = vmatprep.subr.bf16.mxu1 %v10859_v34  ;;  %v5579_v61 = vsel %vm307_vm0, %v5574_v53, %v5578_v5  ;;  %v5582_v47 = vor.u32 %v5580_v32, %v5578_v5  ;;  %v5588_v49 = vshrl.u32 %v12602_v58, 16  ;;  %v10873_v5 = vld [vmem:[%s13600_s1 + $0x1d0] sm:$0xff]  }
 0x18d   : > { %v9824_v38 = vpop.f32.mrf.mxu0  ;;  %10207 = vmatmul.mubr.bf16.vlgmr.msra.gmra.mxu0 %v5555_v59  ;;  %v10867_v59 = vld [vmem:[%s13600_s1 + $0x1e0] sm:$0xff]   ;;  %v5586_v3 = vrot.slane %v5584_v4, 1 }
 0x18e   : > { %v2385_v14 = vadd.f32 %v12329_v39, %v2364_v2  ;;  %v2805_v27 = vadd.f32 %v9824_v38, %v12355_v41  ;;  %v9856_v23 = vpop.f32.mrf.mxu1  ;;  %10239 = vmatmul.mubr.bf16.vlgmr.msra.gmra.mxu1 %v5790_v45  ;;  %10255 = vmatpush3.bf16.msra.mxu0 %v10858_v13  ;;  %v12614_v13 = vld [vmem:[%s11090_s16 + $0xbc] sm:$0x1f]  }
 0x18f   : > { %10287 = vmatpush3.bf16.msra.mxu1 %v10859_v34  ;;  %v2796_v63 = vpop.f32.mrf.mxu0  ;;  %10256 = vmatprep.subr.bf16.mxu0 %v10860_v33  ;;  %v6204_v34 = vld [vmem:[%s11090_s16 + $0x90] sm:$0xf]  ;;  %v5592_v28 = vshll.u32 %v12614_v13, 16  ;;  %v10870_v2 = vld [vmem:[%s13600_s1 + $0x198] sm:$0xff]   ;;  %v5596_v11 = vshrl.u32 %v12614_v13, 16 }
 0x190   : > { %2400 = vst [vmem:[%s12365_s4 + $0x68] sm:$0xff] %v2385_v14  ;;  %v12609_v39 = vadd.f32 %v9856_v23, %v2805_v27  ;;  %v2797_v41 = vadd.f32 %v2796_v63, %v12372_v48  ;;  %v2983_v37 = vpop.f32.mrf.mxu1  ;;  %10288 = vmatprep.subr.bf16.mxu1 %v10861_v57  ;;  %10210 = vmatprep.mubr.bf16.mxu0 %v5563_v21  ;;  %v10871_v38 = vld [vmem:[%s13600_s1 + $0x1d8] sm:$0xff]   ;;  %v5799_v21 = vrot.slane %v12614_v13, 1 }
 0x191   : > { %v9825_v46 = vpop.f32.mrf.mxu0  ;;  %10242 = vmatprep.mubr.bf16.mxu1 %v5792_v29  ;;  %v5571_v48 = vsel %vm307_vm0, %v5566_v55, %v5570_v56  ;;  %v12645_v10 = vcombine.low %v6204_v34, %v12627_v35  ;;  %v5594_v7 = vrot.slane %v5592_v28, 1  ;;  %v12659_v14 = vld [vmem:[%s11090_s16 + $0x98] sm:$0xff]   ;;  %v5587_v55 = vsel %vm307_vm0, %v5582_v47, %v5586_v3  ;;  %v10876_v34 = vld [vmem:[%s13600_s1 + $0x1c8] sm:$0xff]   ;;  %v10877_v47 = vld [vmem:[%s13600_s1 + $0x180] sm:$0xff]  }
 0x192   : > { %v12616_v62 = vadd.f32 %v2983_v37, %v2797_v41  ;;  %v2808_v6 = vadd.f32 %v9825_v46, %v12392_v8  ;;  %v9857_v24 = vpop.f32.mrf.mxu1  ;;  %10257 = vmatpush3.bf16.msra.mxu0 %v10860_v33  ;;  %v5796_v33 = vsel %vm697_vm1, %v5793_v18, %v5795_v60  ;;  %v6284_v53 = vshll.u32 %v12659_v14, 16 }
 0x193   : > { %10289 = vmatpush3.bf16.msra.mxu1 %v10861_v57  ;;  %v2799_v51 = vpop.f32.mrf.mxu0  ;;  %10258 = vmatprep.subr.bf16.mxu0 %v10864_v43  ;;  %v5797_v57 = vrot.slane %v12602_v58, 1  ;;  %v6279_v56 = vshll.u32 %v12645_v10, 16  ;;  %v6277_v4 = vshrl.u32 %v12645_v10, 16 }
 0x194   : > { %v12629_v17 = vadd.f32 %v9857_v24, %v2808_v6  ;;  %v2800_v8 = vadd.f32 %v2799_v51, %v12415_v16  ;;  %v2986_v9 = vpop.f32.mrf.mxu1  ;;  %10290 = vmatprep.subr.bf16.mxu1 %v10865_v52  ;;  %v12688_v6 = vld [vmem:[%s11090_s16 + $0xa0] sm:$0xff]  }
 0x195   : > { %v9828_v42 = vpop.f32.mrf.mxu0  ;;  %10211 = vmatmul.mubr.bf16.gmra.mxu0 %v5571_v48  ;;  %v5798_v63 = vsel %vm697_vm1, %v5795_v60, %v5797_v57  ;;  %v5800_v46 = vsel %vm697_vm1, %v5797_v57, %v5799_v21  ;;  %v6281_v51 = vrot.slane %v6279_v56, 1  ;;  %v6292_v28 = vshll.u32 %v12688_v6, 16 }
 0x196   : > { %v12641_v16 = vadd.f32 %v2986_v9, %v2800_v8  ;;  %v2821_v30 = vadd.f32 %v9828_v42, %v12436_v15  ;;  %v9860_v54 = vpop.f32.mrf.mxu1  ;;  %10243 = vmatmul.mubr.bf16.gmra.mxu1 %v5794_v25  ;;  %10259 = vmatpush3.bf16.msra.mxu0 %v10864_v43  ;;  %v5590_v43 = vor.u32 %v5588_v49, %v5586_v3  ;;  %v6286_v49 = vrot.slane %v6284_v53, 1  ;;  %v10878_v3 = vld [vmem:[%s13600_s1 + $0x1c0] sm:$0xff]  }
 0x197   : > { %10291 = vmatpush3.bf16.msra.mxu1 %v10865_v52  ;;  %v2812_v45 = vpop.f32.mrf.mxu0  ;;  %10260 = vmatprep.subr.bf16.mxu0 %v10866_v26  ;;  %v10872_v52 = vld [vmem:[%s13600_s1 + $0x190] sm:$0xff]   ;;  %v6282_v10 = vor.u32 %v6281_v51, %v6277_v4 }
 0x198   : > { %v12651_v18 = vadd.f32 %v9860_v54, %v2821_v30  ;;  %v2813_v15 = vadd.f32 %v2812_v45, %v12448_v19  ;;  %v2999_v44 = vpop.f32.mrf.mxu1  ;;  %10292 = vmatprep.subr.bf16.mxu1 %v10867_v59  ;;  %10214 = vmatprep.mubr.bf16.mxu0 %v5579_v61  ;;  %v5595_v60 = vsel %vm307_vm0, %v5590_v43, %v5594_v7 }
 0x199   : > { %v9829_v29 = vpop.f32.mrf.mxu0  ;;  %10246 = vmatprep.mubr.bf16.mxu1 %v5796_v33  ;;  %v12702_v33 = vld [vmem:[%s11090_s16 + $0xa8] sm:$0xff]   ;;  %v5598_v61 = vor.u32 %v5596_v11, %v5594_v7 }
 0x19a   : > { %v12661_v27 = vadd.f32 %v2999_v44, %v2813_v15  ;;  %v2824_v23 = vadd.f32 %v9829_v29, %v12468_v36  ;;  %v9861_v19 = vpop.f32.mrf.mxu1  ;;  %10261 = vmatpush3.bf16.msra.mxu0 %v10866_v26  ;;  %v10879_v44 = vld [vmem:[%s11090_s16 + $0x90] sm:$0xff]  }
 0x19b   : > { %10293 = vmatpush3.bf16.msra.mxu1 %v10867_v59  ;;  %v2815_v58 = vpop.f32.mrf.mxu0  ;;  %10262 = vmatprep.subr.bf16.mxu0 %v10870_v2  ;;  %v12721_v29 = vld [vmem:[%s11090_s16 + $0xb0] sm:$0xff]  }
 0x19c   : > { %v12672_v41 = vadd.f32 %v9861_v19, %v2824_v23  ;;  %v2816_v36 = vadd.f32 %v2815_v58, %v12485_v40  ;;  %v3002_v37 = vpop.f32.mrf.mxu1  ;;  %10294 = vmatprep.subr.bf16.mxu1 %v10871_v38  ;;  %v10875_v40 = vld [vmem:[%s13600_s1 + $0x188] sm:$0xff]   ;;  %v10882_v58 = vld [vmem:[%s11090_s16 + $0x98] sm:$0xff]   ;;  %v6312_v4 = vshrl.u32 %v12721_v29, 16 }
 0x19d   : > { %v9832_v32 = vpop.f32.mrf.mxu0  ;;  %10215 = vmatmul.mubr.bf16.gmra.mxu0 %v5587_v55 }
 0x19e   : > { %v12690_v24 = vadd.f32 %v3002_v37, %v2816_v36  ;;  %v2837_v48 = vadd.f32 %v9832_v32, %v12496_v50  ;;  %v9864_v26 = vpop.f32.mrf.mxu1  ;;  %10247 = vmatmul.mubr.bf16.gmra.mxu1 %v5798_v63  ;;  %10263 = vmatpush3.bf16.msra.mxu0 %v10870_v2  ;;  %v6288_v50 = vshrl.u32 %v12659_v14, 16  ;;  %v6294_v63 = vrot.slane %v6292_v28, 1 }
 0x19f   : > { %10295 = vmatpush3.bf16.msra.mxu1 %v10871_v38  ;;  %v2828_v25 = vpop.f32.mrf.mxu0  ;;  %10264 = vmatprep.subr.bf16.mxu0 %v10872_v52  ;;  %v6300_v38 = vshll.u32 %v12702_v33, 16  ;;  %v6308_v37 = vshll.u32 %v12721_v29, 16 }
 0x1a0   : > { %v12697_v8 = vadd.f32 %v9864_v26, %v2837_v48  ;;  %v2829_v9 = vadd.f32 %v2828_v25, %v12511_v31  ;;  %v3015_v59 = vpop.f32.mrf.mxu1  ;;  %10296 = vmatprep.subr.bf16.mxu1 %v10873_v5  ;;  %10218 = vmatprep.mubr.bf16.mxu0 %v5595_v60  ;;  %v6290_v56 = vor.u32 %v6288_v50, %v6286_v49  ;;  %v6304_v26 = vshrl.u32 %v12702_v33, 16 }
 0x1a1   : > { %v9833_v42 = vpop.f32.mrf.mxu0  ;;  %10250 = vmatprep.mubr.bf16.mxu1 %v5800_v46 }
 0x1a2   : > { %v12708_v30 = vadd.f32 %v3015_v59, %v2829_v9  ;;  %v2840_v31 = vadd.f32 %v9833_v42, %v12525_v1  ;;  %v9865_v54 = vpop.f32.mrf.mxu1  ;;  %10265 = vmatpush3.bf16.msra.mxu0 %v10872_v52  ;;  %v6296_v1 = vshrl.u32 %v12688_v6, 16  ;;  %v10884_v52 = vld [vmem:[%s13600_s1 + $0x238] sm:$0xff]   ;;  %v6295_v48 = vsel %vm307_vm0, %v6290_v56, %v6294_v63  ;;  %v10888_v9 = vld [vmem:[%s11090_s16 + $0xa0] sm:$0xff]  }
 0x1a3   : > { %10297 = vmatpush3.bf16.msra.mxu1 %v10873_v5  ;;  %v2831_v45 = vpop.f32.mrf.mxu0  ;;  %10266 = vmatprep.subr.bf16.mxu0 %v10875_v40  ;;  %v12741_v5 = vld [vmem:[%s11090_s16 + $0xb8] sm:$0xff]   ;;  %v6310_v59 = vrot.slane %v6308_v37, 1  ;;  %v12758_v42 = vld [vmem:[%s11090_s16 + $0xc0] sm:$0xff]  }
 0x1a4   : > { %v12714_v57 = vadd.f32 %v9865_v54, %v2840_v31  ;;  %v2832_v2 = vadd.f32 %v2831_v45, %v12540_v20  ;;  %v3018_v15 = vpop.f32.mrf.mxu1  ;;  %10298 = vmatprep.subr.bf16.mxu1 %v10876_v34  ;;  %v6287_v20 = vsel %vm307_vm0, %v6282_v10, %v6286_v49  ;;  %v6298_v46 = vor.u32 %v6296_v1, %v6294_v63  ;;  %v10893_v54 = vld [vmem:[%s13600_s1 + $0x68] sm:$0xff]  }
 0x1a5   : > { %v9836_v43 = vpop.f32.mrf.mxu0  ;;  %10219 = vmatmul.mubr.bf16.gmra.mxu0 %v5598_v61  ;;  %v6316_v50 = vshll.u32 %v12741_v5, 16  ;;  %v6320_v61 = vshrl.u32 %v12741_v5, 16  ;;  %v10890_v10 = vld [vmem:[%s11090_s16 + $0xa8] sm:$0xff]  }
 0x1a6   : > { %v12723_v7 = vadd.f32 %v3018_v15, %v2832_v2  ;;  %v2853_v23 = vadd.f32 %v9836_v43, %v12556_v12  ;;  %v9868_v19 = vpop.f32.mrf.mxu1  ;;  %10251 = vmatmul.mubr.bf16.gmra.mxu1 %v5799_v21  ;;  %10267 = vmatpush3.bf16.msra.mxu0 %v10875_v40  ;;  %v10885_v21 = vld [vmem:[%s13600_s1 + $0x78] sm:$0xff]   ;;  %v6302_v40 = vrot.slane %v6300_v38, 1  ;;  %v12781_v1 = vld [vmem:[%s11090_s16 + $0xc8] sm:$0x1f]   ;;  %v10894_v43 = vld [vmem:[%s13600_s1 + $0x220] sm:$0xff]  }
 0x1a7   : > { %10299 = vmatpush3.bf16.msra.mxu1 %v10876_v34  ;;  %v2844_v55 = vpop.f32.mrf.mxu0  ;;  %10268 = vmatprep.subr.bf16.mxu0 %v10877_v47  ;;  %v10887_v34 = vld [vmem:[%s13600_s1 + $0x70] sm:$0xff]   ;;  %v6318_v15 = vrot.slane %v6316_v50, 1 }
 0x1a8   : > { %13657 = vst [vmem:[#allocation19_spill] sm:$0xff] %v12723_v7  ;;  %v12733_v36 = vadd.f32 %v9868_v19, %v2853_v23  ;;  %v2845_v12 = vadd.f32 %v2844_v55, %v12567_v22  ;;  %v3031_v13 = vpop.f32.mrf.mxu1  ;;  %10300 = vmatprep.subr.bf16.mxu1 %v10878_v3  ;;  %10270 = vmatprep.mubr.bf16.mxu0 %v10879_v44  ;;  %v10886_v22 = vld [vmem:[%s13600_s1 + $0x230] sm:$0xff]   ;;  %v6324_v44 = vshll.u32 %v12758_v42, 16  ;;  %v12790_v19 = vld [vmem:[%s11090_s16 + $0xb8] sm:$0xf] }
 0x1a9   : > { %v9837_v11 = vpop.f32.mrf.mxu0  ;;  %10302 = vmatprep.mubr.bf16.mxu1 %v6287_v20  ;;  %v6303_v31 = vsel %vm307_vm0, %v6298_v46, %v6302_v40  ;;  %v6306_v45 = vor.u32 %v6304_v26, %v6302_v40  ;;  %v6738_v23 = vld [vmem:[%s11090_s16 + $0xb4] sm:$0xf]  ;;  %v6314_v55 = vor.u32 %v6312_v4, %v6310_v59  ;;  %v6322_v40 = vor.u32 %v6320_v61, %v6318_v15  ;;  %v12819_v26 = vld [vmem:[%s11090_s16 + $0xbc] sm:$0xf]  ;;  %v6757_v4 = vld [vmem:[%s11090_s16 + $0xc0] sm:$0x1] }
 0x1aa   : > { %13658 = vst [vmem:[#allocation7_spill] sm:$0xff] %v12733_v36  ;;  %v12743_v32 = vadd.f32 %v3031_v13, %v2845_v12  ;;  %v9869_v60 = vpop.f32.mrf.mxu1  ;;  %10269 = vmatpush3.bf16.msra.mxu0 %v10877_v47  ;;  %v10896_v12 = vld [vmem:[%s11090_s16 + $0xb0] sm:$0xff]   ;;  %v6328_v11 = vshrl.u32 %v12758_v42, 16  ;;  %v10909_v36 = vld [vmem:[%s13600_s1 + $0x200] sm:$0xff]  }
 0x1ab   : > { %10301 = vmatpush3.bf16.msra.mxu1 %v10878_v3  ;;  %v2847_v53 = vpop.f32.mrf.mxu0  ;;  %10318 = vmatprep.subr.bf16.mxu0 %v10884_v52  ;;  %v6319_v37 = vsel %vm307_vm0, %v6314_v55, %v6318_v15  ;;  %v6332_v60 = vshll.u32 %v12781_v1, 16  ;;  %v10902_v15 = vld [vmem:[%s13600_s1 + $0x210] sm:$0xff]  }
 0x1ac   : > { %13659 = vst [vmem:[#allocation2_spill] sm:$0xff] %v12743_v32  ;;  %v2848_v51 = vadd.f32 %v2847_v53, %v12589_v0  ;;  %v3034_v25 = vpop.f32.mrf.mxu1  ;;  %10350 = vmatprep.subr.bf16.mxu1 %v10885_v21  ;;  %v10892_v0 = vld [vmem:[%s13600_s1 + $0x228] sm:$0xff]   ;;  %v6326_v53 = vrot.slane %v6324_v44, 1  ;;  %v6996_v7 = vld [vmem:[%s11090_s16 + $0xb4] sm:$0xe] }
 0x1ad   : > { %v12761_v47 = vpop.f32.mrf.mxu0  ;;  %10271 = vmatmul.mubr.bf16.vlgmr.msra.gmra.mxu0 %v10882_v58  ;;  %v6311_v58 = vsel %vm307_vm0, %v6306_v45, %v6310_v59  ;;  %v6334_v61 = vrot.slane %v6332_v60, 1 }
 0x1ae   : > { %v12766_v49 = vadd.f32 %v3034_v25, %v2848_v51  ;;  %v12768_v28 = vpop.f32.mrf.mxu1  ;;  %10303 = vmatmul.mubr.bf16.vlgmr.msra.gmra.mxu1 %v6295_v48  ;;  %10319 = vmatpush3.bf16.msra.mxu0 %v10884_v52  ;;  %v10895_v52 = vld [vmem:[%s13600_s1 + $0x60] sm:$0xff]   ;;  %v10900_v48 = vld [vmem:[%s13600_s1 + $0x218] sm:$0xff]   ;;  %v6330_v50 = vor.u32 %v6328_v11, %v6326_v53  ;;  %v6327_v45 = vsel %vm307_vm0, %v6322_v40, %v6326_v53 }
 0x1af   : > { %10351 = vmatpush3.bf16.msra.mxu1 %v10885_v21  ;;  %v12774_v3 = vpop.f32.mrf.mxu0  ;;  %10320 = vmatprep.subr.bf16.mxu0 %v10886_v22  ;;  %v10901_v25 = vld [vmem:[%s13600_s1 + $0x58] sm:$0xff]  }
 0x1b0   : > { %13660 = vst [vmem:[#allocation9_spill] sm:$0xff] %v12766_v49  ;;  %v12777_v2 = vpop.f32.mrf.mxu1  ;;  %10352 = vmatprep.subr.bf16.mxu1 %v10887_v34  ;;  %10274 = vmatprep.mubr.bf16.mxu0 %v10888_v9  ;;  %v10898_v9 = vld [vmem:[%s11090_s16 + $0xb8] sm:$0xff]  }
 0x1b1   : > { %v12783_v38 = vpop.f32.mrf.mxu0  ;;  %10306 = vmatprep.mubr.bf16.mxu1 %v6303_v31  ;;  %v12834_v31 = vcombine.low %v12819_v26, %v6757_v4 }
 0x1b2   : > { %v12792_v20 = vpop.f32.mrf.mxu1  ;;  %10321 = vmatpush3.bf16.msra.mxu0 %v10886_v22  ;;  %v12811_v22 = vcombine.low %v6738_v23, %v12790_v19  ;;  %v10904_v23 = vld [vmem:[%s11090_s16 + $0xc0] sm:$0xff]  }
 0x1b3   : > { %10353 = vmatpush3.bf16.msra.mxu1 %v10887_v34  ;;  %v12794_v56 = vpop.f32.mrf.mxu0  ;;  %10322 = vmatprep.subr.bf16.mxu0 %v10892_v0  ;;  %v6792_v40 = vshll.u32 %v12834_v31, 16 }
 0x1b4   : > { %v12797_v63 = vpop.f32.mrf.mxu1  ;;  %10354 = vmatprep.subr.bf16.mxu1 %v10893_v54  ;;  %v6785_v11 = vshrl.u32 %v12811_v22, 16 }
 0x1b5   : > { %v12803_v13 = vpop.f32.mrf.mxu0  ;;  %10275 = vmatmul.mubr.bf16.gmra.mxu0 %v10890_v10  ;;  %v6794_v32 = vrot.slane %v6792_v40, 1 }
 0x1b6   : > { %v12805_v21 = vpop.f32.mrf.mxu1  ;;  %10307 = vmatmul.mubr.bf16.gmra.mxu1 %v6311_v58  ;;  %10323 = vmatpush3.bf16.msra.mxu0 %v10892_v0  ;;  %v6506_v0 = vld [vmem:[%s11090_s16 + $0x90] sm:$0xe]  ;;  %v6336_v58 = vshrl.u32 %v12781_v1, 16 }
 0x1b7   : > { %10355 = vmatpush3.bf16.msra.mxu1 %v10893_v54  ;;  %v12813_v46 = vpop.f32.mrf.mxu0  ;;  %10324 = vmatprep.subr.bf16.mxu0 %v10894_v43  ;;  %v6787_v54 = vshll.u32 %v12811_v22, 16 }
 0x1b8   : > { %v12822_v51 = vpop.f32.mrf.mxu1  ;;  %10356 = vmatprep.subr.bf16.mxu1 %v10895_v52  ;;  %10278 = vmatprep.mubr.bf16.mxu0 %v10896_v12 }
 0x1b9   : > { %v12827_v34 = vpop.f32.mrf.mxu0  ;;  %10310 = vmatprep.mubr.bf16.mxu1 %v6319_v37  ;;  %v6335_v37 = vsel %vm307_vm0, %v6330_v50, %v6334_v61  ;;  %v6789_v60 = vrot.slane %v6787_v54, 1 }
 0x1ba   : > { %v12830_v59 = vpop.f32.mrf.mxu1  ;;  %10325 = vmatpush3.bf16.msra.mxu0 %v10894_v43  ;;  %v10903_v43 = vld [vmem:[%s13600_s1 + $0x50] sm:$0xff]  }
 0x1bb   : > { %10357 = vmatpush3.bf16.msra.mxu1 %v10895_v52  ;;  %v12837_v10 = vpop.f32.mrf.mxu0  ;;  %10326 = vmatprep.subr.bf16.mxu0 %v10900_v48  ;;  %v8739_v52 = vcombine.low %v6506_v0, %v12627_v35  ;;  %v10907_v35 = vld [vmem:[%s13600_s1 + $0x208] sm:$0xff]   ;;  %v6527_v0 = vrot.slane %v12659_v14, 1  ;;  %v6790_v49 = vor.u32 %v6789_v60, %v6785_v11  ;;  %v10910_v14 = vld [vmem:[%s13600_s1 + $0x40] sm:$0xff]   ;;  %v6529_v11 = vrot.slane %v12688_v6, 1 }
 0x1bc   : > { %v12843_v44 = vpop.f32.mrf.mxu1  ;;  %10358 = vmatprep.subr.bf16.mxu1 %v10901_v25  ;;  %v8799_v60 = vcombine.low %v6996_v7, %v12790_v19  ;;  %v6531_v6 = vrot.slane %v12702_v33, 1  ;;  %v10918_v33 = vld [vmem:[%s13600_s1 + $0xb0] sm:$0xff]  }
 0x1bd   : > { %v12849_v55 = vpop.f32.mrf.mxu0  ;;  %10279 = vmatmul.mubr.bf16.gmra.mxu0 %v10898_v9  ;;  %v6526_v50 = vrot.slane %v8739_v52, 1  ;;  %v6796_v52 = vshrl.u32 %v12834_v31, 16 }
 0x1be   : > { %v12853_v12 = vpop.f32.mrf.mxu1  ;;  %10311 = vmatmul.mubr.bf16.gmra.mxu1 %v6327_v45  ;;  %10327 = vmatpush3.bf16.msra.mxu0 %v10900_v48  ;;  %v10908_v48 = vld [vmem:[%s13600_s1 + $0x48] sm:$0xff]   ;;  %v6338_v45 = vor.u32 %v6336_v58, %v6334_v61  ;;  %v6795_v58 = vsel %vm307_vm0, %v6790_v49, %v6794_v32  ;;  %v10916_v49 = vld [vmem:[%s13600_s1 + $0xb8] sm:$0xff]  }
 0x1bf   : > { %10359 = vmatpush3.bf16.msra.mxu1 %v10901_v25  ;;  %v12858_v53 = vpop.f32.mrf.mxu0  ;;  %10328 = vmatprep.subr.bf16.mxu0 %v10902_v15  ;;  %v10906_v25 = vld [vmem:[%s11090_s16 + $0xc8] ss:$0 sps:$4 sm:$0xff]   ;;  %v6528_v61 = vsel %vm697_vm1, %v6526_v50, %v6527_v0  ;;  %v6798_v19 = vor.u32 %v6796_v52, %v6794_v32  ;;  %v6532_v32 = vsel %vm697_vm1, %v6529_v11, %v6531_v6 }
 0x1c0   : > { %v12863_v4 = vpop.f32.mrf.mxu1  ;;  %10360 = vmatprep.subr.bf16.mxu1 %v10903_v43  ;;  %10282 = vmatprep.mubr.bf16.mxu0 %v10904_v23 }
 0x1c1   : > { %v12868_v9 = vpop.f32.mrf.mxu0  ;;  %10314 = vmatprep.mubr.bf16.mxu1 %v6335_v37 }
 0x1c2   : > { %v12872_v54 = vpop.f32.mrf.mxu1  ;;  %10329 = vmatpush3.bf16.msra.mxu0 %v10902_v15 }
 0x1c3   : > { %13661 = vst [vmem:[#allocation20_spill] sm:$0xff] %v12872_v54  ;;  %10361 = vmatpush3.bf16.msra.mxu1 %v10903_v43  ;;  %v12874_v23 = vpop.f32.mrf.mxu0  ;;  %10330 = vmatprep.subr.bf16.mxu0 %v10907_v35 }
 0x1c4   : > { %13662 = vst [vmem:[#allocation8_spill] sm:$0xff] %v12874_v23  ;;  %v12880_v37 = vpop.f32.mrf.mxu1  ;;  %10362 = vmatprep.subr.bf16.mxu1 %v10908_v48 }
 0x1c5   : > { %13663 = vst [vmem:[#allocation3_spill] sm:$0xff] %v12880_v37  ;;  %v12885_v15 = vpop.f32.mrf.mxu0  ;;  %10283 = vmatmul.mubr.bf16.gmra.mxu0 %v10906_v25  ;;  %v10915_v25 = vld [vmem:[%s13600_s1 + $0x38] sm:$0xff]  }
 0x1c6   : > { %13664 = vst [vmem:[#allocation11_spill] sm:$0xff] %v12885_v15  ;;  %v12888_v43 = vpop.f32.mrf.mxu1  ;;  %10315 = vmatmul.mubr.bf16.gmra.mxu1 %v6338_v45  ;;  %10331 = vmatpush3.bf16.msra.mxu0 %v10907_v35  ;;  %v7016_v45 = vrot.slane %v8799_v60, 1  ;;  %v10919_v60 = vld [vmem:[%s13600_s1 + $0x28] sm:$0xff]  }
 0x1c7   : > { %13665 = vst [vmem:[#allocation22_spill] sm:$0xff] %v12888_v43  ;;  %10363 = vmatpush3.bf16.msra.mxu1 %v10908_v48  ;;  %v12894_v40 = vpop.f32.mrf.mxu0  ;;  %10332 = vmatprep.subr.bf16.mxu0 %v10909_v36  ;;  %v6530_v48 = vsel %vm697_vm1, %v6527_v0, %v6529_v11  ;;  %v13603_v43 = vrot.slane %v12834_v31, 1  ;;  %v6535_v11 = vrot.slane %v12741_v5, 1  ;;  %v10921_v5 = vld [vmem:[%s13600_s1 + $0x20] sm:$0xff]  }
 0x1c8   : > { %13666 = vst [vmem:[#allocation10_spill] sm:$0xff] %v12894_v40  ;;  %v12899_v50 = vpop.f32.mrf.mxu1  ;;  %10364 = vmatprep.subr.bf16.mxu1 %v10910_v14  ;;  %10334 = vmatprep.mubr.bf16.mxu0 %v6528_v61  ;;  %v10917_v61 = vld [vmem:[%s13600_s1 + $0x30] sm:$0xff]   ;;  %v12976_v40 = vld [vmem:[%s11090_s16 + $0xc4] sm:$0xf] }
 0x1c9   : > { %13667 = vst [vmem:[#allocation4_spill] sm:$0xff] %v12899_v50  ;;  %v9901_v35 = vpop.f32.mrf.mxu0  ;;  %10366 = vmatprep.mubr.bf16.mxu1 %v6795_v58  ;;  %v7018_v58 = vsel %vm697_vm1, %v7016_v45, %v13603_v43  ;;  %v10923_v43 = vld [vmem:[%s13600_s1 + $0x18] sm:$0xff]   ;;  %13671 = vst [vmem:[#allocation5_spill] sm:$0xff] %v12976_v40 }
 0x1ca   : > { %v9933_v7 = vpop.f32.mrf.mxu1  ;;  %10333 = vmatpush3.bf16.msra.mxu0 %v10909_v36 }
 0x1cb   : > { %10365 = vmatpush3.bf16.msra.mxu1 %v10910_v14  ;;  %v12907_v50 = vpop.f32.mrf.mxu0  ;;  %10370 = vmatprep.subr.bf16.mxu0 %v10915_v25  ;;  %v6533_v14 = vrot.slane %v12721_v29, 1  ;;  %v10920_v29 = vld [vmem:[%s13600_s1 + $0xa8] sm:$0xff]  }
 0x1cc   : > { %13668 = vst [vmem:[#allocation13_spill] sm:$0xff] %v12907_v50  ;;  %v12912_v35 = vpop.f32.mrf.mxu1  ;;  %10390 = vmatprep.subr.bf16.mxu1 %v10916_v49 }
 0x1cd   : > { %13669 = vst [vmem:[#allocation24_spill] sm:$0xff] %v12912_v35  ;;  %v12917_v36 = vpop.f32.mrf.mxu0  ;;  %10335 = vmatmul.mubr.bf16.vlgmr.msra.gmra.mxu0 %v6530_v48  ;;  %v6536_v45 = vsel %vm697_vm1, %v6533_v14, %v6535_v11  ;;  %v6539_v35 = vrot.slane %v12781_v1, 1  ;;  %v10925_v1 = vld [vmem:[%s13600_s1 + $0x10] sm:$0xff]  }
 0x1ce   : > { %v12920_v0 = vpop.f32.mrf.mxu1  ;;  %10367 = vmatmul.mubr.bf16.vlgmr.msra.gmra.mxu1 %v6798_v19  ;;  %10371 = vmatpush3.bf16.msra.mxu0 %v10915_v25  ;;  %v6534_v19 = vsel %vm697_vm1, %v6531_v6, %v6533_v14 }
 0x1cf   : > { %10391 = vmatpush3.bf16.msra.mxu1 %v10916_v49  ;;  %v12926_v52 = vpop.f32.mrf.mxu0  ;;  %10372 = vmatprep.subr.bf16.mxu0 %v10917_v61 }
 0x1d0   : > { %v12932_v7 = vpop.f32.mrf.mxu1  ;;  %10392 = vmatprep.subr.bf16.mxu1 %v10918_v33  ;;  %10338 = vmatprep.mubr.bf16.mxu0 %v6532_v32 }
 0x1d1   : > { %v12937_v25 = vpop.f32.mrf.mxu0  ;;  %10406 = vmatprep.mubr.bf16.mxu1 %v7018_v58  ;;  %v10922_v58 = vld [vmem:[%s13600_s1 + $0xa0] sm:$0xff]  }
 0x1d2   : > { %v12939_v49 = vpop.f32.mrf.mxu1  ;;  %10373 = vmatpush3.bf16.msra.mxu0 %v10917_v61 }
 0x1d3   : > { %10393 = vmatpush3.bf16.msra.mxu1 %v10918_v33  ;;  %v12942_v48 = vpop.f32.mrf.mxu0  ;;  %10374 = vmatprep.subr.bf16.mxu0 %v10919_v60  ;;  %v6537_v33 = vrot.slane %v12758_v42, 1 }
 0x1d4   : > { %v12948_v32 = vpop.f32.mrf.mxu1  ;;  %10394 = vmatprep.subr.bf16.mxu1 %v10920_v29 }
 0x1d5   : > { %v12953_v61 = vpop.f32.mrf.mxu0  ;;  %10339 = vmatmul.mubr.bf16.gmra.mxu0 %v6534_v19  ;;  %v6540_v15 = vsel %vm697_vm1, %v6537_v33, %v6539_v35 }
 0x1d6   : > { %v12955_v6 = vpop.f32.mrf.mxu1  ;;  %10375 = vmatpush3.bf16.msra.mxu0 %v10919_v60  ;;  %10342 = vmatprep.mubr.bf16.mxu0 %v6536_v45  ;;  %v10924_v60 = vld [vmem:[%s13600_s1 + $0x98] sm:$0xff]   ;;  %v7248_v45 = vld [vmem:[%s11090_s16 + $0xc0] sm:$0xf] }
 0x1d7   : > { %10395 = vmatpush3.bf16.msra.mxu1 %v10920_v29  ;;  %v12958_v14 = vpop.f32.mrf.mxu0  ;;  %10376 = vmatprep.subr.bf16.mxu0 %v10921_v5  ;;  %v6538_v29 = vsel %vm697_vm1, %v6535_v11, %v6537_v33  ;;  %v10926_v11 = vld [vmem:[%s13600_s1 + $0x90] sm:$0xff]   ;;  %v10927_v33 = vld [vmem:[%s13600_s1 + $0x8] sm:$0xff]  }
 0x1d8   : > { %v12964_v50 = vpop.f32.mrf.mxu1  ;;  %10396 = vmatprep.subr.bf16.mxu1 %v10922_v58 }
 0x1d9   : > { %v12969_v19 = vpop.f32.mrf.mxu0 }
 0x1da   : > { %v12971_v42 = vpop.f32.mrf.mxu1  ;;  %10377 = vmatpush3.bf16.msra.mxu0 %v10921_v5 }
 0x1db   : > { %13670 = vst [vmem:[#allocation21_spill] sm:$0xff] %v12971_v42  ;;  %10397 = vmatpush3.bf16.msra.mxu1 %v10922_v58  ;;  %v12978_v37 = vpop.f32.mrf.mxu0  ;;  %10378 = vmatprep.subr.bf16.mxu0 %v10923_v43  ;;  %v8850_v58 = vcombine.low %v7248_v45, %v12976_v40  ;;  %v13007_v40 = vld [vmem:[%s11090_s16 + $0xc8] sm:$0x1f]  }
 0x1dc   : > { %v12984_v54 = vpop.f32.mrf.mxu1  ;;  %10398 = vmatprep.subr.bf16.mxu1 %v10924_v60 }
 0x1dd   : > { %13672 = vst [vmem:[#allocation15_spill] sm:$0xff] %v12984_v54  ;;  %v12989_v5 = vpop.f32.mrf.mxu0  ;;  %10343 = vmatmul.mubr.bf16.gmra.mxu0 %v6538_v29  ;;  %v10928_v29 = vld [vmem:[%s13600_s1 + $0x88] sm:$0xff]  }
 0x1de   : > { %13673 = vst [vmem:[#allocation12_spill] sm:$0xff] %v12989_v5  ;;  %v12992_v42 = vpop.f32.mrf.mxu1  ;;  %10379 = vmatpush3.bf16.msra.mxu0 %v10923_v43  ;;  %10346 = vmatprep.mubr.bf16.mxu0 %v6540_v15  ;;  %v7281_v15 = vshll.u32 %v8850_v58, 16  ;;  %v3283_v43 = vadd.f32 %v12761_v47, %v12609_v39  ;;  %v10930_v39 = vld [vmem:[%s13600_s1 + $0x80] sm:$0xff]   ;;  %v3284_v47 = vadd.f32 %v12783_v38, %v12629_v17  ;;  %v10932_v17 = vld [vmem:[%s13600_s1 + $0xf8] sm:$0xff]  }
 0x1df   : > { %13674 = vst [vmem:[#allocation23_spill] sm:$0xff] %v12992_v42  ;;  %10399 = vmatpush3.bf16.msra.mxu1 %v10924_v60  ;;  %v12994_v23 = vpop.f32.mrf.mxu0  ;;  %10380 = vmatprep.subr.bf16.mxu0 %v10925_v1 }
 0x1e0   : > { %13675 = vst [vmem:[#allocation14_spill] sm:$0xff] %v12994_v23  ;;  %v12999_v54 = vpop.f32.mrf.mxu1  ;;  %10400 = vmatprep.subr.bf16.mxu1 %v10926_v11  ;;  %v3585_v5 = vadd.f32 %v12768_v28, %v3283_v43  ;;  %v8774_v28 = vcombine.low %v12819_v26, %v12819_v26 }
 0x1e1   : > { %13676 = vst [vmem:[#allocation25_spill] sm:$0xff] %v12999_v54  ;;  %v13004_v45 = vpop.f32.mrf.mxu0  ;;  %v10929_v54 = vld [vmem:[%s13600_s1] sm:$0xff]  }
 0x1e2   : > { %13677 = vst [vmem:[#allocation16_spill] sm:$0xff] %v13004_v45  ;;  %v13011_v60 = vpop.f32.mrf.mxu1  ;;  %10381 = vmatpush3.bf16.msra.mxu0 %v10925_v1  ;;  %v3281_v45 = vadd.f32 %v12774_v3, %v12616_v62 }
 0x1e3   : > { %13678 = vst [vmem:[#allocation6_spill] sm:$0xff] %v13011_v60  ;;  %10401 = vmatpush3.bf16.msra.mxu1 %v10926_v11  ;;  %v13013_v42 = vpop.f32.mrf.mxu0  ;;  %10382 = vmatprep.subr.bf16.mxu0 %v10927_v33  ;;  %v7279_v11 = vshrl.u32 %v8850_v58, 16  ;;  %v7283_v60 = vrot.slane %v7281_v15, 1  ;;  %v3787_v58 = vadd.f32 %v12917_v36, %v3585_v5  ;;  %v3285_v36 = vadd.f32 %v12813_v46, %v12661_v27  ;;  %v10935_v27 = vld [vmem:[%s13600_s1 + $0x130] sm:$0xff]   ;;  %v10948_v46 = vld [vmem:[%s11090_s16 + $0xc0] sm:$0xff]  }
 0x1e4   : > { %13679 = vst [vmem:[#allocation17_spill] sm:$0xff] %v13013_v42  ;;  %v13020_v23 = vpop.f32.mrf.mxu1  ;;  %10402 = vmatprep.subr.bf16.mxu1 %v10928_v29  ;;  %v7286_v42 = vshll.u32 %v13007_v40, 16  ;;  %v3583_v38 = vadd.f32 %v12777_v2, %v3281_v45  ;;  %v3287_v2 = vadd.f32 %v12803_v13, %v12651_v18  ;;  %v10934_v18 = vld [vmem:[%s13600_s1 + $0xf0] sm:$0xff]  }
 0x1e5   : > { %v13027_v1 = vpop.f32.mrf.mxu0  ;;  %10347 = vmatmul.mubr.bf16.gmra.mxu0 %v6539_v35  ;;  %v3282_v35 = vadd.f32 %v12794_v56, %v12641_v16  ;;  %v7284_v15 = vor.u32 %v7283_v60, %v7279_v11  ;;  %v4023_v13 = vadd.f32 %v12920_v0, %v3787_v58  ;;  %v13680_v11 = vrot.slane %v12834_v31, 1  ;;  %v13100_v58 = vld [vmem:[%s13601_s2] ss:$0 sm:$0xff] }
 0x1e6   : > { %v13031_v62 = vpop.f32.mrf.mxu1  ;;  %10383 = vmatpush3.bf16.msra.mxu0 %v10927_v33  ;;  %10386 = vmatprep.mubr.bf16.mxu0 %v12811_v22  ;;  %v10933_v22 = vld [vmem:[%s13600_s1 + $0x138] sm:$0xff]   ;;  %v13053_v16 = vrot.slane %v7286_v42, 1  ;;  %v3785_v56 = vadd.f32 %v12926_v52, %v3583_v38 }
 0x1e7   : > { %10403 = vmatpush3.bf16.msra.mxu1 %v10928_v29  ;;  %v13034_v3 = vpop.f32.mrf.mxu0  ;;  %10384 = vmatprep.subr.bf16.mxu0 %v10929_v54  ;;  %v3586_v29 = vadd.f32 %v12792_v20, %v3284_v47  ;;  %v3584_v20 = vadd.f32 %v12797_v63, %v3282_v35 }
 0x1e8   : > { %v13045_v33 = vpop.f32.mrf.mxu1  ;;  %10404 = vmatprep.subr.bf16.mxu1 %v10930_v39  ;;  %v7289_v63 = vsel %vm307_vm0, %v7284_v15, %v13053_v16  ;;  %v4021_v0 = vadd.f32 %v12932_v7, %v3785_v56  ;;  %v10936_v7 = vld [vmem:[%s13600_s1 + $0xe8] sm:$0xff]  }
 0x1e9   : > { %v9965_v45 = vpop.f32.mrf.mxu0  ;;  %v3788_v5 = vadd.f32 %v12937_v25, %v3586_v29  ;;  %v3288_v25 = vadd.f32 %v12827_v34, %v12672_v41  ;;  %v3786_v60 = vadd.f32 %v12942_v48, %v3584_v20  ;;  %v3286_v41 = vadd.f32 %v12837_v10, %v12690_v24 }
 0x1ea   : > { %v9997_v26 = vpop.f32.mrf.mxu1  ;;  %10385 = vmatpush3.bf16.msra.mxu0 %v10929_v54  ;;  %v3589_v54 = vadd.f32 %v12805_v21, %v3287_v2  ;;  %v3587_v21 = vadd.f32 %v12822_v51, %v3285_v36  ;;  %v10937_v51 = vld [vmem:[%s13600_s1 + $0x128] sm:$0xff]   ;;  %v3291_v10 = vadd.f32 %v12849_v55, %v12697_v8  ;;  %v3289_v55 = vadd.f32 %v12858_v53, %v12708_v30  ;;  %v10938_v45 = vld [vmem:[%s13600_s1 + $0xe0] sm:$0xff]  }
 0x1eb   : > { %10405 = vmatpush3.bf16.msra.mxu1 %v10930_v39  ;;  %v13059_v43 = vpop.f32.mrf.mxu0  ;;  %10410 = vmatprep.subr.bf16.mxu0 %v10932_v17  ;;  %v4024_v34 = vadd.f32 %v12939_v49, %v3788_v5  ;;  %v3590_v24 = vadd.f32 %v12830_v59, %v3288_v25  ;;  %v3588_v8 = vadd.f32 %v12843_v44, %v3286_v41  ;;  %v10939_v30 = vld [vmem:[%s13600_s1 + $0x120] sm:$0xff]   ;;  %v13681_v25 = vld [vmem:[#allocation19_spill] sm:$0xff] }
 0x1ec   : > { %v13066_v52 = vpop.f32.mrf.mxu1  ;;  %10430 = vmatprep.subr.bf16.mxu1 %v10933_v22  ;;  %v3791_v48 = vadd.f32 %v12953_v61, %v3589_v54  ;;  %v3789_v49 = vadd.f32 %v12958_v14, %v3587_v21  ;;  %v4022_v61 = vadd.f32 %v12948_v32, %v3786_v60  ;;  %v3593_v53 = vadd.f32 %v12853_v12, %v3291_v10  ;;  %v13682_v12 = vld [vmem:[#allocation8_spill] sm:$0xff] }
 0x1ed   : > { %v10016_v42 = vpop.f32.mrf.mxu0  ;;  %10387 = vmatmul.mubr.bf16.vlgmr.msra.gmra.mxu0 %v8774_v28  ;;  %v3792_v14 = vadd.f32 %v12969_v19, %v3590_v24  ;;  %v3292_v19 = vadd.f32 %v12868_v9, %v12714_v57  ;;  %v3591_v54 = vadd.f32 %v12863_v4, %v3289_v55  ;;  %v13685_v21 = vld [vmem:[#allocation20_spill] sm:$0xff] }
 0x1ee   : > { %v4325_v39 = vadd.f32 %v10016_v42, %v4023_v13  ;;  %v10048_v47 = vpop.f32.mrf.mxu1  ;;  %10407 = vmatmul.mubr.bf16.vlgmr.msra.gmra.mxu1 %v13680_v11  ;;  %10411 = vmatpush3.bf16.msra.mxu0 %v10932_v17  ;;  %v4027_v15 = vadd.f32 %v12955_v6, %v3791_v48  ;;  %v4025_v5 = vadd.f32 %v12964_v50, %v3789_v49  ;;  %v13684_v50 = vld [vmem:[#allocation12_spill] sm:$0xff]  ;;  %v10941_v11 = vld [vmem:[%s13600_s1 + $0x118] sm:$0xff]   ;;  %v13688_v48 = vld [vmem:[#allocation14_spill] sm:$0xff] }
 0x1ef   : > { %10431 = vmatpush3.bf16.msra.mxu1 %v10933_v22  ;;  %v4261_v38 = vpop.f32.mrf.mxu0  ;;  %10412 = vmatprep.subr.bf16.mxu0 %v10934_v18  ;;  %v3790_v6 = vadd.f32 %v12978_v37, %v3588_v8  ;;  %v3290_v42 = vadd.f32 %v13682_v12, %v13681_v25  ;;  %v10940_v37 = vld [vmem:[%s13600_s1 + $0xd8] sm:$0xff]   ;;  %v3594_v41 = vadd.f32 %v13685_v21, %v3292_v19  ;;  %v13693_v8 = vld [vmem:[#allocation16_spill] sm:$0xff] }
 0x1f0   : > { %v4527_v35 = vadd.f32 %v10048_v47, %v4325_v39  ;;  %v4323_v31 = vadd.f32 %v4261_v38, %v4021_v0  ;;  %v4463_v28 = vpop.f32.mrf.mxu1  ;;  %10432 = vmatprep.subr.bf16.mxu1 %v10935_v27  ;;  %10426 = vmatprep.mubr.bf16.mxu0 %v10948_v46  ;;  %v3795_v0 = vadd.f32 %v13684_v50, %v3593_v53  ;;  %v13687_v38 = vld [vmem:[#allocation11_spill] sm:$0xff]  ;;  %v13695_v53 = vld [vmem:[#allocation22_spill] sm:$0xff]  ;;  %v13698_v12 = vld [vmem:[#allocation4_spill] sm:$0xff] }
 0x1f1   : > { %v10017_v17 = vpop.f32.mrf.mxu0  ;;  %10446 = vmatprep.mubr.bf16.mxu1 %v7289_v63  ;;  %v13683_v63 = vld [vmem:[#allocation21_spill] sm:$0xff]  ;;  %v3796_v55 = vadd.f32 %v13693_v8, %v3594_v41  ;;  %v13701_v50 = vld [vmem:[#allocation6_spill] sm:$0xff]  ;;  %v7290_v8 = vshrl.u32 %v13007_v40, 16 }
 0x1f2   : > { %v4542_v22 = vadd.f32 %v13100_v58, %v4527_v35  ;;  %v4525_v29 = vadd.f32 %v4463_v28, %v4323_v31  ;;  %v4326_v2 = vadd.f32 %v10017_v17, %v4024_v34  ;;  %v10049_v59 = vpop.f32.mrf.mxu1  ;;  %10413 = vmatpush3.bf16.msra.mxu0 %v10934_v18  ;;  %v4028_v57 = vadd.f32 %v13683_v63, %v3792_v14  ;;  %v13686_v34 = vld [vmem:[#allocation7_spill] sm:$0xff]  ;;  %v13699_v63 = vld [vmem:[#allocation9_spill] sm:$0xff] }
 0x1f3   : > { %10433 = vmatpush3.bf16.msra.mxu1 %v10935_v27  ;;  %v4264_v32 = vpop.f32.mrf.mxu0  ;;  %10414 = vmatprep.subr.bf16.mxu0 %v10936_v7  ;;  %v3793_v35 = vadd.f32 %v13688_v48, %v3591_v54  ;;  %v13689_v28 = vld [vmem:[#allocation15_spill] sm:$0xff] }
 0x1f4   : > { %4557 = vst [vmem:[%s12365_s4 + $0x88] sm:$0xff] %v4542_v22  ;;  %v4540_v56 = vadd.f32 %v13100_v58, %v4525_v29  ;;  %v4528_v26 = vadd.f32 %v10049_v59, %v4326_v2  ;;  %v4324_v44 = vadd.f32 %v4264_v32, %v4022_v61  ;;  %v4466_v36 = vpop.f32.mrf.mxu1  ;;  %10434 = vmatprep.subr.bf16.mxu1 %v10937_v51  ;;  %v13690_v61 = vld [vmem:[#allocation3_spill] sm:$0xff]  ;;  %v13691_v29 = vld [vmem:[#allocation2_spill] sm:$0xff]  ;;  %v10942_v32 = vld [vmem:[%s13600_s1 + $0xd0] sm:$0xff]  }
 0x1f5   : > { %v10020_v18 = vpop.f32.mrf.mxu0  ;;  %v3592_v22 = vadd.f32 %v13690_v61, %v3290_v42  ;;  %v13692_v2 = vld [vmem:[#allocation10_spill] sm:$0xff] }
 0x1f6   : > { %4555 = vst [vmem:[%s12365_s4 + $0x78] sm:$0xff] %v4540_v56  ;;  %v4543_v20 = vadd.f32 %v13100_v58, %v4528_v26  ;;  %v4526_v13 = vadd.f32 %v4466_v36, %v4324_v44  ;;  %v4329_v27 = vadd.f32 %v10020_v18, %v4027_v15  ;;  %v10052_v46 = vpop.f32.mrf.mxu1  ;;  %10415 = vmatpush3.bf16.msra.mxu0 %v10936_v7  ;;  %v13694_v15 = vld [vmem:[#allocation23_spill] sm:$0xff] }
 0x1f7   : > { %10435 = vmatpush3.bf16.msra.mxu1 %v10937_v51  ;;  %v4277_v9 = vpop.f32.mrf.mxu0  ;;  %10416 = vmatprep.subr.bf16.mxu0 %v10938_v45  ;;  %v3295_v7 = vadd.f32 %v13687_v38, %v13686_v34  ;;  %v4026_v51 = vadd.f32 %v13689_v28, %v3790_v6  ;;  %v3293_v59 = vadd.f32 %v13692_v2, %v13691_v29  ;;  %v7394_v28 = vld [vmem:[%s11090_s16 + $0xc0] sm:$0xe] }
 0x1f8   : > { %4558 = vst [vmem:[%s12365_s4 + $0x90] sm:$0xff] %v4543_v20  ;;  %v4541_v60 = vadd.f32 %v13100_v58, %v4526_v13  ;;  %v4531_v39 = vadd.f32 %v10052_v46, %v4329_v27  ;;  %v4327_v4 = vadd.f32 %v4277_v9, %v4025_v5  ;;  %v4479_v47 = vpop.f32.mrf.mxu1  ;;  %10436 = vmatprep.subr.bf16.mxu1 %v10939_v30  ;;  %v13696_v5 = vld [vmem:[#allocation25_spill] sm:$0xff]  ;;  %v10947_v29 = vld [vmem:[%s13600_s1 + $0x100] sm:$0xff]  }
 0x1f9   : > { %v10021_v31 = vpop.f32.mrf.mxu0  ;;  %v4031_v56 = vadd.f32 %v13694_v15, %v3795_v0  ;;  %v3597_v19 = vadd.f32 %v13695_v53, %v3295_v7  ;;  %v4029_v18 = vadd.f32 %v13696_v5, %v3793_v35  ;;  %v13697_v20 = vld [vmem:[#allocation17_spill] sm:$0xff]  ;;  %v3595_v42 = vadd.f32 %v13698_v12, %v3293_v59  ;;  %v10951_v5 = vld [vmem:[%s11090_s16 + $0xc8] ss:$0 sps:$4 sm:$0xff]   ;;  %v10954_v12 = vld [vmem:[%s13600_s1 + $0x170] sm:$0xff]  }
 0x1fa   : > { %4556 = vst [vmem:[%s12365_s4 + $0x80] sm:$0xff] %v4541_v60  ;;  %v4546_v24 = vadd.f32 %v13100_v58, %v4531_v39  ;;  %v4529_v10 = vadd.f32 %v4479_v47, %v4327_v4  ;;  %v4330_v49 = vadd.f32 %v10021_v31, %v4028_v57  ;;  %v10053_v17 = vpop.f32.mrf.mxu1  ;;  %10417 = vmatpush3.bf16.msra.mxu0 %v10938_v45  ;;  %v13700_v57 = vld [vmem:[#allocation13_spill] sm:$0xff]  ;;  %v10944_v39 = vld [vmem:[%s13600_s1 + $0xc8] sm:$0xff]  }
 0x1fb   : > { %10437 = vmatpush3.bf16.msra.mxu1 %v10939_v30  ;;  %v4280_v14 = vpop.f32.mrf.mxu0  ;;  %10418 = vmatprep.subr.bf16.mxu0 %v10940_v37  ;;  %v10943_v30 = vld [vmem:[%s13600_s1 + $0x110] sm:$0xff]   ;;  %v3794_v13 = vadd.f32 %v13697_v20, %v3592_v22  ;;  %v3294_v9 = vadd.f32 %v13700_v57, %v13699_v63  ;;  %v4032_v0 = vadd.f32 %v13701_v50, %v3796_v55  ;;  %v13703_v55 = vld [vmem:[#allocation5_spill] sm:$0xff] }
 0x1fc   : > { %4561 = vst [vmem:[%s12365_s4 + $0xa8] sm:$0xff] %v4546_v24  ;;  %v4544_v45 = vadd.f32 %v13100_v58, %v4529_v10  ;;  %v4532_v26 = vadd.f32 %v10053_v17, %v4330_v49  ;;  %v4328_v44 = vadd.f32 %v4280_v14, %v4026_v51  ;;  %v4482_v36 = vpop.f32.mrf.mxu1  ;;  %10438 = vmatprep.subr.bf16.mxu1 %v10941_v11  ;;  %v13702_v51 = vld [vmem:[#allocation24_spill] sm:$0xff]  ;;  %v10953_v53 = vld [vmem:[%s13600_s1 + $0x1b8] sm:$0xff]  }
 0x1fd   : > { %v10024_v6 = vpop.f32.mrf.mxu0  ;;  %v3799_v4 = vadd.f32 %v13027_v1, %v3597_v19  ;;  %v3797_v34 = vadd.f32 %v13034_v3, %v3595_v42  ;;  %v4030_v7 = vadd.f32 %v13020_v23, %v3794_v13  ;;  %v3596_v24 = vadd.f32 %v13702_v51, %v3294_v9  ;;  %v10946_v3 = vld [vmem:[%s13600_s1 + $0xc0] sm:$0xff]   ;;  %v10955_v57 = vld [vmem:[%s13600_s1 + $0x1b0] sm:$0xff]  }
 0x1fe   : > { %4559 = vst [vmem:[%s12365_s4 + $0x98] sm:$0xff] %v4544_v45  ;;  %v4547_v27 = vadd.f32 %v13100_v58, %v4532_v26  ;;  %v4530_v46 = vadd.f32 %v4482_v36, %v4328_v44  ;;  %v4333_v54 = vadd.f32 %v10024_v6, %v4031_v56  ;;  %v10056_v25 = vpop.f32.mrf.mxu1  ;;  %10419 = vmatpush3.bf16.msra.mxu0 %v10940_v37  ;;  %v7415_v6 = vrot.slane %v13007_v40, 1  ;;  %v10969_v50 = vld [vmem:[%s11090_s16 + $0xcc] sm:$0xff]  }
 0x1ff   : > { %10439 = vmatpush3.bf16.msra.mxu1 %v10941_v11  ;;  %v4293_v60 = vpop.f32.mrf.mxu0  ;;  %10420 = vmatprep.subr.bf16.mxu0 %v10942_v32  ;;  %v10945_v11 = vld [vmem:[%s13600_s1 + $0x108] sm:$0xff]   ;;  %v4035_v23 = vadd.f32 %v13031_v62, %v3799_v4  ;;  %v4033_v2 = vadd.f32 %v13045_v33, %v3797_v34  ;;  %v8876_v14 = vcombine.low %v7394_v28, %v13703_v55  ;;  %v10952_v33 = vld [vmem:[%s13600_s1 + $0x178] sm:$0xff]  }
 0x200   : > { %4562 = vst [vmem:[%s12365_s4 + $0xb0] sm:$0xff] %v4547_v27  ;;  %v4545_v37 = vadd.f32 %v13100_v58, %v4530_v46  ;;  %v4535_v47 = vadd.f32 %v10056_v25, %v4333_v54  ;;  %v4331_v21 = vadd.f32 %v4293_v60, %v4029_v18  ;;  %v4495_v41 = vpop.f32.mrf.mxu1  ;;  %10440 = vmatprep.subr.bf16.mxu1 %v10943_v30  ;;  %v10975_v40 = vld [vmem:[%s13600_s1 + $0x1e8] sm:$0xff]  }
 0x201   : > { %v10025_v38 = vpop.f32.mrf.mxu0  ;;  %v3798_v62 = vadd.f32 %v13059_v43, %v3596_v24  ;;  %v7414_v18 = vrot.slane %v8876_v14, 1  ;;  %v7292_v54 = vor.u32 %v7290_v8, %v13053_v16  ;;  %v10962_v14 = vld [vmem:[%s13600_s1 + $0x150] sm:$0xff]  }
 0x202   : > { %4560 = vst [vmem:[%s12365_s4 + $0xa0] sm:$0xff] %v4545_v37  ;;  %v4550_v1 = vadd.f32 %v13100_v58, %v4535_v47  ;;  %v4533_v48 = vadd.f32 %v4495_v41, %v4331_v21  ;;  %v4334_v35 = vadd.f32 %v10025_v38, %v4032_v0  ;;  %v10057_v31 = vpop.f32.mrf.mxu1  ;;  %10421 = vmatpush3.bf16.msra.mxu0 %v10942_v32  ;;  %v10956_v37 = vld [vmem:[%s13600_s1 + $0x168] sm:$0xff]  }
 0x203   : > { %10441 = vmatpush3.bf16.msra.mxu1 %v10943_v30  ;;  %v4296_v10 = vpop.f32.mrf.mxu0  ;;  %10422 = vmatprep.subr.bf16.mxu0 %v10944_v39  ;;  %v4034_v20 = vadd.f32 %v13066_v52, %v3798_v62  ;;  %v7416_v16 = vsel %vm697_vm1, %v7414_v18, %v7415_v6  ;;  %v10957_v41 = vld [vmem:[%s13600_s1 + $0x1a8] sm:$0xff]  }
 0x204   : > { %4565 = vst [vmem:[%s12365_s4 + $0xc8] sm:$0xff] %v4550_v1  ;;  %v4548_v49 = vadd.f32 %v13100_v58, %v4533_v48  ;;  %v4536_v17 = vadd.f32 %v10057_v31, %v4334_v35  ;;  %v4332_v61 = vadd.f32 %v4296_v10, %v4030_v7  ;;  %v4498_v22 = vpop.f32.mrf.mxu1  ;;  %10442 = vmatprep.subr.bf16.mxu1 %v10945_v11  ;;  %v10958_v48 = vld [vmem:[%s13600_s1 + $0x160] sm:$0xff]  }
 0x205   : > { %v10028_v59 = vpop.f32.mrf.mxu0  ;;  %v10959_v31 = vld [vmem:[%s13600_s1 + $0x1a0] sm:$0xff]  }
 0x206   : > { %4563 = vst [vmem:[%s12365_s4 + $0xb8] sm:$0xff] %v4548_v49  ;;  %v4551_v32 = vadd.f32 %v13100_v58, %v4536_v17  ;;  %v4534_v15 = vadd.f32 %v4498_v22, %v4332_v61  ;;  %v4337_v56 = vadd.f32 %v10028_v59, %v4035_v23  ;;  %v10060_v45 = vpop.f32.mrf.mxu1  ;;  %10423 = vmatpush3.bf16.msra.mxu0 %v10944_v39  ;;  %v10960_v23 = vld [vmem:[%s13600_s1 + $0x158] sm:$0xff]   ;;  %v7647_v59 = vld [vmem:[%s11090_s16 + $0xd0] sm:$0xf] }
 0x207   : > { %10443 = vmatpush3.bf16.msra.mxu1 %v10945_v11  ;;  %v4309_v26 = vpop.f32.mrf.mxu0  ;;  %10424 = vmatprep.subr.bf16.mxu0 %v10946_v3  ;;  %v10961_v17 = vld [vmem:[%s13600_s1 + $0x198] sm:$0xff]  }
 0x208   : > { %4566 = vst [vmem:[%s12365_s4 + $0xd0] sm:$0xff] %v4551_v32  ;;  %v4549_v44 = vadd.f32 %v13100_v58, %v4534_v15  ;;  %v4539_v43 = vadd.f32 %v10060_v45, %v4337_v56  ;;  %v4335_v36 = vadd.f32 %v4309_v26, %v4033_v2  ;;  %v4511_v30 = vpop.f32.mrf.mxu1  ;;  %10444 = vmatprep.subr.bf16.mxu1 %v10947_v29  ;;  %v7646_v2 = vld [vmem:[%s11090_s16 + $0xcc] sm:$0xf]  ;;  %v10963_v32 = vld [vmem:[%s13600_s1 + $0x190] sm:$0xff]  }
 0x209   : > { %v10029_v19 = vpop.f32.mrf.mxu0  ;;  %v8927_v45 = vcombine.low %v7646_v2, %v7647_v59 }
 0x20a   : > { %4564 = vst [vmem:[%s12365_s4 + $0xc0] sm:$0xff] %v4549_v44  ;;  %v4554_v13 = vadd.f32 %v13100_v58, %v4539_v43  ;;  %v4537_v27 = vadd.f32 %v4511_v30, %v4335_v36  ;;  %v10061_v46 = vpop.f32.mrf.mxu1  ;;  %10425 = vmatpush3.bf16.msra.mxu0 %v10946_v3  ;;  %v10964_v43 = vld [vmem:[%s13600_s1 + $0x148] sm:$0xff]  }
 0x20b   : > { %10445 = vmatpush3.bf16.msra.mxu1 %v10947_v29  ;;  %v4312_v25 = vpop.f32.mrf.mxu0  ;;  %10450 = vmatprep.subr.bf16.mxu0 %v10952_v33  ;;  %v10965_v30 = vld [vmem:[%s13600_s1 + $0x188] sm:$0xff]   ;;  %v7679_v18 = vshll.u32 %v8927_v45, 16  ;;  %v10966_v46 = vld [vmem:[%s13600_s1 + $0x140] sm:$0xff]  }
 0x20c   : > { %4569 = vst [vmem:[%s12365_s4 + $0xe8] sm:$0xff] %v4554_v13  ;;  %v4552_v52 = vadd.f32 %v13100_v58, %v4537_v27  ;;  %v4336_v42 = vadd.f32 %v4312_v25, %v4034_v20  ;;  %v4514_v63 = vpop.f32.mrf.mxu1  ;;  %10470 = vmatprep.subr.bf16.mxu1 %v10953_v53 }
 0x20d   : > { %v10080_v9 = vpop.f32.mrf.mxu0  ;;  %10427 = vmatmul.mubr.bf16.vlgmr.msra.gmra.mxu0 %v10951_v5  ;;  %v13277_v5 = vld [vmem:[%s11090_s16 + $0xd4] sm:$0x1f]  }
 0x20e   : > { %4567 = vst [vmem:[%s12365_s4 + $0xd8] sm:$0xff] %v4552_v52  ;;  %v4538_v0 = vadd.f32 %v4514_v63, %v4336_v42  ;;  %v10112_v60 = vpop.f32.mrf.mxu1  ;;  %10447 = vmatmul.mubr.bf16.vlgmr.msra.gmra.mxu1 %v7292_v54  ;;  %10451 = vmatpush3.bf16.msra.mxu0 %v10952_v33  ;;  %v7792_v54 = vld [vmem:[%s11090_s16 + $0xcc] sm:$0xe]  ;;  %v7677_v63 = vshrl.u32 %v8927_v45, 16 }
 0x20f   : > { %v13222_v39 = vadd.f32 %v10112_v60, %v10080_v9  ;;  %10471 = vmatpush3.bf16.msra.mxu1 %v10953_v53  ;;  %v4811_v4 = vpop.f32.mrf.mxu0  ;;  %10452 = vmatprep.subr.bf16.mxu0 %v10954_v12  ;;  %v7684_v9 = vshll.u32 %v13277_v5, 16 }
 0x210   : > { %v4553_v47 = vadd.f32 %v13100_v58, %v4538_v0  ;;  %v4964_v21 = vpop.f32.mrf.mxu1  ;;  %10472 = vmatprep.subr.bf16.mxu1 %v10955_v57  ;;  %10466 = vmatprep.mubr.bf16.mxu0 %v7416_v16 }
 0x211   : > { %v13231_v11 = vadd.f32 %v4964_v21, %v4811_v4  ;;  %v10081_v34 = vpop.f32.mrf.mxu0  ;;  %10486 = vmatprep.mubr.bf16.mxu1 %v10969_v50  ;;  %v8953_v50 = vcombine.low %v7792_v54, %v7647_v59  ;;  %v10971_v4 = vld [vmem:[%s13600_s1 + $0x1f8] sm:$0xff]  }
 0x212   : > { %4568 = vst [vmem:[%s12365_s4 + $0xe0] sm:$0xff] %v4553_v47  ;;  %v10113_v38 = vpop.f32.mrf.mxu1  ;;  %10453 = vmatpush3.bf16.msra.mxu0 %v10954_v12  ;;  %v10967_v12 = vld [vmem:[%s13600_s1 + $0x180] sm:$0xff]   ;;  %v10972_v47 = vld [vmem:[%s13600_s1 + $0x238] sm:$0xff]  }
 0x213   : > { %v13234_v7 = vadd.f32 %v10113_v38, %v10081_v34  ;;  %10473 = vmatpush3.bf16.msra.mxu1 %v10955_v57  ;;  %v4814_v1 = vpop.f32.mrf.mxu0  ;;  %10454 = vmatprep.subr.bf16.mxu0 %v10956_v37  ;;  %v7681_v57 = vrot.slane %v7679_v18, 1  ;;  %v13301_v38 = vrot.slane %v7684_v9, 1 }
 0x214   : > { %v4967_v35 = vpop.f32.mrf.mxu1  ;;  %10474 = vmatprep.subr.bf16.mxu1 %v10957_v41 }
 0x215   : > { %v13242_v28 = vadd.f32 %v4967_v35, %v4814_v1  ;;  %v10084_v51 = vpop.f32.mrf.mxu0  ;;  %v7682_v34 = vor.u32 %v7681_v57, %v7677_v63  ;;  %v7812_v35 = vrot.slane %v8953_v50, 1 }
 0x216   : > { %v10116_v24 = vpop.f32.mrf.mxu1  ;;  %10455 = vmatpush3.bf16.msra.mxu0 %v10956_v37 }
 0x217   : > { %v13244_v10 = vadd.f32 %v10116_v24, %v10084_v51  ;;  %10475 = vmatpush3.bf16.msra.mxu1 %v10957_v41  ;;  %v4827_v3 = vpop.f32.mrf.mxu0  ;;  %10456 = vmatprep.subr.bf16.mxu0 %v10958_v48  ;;  %v10973_v24 = vld [vmem:[%s13600_s1 + $0x1f0] sm:$0xff]  }
 0x218   : > { %v4980_v49 = vpop.f32.mrf.mxu1  ;;  %10476 = vmatprep.subr.bf16.mxu1 %v10959_v31 }
 0x219   : > { %v13252_v61 = vadd.f32 %v4980_v49, %v4827_v3  ;;  %v10085_v22 = vpop.f32.mrf.mxu0 }
 0x21a   : > { %v10117_v29 = vpop.f32.mrf.mxu1  ;;  %10457 = vmatpush3.bf16.msra.mxu0 %v10958_v48  ;;  %v10970_v48 = vld [vmem:[%s11090_s16 + $0xd4] ss:$0 sps:$4 sm:$0xff]  }
 0x21b   : > { %v13256_v8 = vadd.f32 %v10117_v29, %v10085_v22  ;;  %10477 = vmatpush3.bf16.msra.mxu1 %v10959_v31  ;;  %v4830_v55 = vpop.f32.mrf.mxu0  ;;  %10458 = vmatprep.subr.bf16.mxu0 %v10960_v23  ;;  %v7813_v31 = vrot.slane %v13277_v5, 1  ;;  %v7687_v22 = vsel %vm307_vm0, %v7682_v34, %v13301_v38 }
 0x21c   : > { %v4983_v62 = vpop.f32.mrf.mxu1  ;;  %10478 = vmatprep.subr.bf16.mxu1 %v10961_v17 }
 0x21d   : > { %v13264_v15 = vadd.f32 %v4983_v62, %v4830_v55  ;;  %v10088_v56 = vpop.f32.mrf.mxu0  ;;  %v7814_v59 = vsel %vm697_vm1, %v7812_v35, %v7813_v31 }
 0x21e   : > { %v10120_v26 = vpop.f32.mrf.mxu1  ;;  %10459 = vmatpush3.bf16.msra.mxu0 %v10960_v23  ;;  %v10974_v23 = vld [vmem:[%s13600_s1 + $0x230] sm:$0xff]  }
 0x21f   : > { %v13266_v33 = vadd.f32 %v10120_v26, %v10088_v56  ;;  %10479 = vmatpush3.bf16.msra.mxu1 %v10961_v17  ;;  %v4843_v44 = vpop.f32.mrf.mxu0  ;;  %10460 = vmatprep.subr.bf16.mxu0 %v10962_v14 }
 0x220   : > { %v4996_v36 = vpop.f32.mrf.mxu1  ;;  %10480 = vmatprep.subr.bf16.mxu1 %v10963_v32 }
 0x221   : > { %v13274_v53 = vadd.f32 %v4996_v36, %v4843_v44  ;;  %v10089_v19 = vpop.f32.mrf.mxu0 }
 0x222   : > { %v10121_v20 = vpop.f32.mrf.mxu1  ;;  %10461 = vmatpush3.bf16.msra.mxu0 %v10962_v14 }
 0x223   : > { %v13279_v13 = vadd.f32 %v10121_v20, %v10089_v19  ;;  %10481 = vmatpush3.bf16.msra.mxu1 %v10963_v32  ;;  %v4846_v27 = vpop.f32.mrf.mxu0  ;;  %10462 = vmatprep.subr.bf16.mxu0 %v10964_v43  ;;  %v10978_v19 = vld [vmem:[%s13600_s1 + $0x220] sm:$0xff]  }
 0x224   : > { %v4999_v25 = vpop.f32.mrf.mxu1  ;;  %10482 = vmatprep.subr.bf16.mxu1 %v10965_v30 }
 0x225   : > { %v13288_v52 = vadd.f32 %v4999_v25, %v4846_v27  ;;  %v10092_v42 = vpop.f32.mrf.mxu0 }
 0x226   : > { %v10124_v16 = vpop.f32.mrf.mxu1  ;;  %10463 = vmatpush3.bf16.msra.mxu0 %v10964_v43 }
 0x227   : > { %v13291_v0 = vadd.f32 %v10124_v16, %v10092_v42  ;;  %10483 = vmatpush3.bf16.msra.mxu1 %v10965_v30  ;;  %v4859_v60 = vpop.f32.mrf.mxu0  ;;  %10464 = vmatprep.subr.bf16.mxu0 %v10966_v46  ;;  %v10980_v42 = vld [vmem:[%s13600_s1 + $0x218] sm:$0xff]  }
 0x228   : > { %v5012_v37 = vpop.f32.mrf.mxu1  ;;  %10484 = vmatprep.subr.bf16.mxu1 %v10967_v12 }
 0x229   : > { %v13299_v21 = vadd.f32 %v5012_v37, %v4859_v60  ;;  %v10093_v41 = vpop.f32.mrf.mxu0  ;;  %v10982_v37 = vld [vmem:[%s13600_s1 + $0x210] sm:$0xff]  }
 0x22a   : > { %v10125_v1 = vpop.f32.mrf.mxu1  ;;  %10465 = vmatpush3.bf16.msra.mxu0 %v10966_v46 }
 0x22b   : > { %10485 = vmatpush3.bf16.msra.mxu1 %v10967_v12  ;;  %v4862_v51 = vpop.f32.mrf.mxu0  ;;  %10490 = vmatprep.subr.bf16.mxu0 %v10971_v4 }
 0x22c   : > { %v5015_v3 = vpop.f32.mrf.mxu1  ;;  %10510 = vmatprep.subr.bf16.mxu1 %v10972_v47 }
 0x22d   : > { %v13311_v49 = vadd.f32 %v5015_v3, %v4862_v51  ;;  %v10144_v17 = vpop.f32.mrf.mxu0  ;;  %10467 = vmatmul.mubr.bf16.vlgmr.msra.gmra.mxu0 %v7415_v6 }
 0x22e   : > { %v5215_v29 = vadd.f32 %v10144_v17, %v13222_v39  ;;  %v10176_v2 = vpop.f32.mrf.mxu1  ;;  %10487 = vmatmul.mubr.bf16.vlgmr.msra.gmra.mxu1 %v10970_v48  ;;  %10491 = vmatpush3.bf16.msra.mxu0 %v10971_v4  ;;  %v10976_v39 = vld [vmem:[%s13600_s1 + $0x228] sm:$0xff]  }
 0x22f   : > { %10511 = vmatpush3.bf16.msra.mxu1 %v10972_v47  ;;  %v5151_v55 = vpop.f32.mrf.mxu0  ;;  %10492 = vmatprep.subr.bf16.mxu0 %v10973_v24 }
 0x230   : > { %v13324_v6 = vadd.f32 %v10176_v2, %v5215_v29  ;;  %v5213_v14 = vadd.f32 %v5151_v55, %v13231_v11  ;;  %v5387_v62 = vpop.f32.mrf.mxu1  ;;  %10512 = vmatprep.subr.bf16.mxu1 %v10974_v23  ;;  %10506 = vmatprep.mubr.bf16.mxu0 %v7687_v22  ;;  %v10977_v11 = vld [vmem:[%s13600_s1 + $0x1e0] sm:$0xff]  }
 0x231   : > { %v10145_v32 = vpop.f32.mrf.mxu0  ;;  %10526 = vmatprep.mubr.bf16.mxu1 %v7814_v59  ;;  %v10986_v55 = vld [vmem:[%s13600_s1 + $0x200] sm:$0xff]  }
 0x232   : > { %v13330_v56 = vadd.f32 %v5387_v62, %v5213_v14  ;;  %v5216_v45 = vadd.f32 %v10145_v32, %v13234_v7  ;;  %v10177_v26 = vpop.f32.mrf.mxu1  ;;  %10493 = vmatpush3.bf16.msra.mxu0 %v10973_v24  ;;  %v10984_v24 = vld [vmem:[%s13600_s1 + $0x208] sm:$0xff]  }
 0x233   : > { %10513 = vmatpush3.bf16.msra.mxu1 %v10974_v23  ;;  %v5154_v44 = vpop.f32.mrf.mxu0  ;;  %10494 = vmatprep.subr.bf16.mxu0 %v10975_v40 }
 0x234   : > { %v13336_v43 = vadd.f32 %v10177_v26, %v5216_v45  ;;  %v5214_v36 = vadd.f32 %v5154_v44, %v13242_v28  ;;  %v5390_v30 = vpop.f32.mrf.mxu1  ;;  %10514 = vmatprep.subr.bf16.mxu1 %v10976_v39  ;;  %v10979_v28 = vld [vmem:[%s13600_s1 + $0x1d8] sm:$0xff]  }
 0x235   : > { %v10148_v7 = vpop.f32.mrf.mxu0 }
 0x236   : > { %v13342_v18 = vadd.f32 %v5390_v30, %v5214_v36  ;;  %v5219_v20 = vadd.f32 %v10148_v7, %v13244_v10  ;;  %v10180_v27 = vpop.f32.mrf.mxu1  ;;  %10495 = vmatpush3.bf16.msra.mxu0 %v10975_v40  ;;  %v7688_v40 = vshrl.u32 %v13277_v5, 16 }
 0x237   : > { %10515 = vmatpush3.bf16.msra.mxu1 %v10976_v39  ;;  %v5167_v46 = vpop.f32.mrf.mxu0  ;;  %10496 = vmatprep.subr.bf16.mxu0 %v10977_v11 }
 0x238   : > { %v13348_v54 = vadd.f32 %v10180_v27, %v5219_v20  ;;  %v5217_v25 = vadd.f32 %v5167_v46, %v13252_v61  ;;  %v5403_v12 = vpop.f32.mrf.mxu1  ;;  %10516 = vmatprep.subr.bf16.mxu1 %v10978_v19  ;;  %v10981_v61 = vld [vmem:[%s13600_s1 + $0x1d0] sm:$0xff]  }
 0x239   : > { %v10149_v10 = vpop.f32.mrf.mxu0 }
 0x23a   : > { %v13354_v63 = vadd.f32 %v5403_v12, %v5217_v25  ;;  %v5220_v57 = vadd.f32 %v10149_v10, %v13256_v8  ;;  %v10181_v9 = vpop.f32.mrf.mxu1  ;;  %10497 = vmatpush3.bf16.msra.mxu0 %v10977_v11  ;;  %v7690_v11 = vor.u32 %v7688_v40, %v13301_v38 }
 0x23b   : > { %10517 = vmatpush3.bf16.msra.mxu1 %v10978_v19  ;;  %v5170_v16 = vpop.f32.mrf.mxu0  ;;  %10498 = vmatprep.subr.bf16.mxu0 %v10979_v28 }
 0x23c   : > { %v13360_v50 = vadd.f32 %v10181_v9, %v5220_v57  ;;  %v5218_v60 = vadd.f32 %v5170_v16, %v13264_v15  ;;  %v5406_v4 = vpop.f32.mrf.mxu1  ;;  %10518 = vmatprep.subr.bf16.mxu1 %v10980_v42  ;;  %v10983_v15 = vld [vmem:[%s13600_s1 + $0x1c8] sm:$0xff]  }
 0x23d   : > { %v10152_v8 = vpop.f32.mrf.mxu0 }
 0x23e   : > { %v13366_v47 = vadd.f32 %v5406_v4, %v5218_v60  ;;  %v5223_v41 = vadd.f32 %v10152_v8, %v13266_v33  ;;  %v10184_v34 = vpop.f32.mrf.mxu1  ;;  %10499 = vmatpush3.bf16.msra.mxu0 %v10979_v28 }
 0x23f   : > { %10519 = vmatpush3.bf16.msra.mxu1 %v10980_v42  ;;  %v5183_v1 = vpop.f32.mrf.mxu0  ;;  %10500 = vmatprep.subr.bf16.mxu0 %v10981_v61 }
 0x240   : > { %v13372_v48 = vadd.f32 %v10184_v34, %v5223_v41  ;;  %v5221_v35 = vadd.f32 %v5183_v1, %v13274_v53  ;;  %v5419_v51 = vpop.f32.mrf.mxu1  ;;  %10520 = vmatprep.subr.bf16.mxu1 %v10982_v37  ;;  %v10985_v53 = vld [vmem:[%s13600_s1 + $0x1c0] sm:$0xff]  }
 0x241   : > { %v10153_v33 = vpop.f32.mrf.mxu0 }
 0x242   : > { %v13378_v3 = vadd.f32 %v5419_v51, %v5221_v35  ;;  %v5224_v23 = vadd.f32 %v10153_v33, %v13279_v13  ;;  %v10185_v17 = vpop.f32.mrf.mxu1  ;;  %10501 = vmatpush3.bf16.msra.mxu0 %v10981_v61 }
 0x243   : > { %10521 = vmatpush3.bf16.msra.mxu1 %v10982_v37  ;;  %v5186_v22 = vpop.f32.mrf.mxu0  ;;  %10502 = vmatprep.subr.bf16.mxu0 %v10983_v15 }
 0x244   : > { %v13384_v29 = vadd.f32 %v10185_v17, %v5224_v23  ;;  %v5222_v2 = vadd.f32 %v5186_v22, %v13288_v52  ;;  %v5422_v59 = vpop.f32.mrf.mxu1  ;;  %10522 = vmatprep.subr.bf16.mxu1 %v10984_v24 }
 0x245   : > { %v10156_v13 = vpop.f32.mrf.mxu0 }
 0x246   : > { %v13391_v14 = vadd.f32 %v5422_v59, %v5222_v2  ;;  %v5227_v62 = vadd.f32 %v10156_v13, %v13291_v0  ;;  %v10188_v39 = vpop.f32.mrf.mxu1  ;;  %10503 = vmatpush3.bf16.msra.mxu0 %v10983_v15 }
 0x247   : > { %10523 = vmatpush3.bf16.msra.mxu1 %v10984_v24  ;;  %v5199_v32 = vpop.f32.mrf.mxu0  ;;  %10504 = vmatprep.subr.bf16.mxu0 %v10985_v53 }
 0x248   : > { %v13394_v45 = vadd.f32 %v10188_v39, %v5227_v62  ;;  %v5225_v52 = vadd.f32 %v5199_v32, %v13299_v21  ;;  %v5435_v26 = vpop.f32.mrf.mxu1  ;;  %10524 = vmatprep.subr.bf16.mxu1 %v10986_v55 }
 0x249   : > { %v10157_v44 = vpop.f32.mrf.mxu0 }
 0x24a   : > { %v13398_v36 = vadd.f32 %v5435_v26, %v5225_v52  ;;  %v10189_v30 = vpop.f32.mrf.mxu1  ;;  %10505 = vmatpush3.bf16.msra.mxu0 %v10985_v53 }
 0x24b   : > { %10525 = vmatpush3.bf16.msra.mxu1 %v10986_v55  ;;  %v5202_v0 = vpop.f32.mrf.mxu0 }
 0x24c   : > { %13704 = vst [vmem:[#allocation26_spill] sm:$0xff] %v13398_v36  ;;  %v5226_v19 = vadd.f32 %v5202_v0, %v13311_v49  ;;  %v5438_v7 = vpop.f32.mrf.mxu1 }
 0x24d   : > { %v10208_v20 = vpop.f32.mrf.mxu0  ;;  %10507 = vmatmul.mubr.bf16.vlgmr.msra.gmra.mxu0 %v7690_v11 }
 0x24e   : > { %v13401_v27 = vadd.f32 %v5438_v7, %v5226_v19  ;;  %v10240_v46 = vpop.f32.mrf.mxu1  ;;  %10527 = vmatmul.mubr.bf16.vlgmr.msra.gmra.mxu1 %v7813_v31 }
 0x24f   : > { %v5689_v21 = vpop.f32.mrf.mxu0 }
 0x250   : > { %13705 = vst [vmem:[#allocation27_spill] sm:$0xff] %v13401_v27  ;;  %v5891_v28 = vpop.f32.mrf.mxu1  ;;  %v5751_v36 = vadd.f32 %v5689_v21, %v13330_v56 }
 0x251   : > { %v10209_v38 = vpop.f32.mrf.mxu0 }
 0x252   : > { %v13405_v25 = vpop.f32.mrf.mxu1 }
 0x253   : > { %v5692_v12 = vpop.f32.mrf.mxu0 }
 0x254   : > { %v13407_v42 = vpop.f32.mrf.mxu1 }
 0x255   : > { %v10212_v10 = vpop.f32.mrf.mxu0 }
 0x256   : > { %v13409_v57 = vpop.f32.mrf.mxu1  ;;  %v5757_v21 = vadd.f32 %v10212_v10, %v13348_v54 }
 0x257   : > { %v5705_v49 = vpop.f32.mrf.mxu0 }
 0x258   : > { %v13411_v9 = vpop.f32.mrf.mxu1 }
 0x259   : > { %v13413_v16 = vpop.f32.mrf.mxu0 }
 0x25a   : > { %v13415_v61 = vpop.f32.mrf.mxu1 }
 0x25b   : > { %v13417_v5 = vpop.f32.mrf.mxu0 }
 0x25c   : > { %v13419_v31 = vpop.f32.mrf.mxu1 }
 0x25d   : > { %v13421_v60 = vpop.f32.mrf.mxu0 }
 0x25e   : > { %v13423_v4 = vpop.f32.mrf.mxu1 }
 0x25f   : > { %v13425_v37 = vpop.f32.mrf.mxu0 }
 0x260   : > { %v13427_v8 = vpop.f32.mrf.mxu1 }
 0x261   : > { %v13429_v41 = vpop.f32.mrf.mxu0 }
 0x262   : > { %v13431_v34 = vpop.f32.mrf.mxu1 }
 0x263   : > { %v13433_v1 = vpop.f32.mrf.mxu0 }
 0x264   : > { %v13435_v15 = vpop.f32.mrf.mxu1 }
 0x265   : > { %13706 = vst [vmem:[#allocation18_spill] sm:$0xff] %v13435_v15  ;;  %v13437_v35 = vpop.f32.mrf.mxu0 }
 0x266   : > { %13707 = vst [vmem:[#allocation19_spill] sm:$0xff] %v13437_v35  ;;  %v13439_v51 = vpop.f32.mrf.mxu1 }
 0x267   : > { %13708 = vst [vmem:[#allocation8_spill] sm:$0xff] %v13439_v51  ;;  %v13441_v24 = vpop.f32.mrf.mxu0 }
 0x268   : > { %13709 = vst [vmem:[#allocation21_spill] sm:$0xff] %v13441_v24  ;;  %v13443_v33 = vpop.f32.mrf.mxu1 }
 0x269   : > { %13710 = vst [vmem:[#allocation12_spill] sm:$0xff] %v13443_v33  ;;  %v10221_v23 = vpop.f32.mrf.mxu0  ;;  %v5753_v33 = vadd.f32 %v10208_v20, %v13324_v6  ;;  %v5752_v6 = vadd.f32 %v5692_v12, %v13342_v18  ;;  %v5758_v18 = vadd.f32 %v13413_v16, %v13360_v50 }
 0x26a   : > { %v10253_v17 = vpop.f32.mrf.mxu1 }
 0x26b   : > { %v13445_v22 = vpop.f32.mrf.mxu0  ;;  %v5955_v35 = vadd.f32 %v10240_v46, %v5753_v33  ;;  %v5755_v46 = vadd.f32 %v5705_v49, %v13354_v63 }
 0x26c   : > { %13711 = vst [vmem:[#allocation20_spill] sm:$0xff] %v13445_v22  ;;  %v13447_v53 = vpop.f32.mrf.mxu1 }
 0x26d   : > { %13712 = vst [vmem:[#allocation7_spill] sm:$0xff] %v13447_v53  ;;  %v10272_v2 = vpop.f32.mrf.mxu0  ;;  %v5957_v63 = vadd.f32 %v13411_v9, %v5755_v46 }
 0x26e   : > { %v10304_v59 = vpop.f32.mrf.mxu1  ;;  %v6191_v20 = vadd.f32 %v10272_v2, %v5955_v35 }
 0x26f   : > { %v6127_v55 = vpop.f32.mrf.mxu0 }
 0x270   : > { %v6429_v13 = vpop.f32.mrf.mxu1  ;;  %v6493_v33 = vadd.f32 %v10304_v59, %v6191_v20 }
 0x271   : > { %v10273_v40 = vpop.f32.mrf.mxu0 }
 0x272   : > { %v10305_v62 = vpop.f32.mrf.mxu1 }
 0x273   : > { %v6130_v39 = vpop.f32.mrf.mxu0 }
 0x274   : > { %v6432_v32 = vpop.f32.mrf.mxu1 }
 0x275   : > { %v10276_v52 = vpop.f32.mrf.mxu0 }
 0x276   : > { %v13449_v26 = vpop.f32.mrf.mxu1 }
 0x277   : > { %v6143_v44 = vpop.f32.mrf.mxu0 }
 0x278   : > { %v13451_v11 = vpop.f32.mrf.mxu1  ;;  %v6193_v9 = vadd.f32 %v6143_v44, %v5957_v63  ;;  %v5762_v44 = vadd.f32 %v13429_v41, %v13384_v29  ;;  %v5760_v29 = vadd.f32 %v13433_v1, %v13391_v14 }
 0x279   : > { %v10277_v30 = vpop.f32.mrf.mxu0 }
 0x27a   : > { %v13453_v0 = vpop.f32.mrf.mxu1  ;;  %v5964_v20 = vadd.f32 %v13431_v34, %v5762_v44 }
 0x27b   : > { %v13455_v19 = vpop.f32.mrf.mxu0 }
 0x27c   : > { %v13457_v7 = vpop.f32.mrf.mxu1 }
 0x27d   : > { %13713 = vst [vmem:[#allocation11_spill] sm:$0xff] %v13457_v7  ;;  %v13459_v23 = vpop.f32.mrf.mxu0 }
 0x27e   : > { %v13461_v17 = vpop.f32.mrf.mxu1 }
 0x27f   : > { %13714 = vst [vmem:[#allocation14_spill] sm:$0xff] %v13461_v17  ;;  %v13463_v53 = vpop.f32.mrf.mxu0  ;;  %v5754_v17 = vadd.f32 %v10209_v38, %v13336_v43  ;;  %v5954_v38 = vadd.f32 %v13407_v42, %v5752_v6  ;;  %v5756_v42 = vadd.f32 %v13417_v5, %v13366_v47 }
 0x280   : > { %13715 = vst [vmem:[#allocation15_spill] sm:$0xff] %v13463_v53  ;;  %v13465_v22 = vpop.f32.mrf.mxu1 }
 0x281   : > { %13716 = vst [vmem:[#allocation3_spill] sm:$0xff] %v13465_v22  ;;  %v13467_v27 = vpop.f32.mrf.mxu0  ;;  %v5956_v56 = vadd.f32 %v13405_v25, %v5754_v17  ;;  %v5959_v25 = vadd.f32 %v13409_v57, %v5757_v21  ;;  %v6190_v54 = vadd.f32 %v6130_v39, %v5954_v38  ;;  %v5960_v57 = vadd.f32 %v13415_v61, %v5758_v18  ;;  %v13726_v18 = vld [vmem:[#allocation26_spill] sm:$0xff] }
 0x282   : > { %13717 = vst [vmem:[#allocation2_spill] sm:$0xff] %v13467_v27  ;;  %v13470_v51 = vpop.f32.mrf.mxu1  ;;  %v5953_v27 = vadd.f32 %v5891_v28, %v5751_v36  ;;  %v5759_v39 = vadd.f32 %v13425_v37, %v13378_v3  ;;  %v13526_v3 = vld [vmem:[%s13601_s2] ss:$0 sm:$0xff] }
 0x283   : > { %13718 = vst [vmem:[#allocation10_spill] sm:$0xff] %v13470_v51  ;;  %v13472_v24 = vpop.f32.mrf.mxu0  ;;  %v6192_v36 = vadd.f32 %v10273_v40, %v5956_v56  ;;  %v6195_v2 = vadd.f32 %v10276_v52, %v5959_v25  ;;  %v13722_v56 = vld [vmem:[#allocation19_spill] sm:$0xff] }
 0x284   : > { %13719 = vst [vmem:[#allocation16_spill] sm:$0xff] %v13472_v24  ;;  %v13475_v15 = vpop.f32.mrf.mxu1  ;;  %v5765_v21 = vadd.f32 %v13722_v56, %v13394_v45 }
 0x285   : > { %13720 = vst [vmem:[#allocation23_spill] sm:$0xff] %v13475_v15  ;;  %v13477_v7 = vpop.f32.mrf.mxu0  ;;  %v6189_v15 = vadd.f32 %v6127_v55, %v5953_v27  ;;  %v6497_v61 = vadd.f32 %v13449_v26, %v6195_v2 }
 0x286   : > { %13721 = vst [vmem:[#allocation22_spill] sm:$0xff] %v13477_v7  ;;  %v13480_v53 = vpop.f32.mrf.mxu1  ;;  %v13728_v34 = vld [vmem:[#allocation14_spill] sm:$0xff] }
 0x287   : > { %v13482_v22 = vpop.f32.mrf.mxu0  ;;  %v6491_v35 = vadd.f32 %v6429_v13, %v6189_v15  ;;  %v5761_v15 = vadd.f32 %v13421_v60, %v13372_v48  ;;  %v6492_v13 = vadd.f32 %v6432_v32, %v6190_v54 }
 0x288   : > { %v13485_v51 = vpop.f32.mrf.mxu1 }
 0x289   : > { %v10285_v24 = vpop.f32.mrf.mxu0  ;;  %v5963_v32 = vadd.f32 %v13423_v4, %v5761_v15  ;;  %v5961_v4 = vadd.f32 %v13427_v8, %v5759_v39  ;;  %v13723_v8 = vld [vmem:[#allocation11_spill] sm:$0xff] }
 0x28a   : > { %v10317_v7 = vpop.f32.mrf.mxu1  ;;  %v6494_v24 = vadd.f32 %v10305_v62, %v6192_v36  ;;  %v5958_v62 = vadd.f32 %v13419_v31, %v5756_v42  ;;  %v6495_v31 = vadd.f32 %v13451_v11, %v6193_v9  ;;  %v13733_v9 = vld [vmem:[#allocation12_spill] sm:$0xff] }
 0x28b   : > { %v13490_v43 = vpop.f32.mrf.mxu0  ;;  %v6196_v7 = vadd.f32 %v10277_v30, %v5960_v57  ;;  %v6199_v11 = vadd.f32 %v13459_v23, %v5963_v32  ;;  %v13725_v23 = vld [vmem:[#allocation18_spill] sm:$0xff]  ;;  %v13732_v57 = vld [vmem:[#allocation16_spill] sm:$0xff] }
 0x28c   : > { %v13493_v28 = vpop.f32.mrf.mxu1  ;;  %v6194_v6 = vadd.f32 %v13455_v19, %v5958_v62  ;;  %v5962_v36 = vadd.f32 %v13725_v23, %v5760_v29  ;;  %v13739_v29 = vld [vmem:[#allocation7_spill] sm:$0xff] }
 0x28d   : > { %v10336_v12 = vpop.f32.mrf.mxu0  ;;  %v6498_v26 = vadd.f32 %v13453_v0, %v6196_v7  ;;  %v6501_v54 = vadd.f32 %v13728_v34, %v6199_v11  ;;  %v13737_v7 = vld [vmem:[#allocation22_spill] sm:$0xff] }
 0x28e   : > { %v6695_v27 = vadd.f32 %v10336_v12, %v6493_v33  ;;  %v13498_v10 = vpop.f32.mrf.mxu1  ;;  %v6496_v38 = vadd.f32 %v13723_v8, %v6194_v6  ;;  %v13724_v33 = vld [vmem:[#allocation15_spill] sm:$0xff]  ;;  %v13727_v12 = vld [vmem:[#allocation21_spill] sm:$0xff]  ;;  %v6198_v15 = vadd.f32 %v13732_v57, %v5962_v36 }
 0x28f   : > { %v6631_v49 = vpop.f32.mrf.mxu0  ;;  %v6197_v14 = vadd.f32 %v13724_v33, %v5961_v4  ;;  %v5763_v25 = vadd.f32 %v13727_v12, %v13726_v18 }
 0x290   : > { %v6710_v59 = vadd.f32 %v13100_v58, %v6695_v27  ;;  %v6693_v50 = vadd.f32 %v6631_v49, %v6491_v35  ;;  %v13504_v16 = vpop.f32.mrf.mxu1  ;;  %v13729_v27 = vld [vmem:[#allocation2_spill] sm:$0xff]  ;;  %v13730_v49 = vld [vmem:[#allocation8_spill] sm:$0xff] }
 0x291   : > { %v10337_v55 = vpop.f32.mrf.mxu0  ;;  %v6200_v45 = vadd.f32 %v13729_v27, %v5964_v20 }
 0x292   : > { %6725 = vst [vmem:[%s12365_s4 + $0x100] sm:$0xff] %v6710_v59  ;;  %v6708_v47 = vadd.f32 %v13100_v58, %v6693_v50  ;;  %v6696_v5 = vadd.f32 %v10337_v55, %v6494_v24  ;;  %v10369_v40 = vpop.f32.mrf.mxu1  ;;  %v5967_v24 = vadd.f32 %v13730_v49, %v5765_v21  ;;  %v13731_v59 = vld [vmem:[#allocation3_spill] sm:$0xff] }
 0x293   : > { %v6634_v52 = vpop.f32.mrf.mxu0  ;;  %v6499_v50 = vadd.f32 %v13731_v59, %v6197_v14  ;;  %v13735_v40 = vld [vmem:[#allocation20_spill] sm:$0xff] }
 0x294   : > { %6723 = vst [vmem:[%s12365_s4 + $0xf0] sm:$0xff] %v6708_v47  ;;  %v6711_v48 = vadd.f32 %v13100_v58, %v6696_v5  ;;  %v6694_v60 = vadd.f32 %v6634_v52, %v6492_v13  ;;  %v5965_v47 = vadd.f32 %v13733_v9, %v5763_v25  ;;  %v13734_v5 = vld [vmem:[#allocation27_spill] sm:$0xff]  ;;  %v13736_v52 = vld [vmem:[#allocation10_spill] sm:$0xff] }
 0x295   : > { %v10340_v17 = vpop.f32.mrf.mxu0  ;;  %v5764_v62 = vadd.f32 %v13735_v40, %v13734_v5 }
 0x296   : > { %6726 = vst [vmem:[%s12365_s4 + $0x108] sm:$0xff] %v6711_v48  ;;  %v6709_v58 = vadd.f32 %v13526_v3, %v6694_v60  ;;  %v6699_v37 = vadd.f32 %v10340_v17, %v6497_v61  ;;  %v6502_v61 = vadd.f32 %v13736_v52, %v6200_v45  ;;  %v6203_v48 = vadd.f32 %v13737_v7, %v5967_v24  ;;  %v13738_v17 = vld [vmem:[#allocation23_spill] sm:$0xff] }
 0x297   : > { %v6647_v41 = vpop.f32.mrf.mxu0  ;;  %v6201_v6 = vadd.f32 %v13482_v22, %v5965_v47 }
 0x298   : > { %6724 = vst [vmem:[%s12365_s4 + $0xf8] sm:$0xff] %v6709_v58  ;;  %v6714_v30 = vadd.f32 %v13526_v3, %v6699_v37  ;;  %v6697_v19 = vadd.f32 %v6647_v41, %v6495_v31  ;;  %v6500_v31 = vadd.f32 %v13738_v17, %v6198_v15  ;;  %v5966_v41 = vadd.f32 %v13739_v29, %v5764_v62 }
 0x299   : > { %v10341_v46 = vpop.f32.mrf.mxu0  ;;  %v6503_v20 = vadd.f32 %v13485_v51, %v6201_v6  ;;  %v6886_v51 = vpop.f32.mrf.mxu1 }
 0x29a   : > { %6729 = vst [vmem:[%s12365_s4 + $0x120] sm:$0xff] %v6714_v30  ;;  %v6712_v1 = vadd.f32 %v13526_v3, %v6697_v19  ;;  %v6700_v0 = vadd.f32 %v10341_v46, %v6498_v26  ;;  %v6505_v26 = vadd.f32 %v13480_v53, %v6203_v48  ;;  %v6202_v22 = vadd.f32 %v13490_v43, %v5966_v41 }
 0x29b   : > { %v6650_v35 = vpop.f32.mrf.mxu0 }
 0x29c   : > { %6727 = vst [vmem:[%s12365_s4 + $0x110] sm:$0xff] %v6712_v1  ;;  %v6715_v63 = vadd.f32 %v13526_v3, %v6700_v0  ;;  %v6698_v42 = vadd.f32 %v6650_v35, %v6496_v38  ;;  %v6504_v33 = vadd.f32 %v13493_v28, %v6202_v22 }
 0x29d   : > { %v10344_v2 = vpop.f32.mrf.mxu0 }
 0x29e   : > { %6730 = vst [vmem:[%s12365_s4 + $0x128] sm:$0xff] %v6715_v63  ;;  %v6713_v55 = vadd.f32 %v13526_v3, %v6698_v42  ;;  %v6703_v13 = vadd.f32 %v10344_v2, %v6501_v54 }
 0x29f   : > { %v6663_v39 = vpop.f32.mrf.mxu0 }
 0x2a0   : > { %6728 = vst [vmem:[%s12365_s4 + $0x118] sm:$0xff] %v6713_v55  ;;  %v6718_v60 = vadd.f32 %v13526_v3, %v6703_v13  ;;  %v6701_v32 = vadd.f32 %v6663_v39, %v6499_v50 }
 0x2a1   : > { %v10345_v44 = vpop.f32.mrf.mxu0 }
 0x2a2   : > { %6733 = vst [vmem:[%s12365_s4 + $0x140] sm:$0xff] %v6718_v60  ;;  %v6716_v58 = vadd.f32 %v13526_v3, %v6701_v32  ;;  %v6704_v37 = vadd.f32 %v10345_v44, %v6502_v61 }
 0x2a3   : > { %v6666_v4 = vpop.f32.mrf.mxu0 }
 0x2a4   : > { %6731 = vst [vmem:[%s12365_s4 + $0x130] sm:$0xff] %v6716_v58  ;;  %v6719_v11 = vadd.f32 %v13526_v3, %v6704_v37  ;;  %v6702_v30 = vadd.f32 %v6666_v4, %v6500_v31 }
 0x2a5   : > { %v10348_v19 = vpop.f32.mrf.mxu0 }
 0x2a6   : > { %6734 = vst [vmem:[%s12365_s4 + $0x148] sm:$0xff] %v6719_v11  ;;  %v6717_v56 = vadd.f32 %v13526_v3, %v6702_v30  ;;  %v6707_v21 = vadd.f32 %v10348_v19, %v6505_v26 }
 0x2a7   : > { %v6679_v46 = vpop.f32.mrf.mxu0 }
 0x2a8   : > { %6732 = vst [vmem:[%s12365_s4 + $0x138] sm:$0xff] %v6717_v56  ;;  %v6722_v53 = vadd.f32 %v13526_v3, %v6707_v21  ;;  %v6705_v8 = vadd.f32 %v6679_v46, %v6503_v20 }
 0x2a9   : > { %v10349_v38 = vpop.f32.mrf.mxu0 }
 0x2aa   : > { %6737 = vst [vmem:[%s12365_s4 + $0x160] sm:$0xff] %v6722_v53  ;;  %v6720_v14 = vadd.f32 %v13526_v3, %v6705_v8 }
 0x2ab   : > { %v6682_v1 = vpop.f32.mrf.mxu0 }
 0x2ac   : > { %6735 = vst [vmem:[%s12365_s4 + $0x150] sm:$0xff] %v6720_v14  ;;  %v6706_v43 = vadd.f32 %v6682_v1, %v6504_v33 }
 0x2ad   : > { %v10388_v0 = vpop.f32.mrf.mxu0 }
 0x2ae   : > { %v6721_v23 = vadd.f32 %v13526_v3, %v6706_v43  ;;  %v6991_v36 = vadd.f32 %v10388_v0, %v13498_v10  ;;  %v10408_v18 = vpop.f32.mrf.mxu1 }
 0x2af   : > { %v6982_v12 = vpop.f32.mrf.mxu0 }
 0x2b0   : > { %6736 = vst [vmem:[%s12365_s4 + $0x158] sm:$0xff] %v6721_v23  ;;  %v7119_v25 = vadd.f32 %v10408_v18, %v6991_v36  ;;  %v6983_v35 = vadd.f32 %v6982_v12, %v13504_v16  ;;  %v7103_v34 = vpop.f32.mrf.mxu1 }
 0x2b1   : > { %v10389_v28 = vpop.f32.mrf.mxu0 }
 0x2b2   : > { %v7117_v54 = vadd.f32 %v7103_v34, %v6983_v35  ;;  %v10409_v27 = vpop.f32.mrf.mxu1 }
 0x2b3   : > { %v6985_v45 = vpop.f32.mrf.mxu0 }
 0x2b4   : > { %v7106_v63 = vpop.f32.mrf.mxu1  ;;  %v6986_v5 = vadd.f32 %v6985_v45, %v6886_v51 }
 0x2b6   : > { %v7118_v39 = vadd.f32 %v7106_v63, %v6986_v5 }
 0x2cd   : > { %v10428_v42 = vpop.f32.mrf.mxu0 }
 0x2ce   : > { %v10448_v49 = vpop.f32.mrf.mxu1  ;;  %v7247_v40 = vadd.f32 %v10428_v42, %v7119_v25 }
 0x2cf   : > { %v7231_v24 = vpop.f32.mrf.mxu0 }
 0x2d0   : > { %v7377_v2 = vpop.f32.mrf.mxu1  ;;  %v7245_v62 = vadd.f32 %v7231_v24, %v7117_v54  ;;  %v7393_v52 = vadd.f32 %v10448_v49, %v7247_v40 }
 0x2d1   : > { %v10429_v59 = vpop.f32.mrf.mxu0 }
 0x2d2   : > { %v10449_v50 = vpop.f32.mrf.mxu1  ;;  %v7391_v61 = vadd.f32 %v7377_v2, %v7245_v62 }
 0x2d3   : > { %v7234_v57 = vpop.f32.mrf.mxu0 }
 0x2d4   : > { %v7380_v10 = vpop.f32.mrf.mxu1  ;;  %v7246_v7 = vadd.f32 %v7234_v57, %v7118_v39 }
 0x2d6   : > { %v7392_v44 = vadd.f32 %v7380_v10, %v7246_v7 }
 0x2ed   : > { %v10468_v15 = vpop.f32.mrf.mxu0 }
 0x2ee   : > { %v10488_v55 = vpop.f32.mrf.mxu1  ;;  %v7517_v48 = vadd.f32 %v10468_v15, %v7393_v52 }
 0x2ef   : > { %v7501_v13 = vpop.f32.mrf.mxu0 }
 0x2f0   : > { %v7629_v9 = vpop.f32.mrf.mxu1  ;;  %v7515_v60 = vadd.f32 %v7501_v13, %v7391_v61  ;;  %v7645_v17 = vadd.f32 %v10488_v55, %v7517_v48 }
 0x2f1   : > { %v10469_v47 = vpop.f32.mrf.mxu0 }
 0x2f2   : > { %v10489_v16 = vpop.f32.mrf.mxu1  ;;  %v7643_v58 = vadd.f32 %v7629_v9, %v7515_v60 }
 0x2f3   : > { %v7504_v32 = vpop.f32.mrf.mxu0 }
 0x2f4   : > { %v7632_v31 = vpop.f32.mrf.mxu1  ;;  %v7516_v37 = vadd.f32 %v7504_v32, %v7392_v44 }
 0x2f6   : > { %v7644_v20 = vadd.f32 %v7632_v31, %v7516_v37 }
 0x30d   : > { %v10508_v6 = vpop.f32.mrf.mxu0 }
 0x30e   : > { %v7791_v4 = vadd.f32 %v10508_v6, %v7645_v17  ;;  %v10528_v29 = vpop.f32.mrf.mxu1 }
 0x30f   : > { %v7775_v41 = vpop.f32.mrf.mxu0 }
 0x310   : > { %v7915_v26 = vadd.f32 %v10528_v29, %v7791_v4  ;;  %v7789_v11 = vadd.f32 %v7775_v41, %v7643_v58  ;;  %v7899_v30 = vpop.f32.mrf.mxu1 }
 0x311   : > { %v10509_v19 = vpop.f32.mrf.mxu0 }
 0x312   : > { %v7918_v22 = vadd.f32 %v13526_v3, %v7915_v26  ;;  %v7913_v56 = vadd.f32 %v7899_v30, %v7789_v11  ;;  %v10529_v21 = vpop.f32.mrf.mxu1 }
 0x313   : > { %v7778_v46 = vpop.f32.mrf.mxu0 }
 0x314   : > { %7921 = vst [vmem:[%s12365_s4 + $0x178] sm:$0xff] %v7918_v22  ;;  %v7916_v53 = vadd.f32 %v13526_v3, %v7913_v56  ;;  %v7790_v8 = vadd.f32 %v7778_v46, %v7644_v20  ;;  %v7902_v38 = vpop.f32.mrf.mxu1 }
 0x316   : > { %7919 = vst [vmem:[%s12365_s4 + $0x168] sm:$0xff] %v7916_v53  ;;  %v7914_v33 = vadd.f32 %v7902_v38, %v7790_v8 }
 0x318   : > { %v7917_v14 = vadd.f32 %v13526_v3, %v7914_v33 }
 0x31a   : > { %7920 = vst [vmem:[%s12365_s4 + $0x170] sm:$0xff] %v7917_v14 }
 0x31b PF: > { %s13_s14 = sadd.s32 1, %s11014_s14   ;;  %s13740_s12 = smov %s11010_s13 }
 0x31c   : > { %p10_p5 = scmp.ge.s32.totalorder %s13_s14, 4   ;;  %s13741_s13 = smov %s13743_s15 }
 0x31e   :  { %12 = sbr.rel (!%p10_p5) target bundleno = 2 (0x2), region = 73 }

</bundles_post_ra>
